<compile_context>
chip_gen: v7x
topology: tpu7x:2x2x1
jax: 0.10.0
libtpu: 0.0.40
codegen_flags: <defaults>
</compile_context>

<pallas_src>
import jax
import jax.numpy as jnp
from jax import lax
from jax.experimental import pallas as pl
from jax.experimental.pallas import tpu as pltpu

N = 16                 # graph_size (nodes per graph)
F = 32                 # feature_size
NUM_ITERS = 5          # aggregation rounds (fixed in the torch module)
TWO_N = 2 * N          # nodes per fused pair (graph1 | graph2)
B_TILE = 16            # graph pairs per grid step (v6e/v7x; use 4-8 on v5e)
COLS = B_TILE * TWO_N  # fused lane dim per tile (512)
MXU_DTYPE = jnp.bfloat16  # MXU operand dtype (f32 accumulation kept)


def gnn_kernel(x0_ref, bd_ref, w_ref, sel_ref, lwt_ref, lb_ref, out_ref):
    f32 = jnp.float32

    x = x0_ref[...]            # [F, COLS]  bf16 (embedding replicated per graph)
    bd = bd_ref[0]             # [COLS, COLS] bf16 block-diagonal adjacency
    w = w_ref[...]             # [F, F]     bf16

    # ---- 5 aggregation rounds; both graphs of all B_TILE pairs fused:
    #      2 wide bf16 MXU ops (f32 accumulate) + 1 wide relu per round. ----
    for _ in range(NUM_ITERS):
        agg = jnp.dot(x, bd, preferred_element_type=f32)              # [F, COLS]
        x = jnp.maximum(
            jnp.dot(w, agg.astype(MXU_DTYPE), preferred_element_type=f32), 0.0
        ).astype(MXU_DTYPE)

    # ---- Per-graph node mean: one fused MXU op with the precomputed selector.
    #      means[:, :B_TILE] = graph-1 means, means[:, B_TILE:] = graph-2 means.
    means = jnp.dot(x, sel_ref[...], preferred_element_type=f32)      # [F, 2*B_TILE]
    m1 = means[:, :B_TILE]
    m2 = means[:, B_TILE:]

    # ---- Final linear as small MXU matmuls, written as a [B_TILE, 2] slab. ----
    lwt = lwt_ref[...].astype(f32)                                    # [2F, 2]
    dn = (((0,), (0,)), ((), ()))                                     # contract feature axis
    scores = (lax.dot_general(m1, lwt[:F, :], dn, preferred_element_type=f32)
              + lax.dot_general(m2, lwt[F:, :], dn, preferred_element_type=f32)
              + lb_ref[...].astype(f32))                              # [B_TILE, 2]
    out_ref[0] = scores.astype(out_ref.dtype)


def _precompute_constants(embedding):
    """Host/XLA-side constants, loaded once into VMEM (constant index_maps)."""
    # Embedding replicated for every graph copy: columns [k*N, (k+1)*N) = embedding.
    x0 = jnp.tile(embedding, (1, 2 * B_TILE)).astype(MXU_DTYPE)        # [F, COLS]
    # Mean-pooling selector: column b selects graph-1 of pair b, column
    # B_TILE+b selects graph-2 of pair b, each with weight 1/N (exact in bf16).
    rows = jnp.arange(COLS)
    pair = rows // TWO_N
    is_g1 = (rows % TWO_N) < N
    c = jnp.arange(2 * B_TILE)[None, :]
    sel1 = is_g1[:, None] & (c == pair[:, None])
    sel2 = (~is_g1)[:, None] & (c == (pair[:, None] + B_TILE))
    sel = ((sel1 | sel2).astype(jnp.float32) / N).astype(MXU_DTYPE)    # [COLS, 2*B_TILE]
    return x0, sel


def _precompute_block_diag(g1b, g2b):
    """[B, N, N] x2 -> [num_blocks, COLS, COLS] bf16 block-diagonal (HBM input)."""
    B = g1b.shape[0]
    num_blocks = B // B_TILE
    pair_bd = jnp.zeros((B, TWO_N, TWO_N), jnp.float32)
    pair_bd = pair_bd.at[:, :N, :N].set(g1b.astype(jnp.float32))
    pair_bd = pair_bd.at[:, N:, N:].set(g2b.astype(jnp.float32))
    pb = pair_bd.reshape(num_blocks, B_TILE, TWO_N, TWO_N)
    eye = jnp.eye(B_TILE, dtype=jnp.float32)
    tiled = jnp.einsum('bpij,pq->bpiqj', pb, eye)                      # [nb,BT,2N,BT,2N]
    return tiled.reshape(num_blocks, COLS, COLS).astype(MXU_DTYPE)


def _gnn_pallas_batched(embedding, g1b, g2b, aggr_w, lin_w_t, lin_b):
    """g1b/g2b: [B, N, N] with B a multiple of B_TILE -> scores [B, 2]."""
    num_blocks = g1b.shape[0] // B_TILE
    x0, sel = _precompute_constants(embedding)
    bd = _precompute_block_diag(g1b, g2b)
    w_bf16 = aggr_w.astype(MXU_DTYPE)

    out = pl.pallas_call(
        gnn_kernel,
        out_shape=jax.ShapeDtypeStruct((num_blocks, B_TILE, 2), jnp.float32),
        grid=(num_blocks,),
        in_specs=[
            pl.BlockSpec((F, COLS), lambda i: (0, 0)),            # x0 (constant)
            pl.BlockSpec((1, COLS, COLS), lambda i: (i, 0, 0)),   # block-diag adjacency
            pl.BlockSpec((F, F), lambda i: (0, 0)),               # aggregation weight
            pl.BlockSpec((COLS, 2 * B_TILE), lambda i: (0, 0)),   # mean selector
            pl.BlockSpec((2 * F, 2), lambda i: (0, 0)),           # linear weight^T
            pl.BlockSpec((1, 2), lambda i: (0, 0)),               # linear bias
        ],
        out_specs=pl.BlockSpec((1, B_TILE, 2), lambda i: (i, 0, 0)),
        compiler_params=pltpu.CompilerParams(
            dimension_semantics=("parallel",)),   # batch tiles shard across v7x's 2 TCs
    )(x0, bd, w_bf16, sel, lin_w_t, lin_b)
    return out.reshape(num_blocks * B_TILE, 2)


def gnn_forward(embedding, g1, g2, aggr_w, lin_w_t, lin_b):
    """g1/g2: [N, N] (single pair, matches torch forward) or [B, N, N] (batch).
    Returns [1, 2] (single) or [B, 2] (batch)."""
    single = g1.ndim == 2
    if single:
        g1 = g1[None]
        g2 = g2[None]
    B = g1.shape[0]
    pad = (-B) % B_TILE
    if pad:
        g1 = jnp.concatenate([g1, jnp.broadcast_to(g1[-1:], (pad, N, N))], axis=0)
        g2 = jnp.concatenate([g2, jnp.broadcast_to(g2[-1:], (pad, N, N))], axis=0)
    out = _gnn_pallas_batched(embedding, g1, g2, aggr_w, lin_w_t, lin_b)[:B]
    return out[0:1] if single else out


def reference_forward(embedding, g1, g2, aggr_w, lin_w_t, lin_b):
    """Pure-JAX f32 reference for a single pair (mirrors the torch module)."""
    f1 = embedding
    f2 = embedding
    for _ in range(NUM_ITERS):
        f1 = jnp.maximum(aggr_w @ (f1 @ g1), 0.0)
        f2 = jnp.maximum(aggr_w @ (f2 @ g2), 0.0)
    m1 = jnp.mean(f1, axis=1)
    m2 = jnp.mean(f2, axis=1)
    combine = jnp.concatenate([m1, m2], axis=0).reshape(1, -1)
    return combine @ lin_w_t + lin_b


if __name__ == "__main__":
    B_TOTAL = 32  # graph pairs in the demo batch -> 2 grid steps of 16 pairs

    key = jax.random.PRNGKey(0)
    k_emb, k_w, k_lw, k_lb, k_g1, k_g2 = jax.random.split(key, 6)

    # deterministic parameter init, matching reset_parameters() in spirit
    embedding = jax.random.normal(k_emb, (F, N), dtype=jnp.float32)
    aggr_w = jax.random.normal(k_w, (F, F), dtype=jnp.float32) / jnp.sqrt(F)
    lin_w = jax.random.normal(k_lw, (2, 2 * F), dtype=jnp.float32)   # torch layout [out, in]
    lin_w_t = lin_w.T                                                # [2F, 2] for x @ W^T
    lin_b = jax.random.normal(k_lb, (1, 2), dtype=jnp.float32)

    # synthetic symmetric adjacency matrices for B_TOTAL pairs (lightly scaled)
    a1 = (jax.random.uniform(k_g1, (B_TOTAL, N, N)) < 0.3).astype(jnp.float32)
    a2 = (jax.random.uniform(k_g2, (B_TOTAL, N, N)) < 0.3).astype(jnp.float32)
    eye = jnp.eye(N, dtype=jnp.float32)
    g1b = (jnp.maximum(a1, jnp.swapaxes(a1, 1, 2)) + eye) * 0.5
    g2b = (jnp.maximum(a2, jnp.swapaxes(a2, 1, 2)) + eye) * 0.5

    # batched kernel run
    scores = gnn_forward(embedding, g1b, g2b, aggr_w, lin_w_t, lin_b)
    jax.block_until_ready(scores)
    assert scores.shape == (B_TOTAL, 2)

    # pure-JAX f32 reference, pair by pair
    ref = jnp.concatenate(
        [reference_forward(embedding, g1b[i], g2b[i], aggr_w, lin_w_t, lin_b)
         for i in range(B_TOTAL)], axis=0)

    # bf16 MXU operands -> tolerance loosened relative to the f32 reference
    scale = jnp.max(jnp.abs(ref))
    max_err = jnp.max(jnp.abs(scores - ref))
    assert max_err <= 5e-2 * scale, (float(max_err), float(scale))

    # single-pair path (matches the original module's forward(g1, g2) signature)
    s0 = gnn_forward(embedding, g1b[0], g2b[0], aggr_w, lin_w_t, lin_b)
    jax.block_until_ready(s0)
    assert s0.shape == (1, 2)
    assert jnp.max(jnp.abs(s0 - ref[0:1])) <= 5e-2 * scale, (s0, ref[0:1])

    print("KERNEL_OK")
</pallas_src>

<mosaic_0001>
module attributes {stable_mosaic.version = 11 : i64} {
  func.func @gnn_kernel(%arg0: i32, %arg1: memref<32x512xbf16, #tpu.memory_space<vmem>>, %arg2: memref<1x512x512xbf16, #tpu.memory_space<vmem>>, %arg3: memref<32x32xbf16, #tpu.memory_space<vmem>>, %arg4: memref<512x32xbf16, #tpu.memory_space<vmem>>, %arg5: memref<64x2xf32, #tpu.memory_space<vmem>>, %arg6: memref<1x2xf32, #tpu.memory_space<vmem>>, %arg7: memref<1x16x2xf32, #tpu.memory_space<vmem>>) attributes {dimension_semantics = [#tpu.dimension_semantics<parallel>], iteration_bounds = array<i64: 2>, scalar_prefetch = 0 : i64, scratch_operands = 0 : i64, tpu.core_type = #tpu.core_type<tc>, window_params = [{pipeline_mode = #tpu.pipeline_mode<synchronous>, transform_indices = @transform_0, window_bounds = array<i64: 32, 512>}, {transform_indices = @transform_1, window_bounds = array<i64: 1, 512, 512>}, {pipeline_mode = #tpu.pipeline_mode<synchronous>, transform_indices = @transform_2, window_bounds = array<i64: 32, 32>}, {pipeline_mode = #tpu.pipeline_mode<synchronous>, transform_indices = @transform_3, window_bounds = array<i64: 512, 32>}, {pipeline_mode = #tpu.pipeline_mode<synchronous>, transform_indices = @transform_4, window_bounds = array<i64: 64, 2>}, {pipeline_mode = #tpu.pipeline_mode<synchronous>, transform_indices = @transform_5, window_bounds = array<i64: 1, 2>}, {transform_indices = @transform_6, window_bounds = array<i64: 1, 16, 2>}]} {
    %c0 = arith.constant 0 : index
    %c0_0 = arith.constant 0 : index
    %0 = vector.load %arg1[%c0, %c0_0] : memref<32x512xbf16, #tpu.memory_space<vmem>>, vector<32x512xbf16>
    %c0_1 = arith.constant 0 : index
    %c0_2 = arith.constant 0 : index
    %c0_3 = arith.constant 0 : index
    %1 = vector.load %arg2[%c0_1, %c0_2, %c0_3] : memref<1x512x512xbf16, #tpu.memory_space<vmem>>, vector<1x512x512xbf16>
    %2 = vector.shape_cast %1 : vector<1x512x512xbf16> to vector<512x512xbf16>
    %c0_4 = arith.constant 0 : index
    %c0_5 = arith.constant 0 : index
    %3 = vector.load %arg3[%c0_4, %c0_5] : memref<32x32xbf16, #tpu.memory_space<vmem>>, vector<32x32xbf16>
    %cst = arith.constant dense<0.000000e+00> : vector<32x512xf32>
    %4 = tpu.matmul %0, %2, %cst {dimension_numbers = #tpu.dot_dimension_numbers<[1], [0], [0], [1], [0, 0, 1, 1], [], []>} : vector<32x512xbf16>, vector<512x512xbf16>, vector<32x512xf32> -> vector<32x512xf32>
    %5 = arith.truncf %4 : vector<32x512xf32> to vector<32x512xbf16>
    %cst_6 = arith.constant dense<0.000000e+00> : vector<32x512xf32>
    %6 = tpu.matmul %3, %5, %cst_6 {dimension_numbers = #tpu.dot_dimension_numbers<[1], [0], [0], [1], [0, 0, 1, 1], [], []>} : vector<32x32xbf16>, vector<32x512xbf16>, vector<32x512xf32> -> vector<32x512xf32>
    %cst_7 = arith.constant 0.000000e+00 : f32
    %7 = vector.broadcast %cst_7 : f32 to vector<32x512xf32>
    %8 = arith.maximumf %6, %7 : vector<32x512xf32>
    %9 = arith.truncf %8 : vector<32x512xf32> to vector<32x512xbf16>
    %cst_8 = arith.constant dense<0.000000e+00> : vector<32x512xf32>
    %10 = tpu.matmul %9, %2, %cst_8 {dimension_numbers = #tpu.dot_dimension_numbers<[1], [0], [0], [1], [0, 0, 1, 1], [], []>} : vector<32x512xbf16>, vector<512x512xbf16>, vector<32x512xf32> -> vector<32x512xf32>
    %11 = arith.truncf %10 : vector<32x512xf32> to vector<32x512xbf16>
    %cst_9 = arith.constant dense<0.000000e+00> : vector<32x512xf32>
    %12 = tpu.matmul %3, %11, %cst_9 {dimension_numbers = #tpu.dot_dimension_numbers<[1], [0], [0], [1], [0, 0, 1, 1], [], []>} : vector<32x32xbf16>, vector<32x512xbf16>, vector<32x512xf32> -> vector<32x512xf32>
    %cst_10 = arith.constant 0.000000e+00 : f32
    %13 = vector.broadcast %cst_10 : f32 to vector<32x512xf32>
    %14 = arith.maximumf %12, %13 : vector<32x512xf32>
    %15 = arith.truncf %14 : vector<32x512xf32> to vector<32x512xbf16>
    %cst_11 = arith.constant dense<0.000000e+00> : vector<32x512xf32>
    %16 = tpu.matmul %15, %2, %cst_11 {dimension_numbers = #tpu.dot_dimension_numbers<[1], [0], [0], [1], [0, 0, 1, 1], [], []>} : vector<32x512xbf16>, vector<512x512xbf16>, vector<32x512xf32> -> vector<32x512xf32>
    %17 = arith.truncf %16 : vector<32x512xf32> to vector<32x512xbf16>
    %cst_12 = arith.constant dense<0.000000e+00> : vector<32x512xf32>
    %18 = tpu.matmul %3, %17, %cst_12 {dimension_numbers = #tpu.dot_dimension_numbers<[1], [0], [0], [1], [0, 0, 1, 1], [], []>} : vector<32x32xbf16>, vector<32x512xbf16>, vector<32x512xf32> -> vector<32x512xf32>
    %cst_13 = arith.constant 0.000000e+00 : f32
    %19 = vector.broadcast %cst_13 : f32 to vector<32x512xf32>
    %20 = arith.maximumf %18, %19 : vector<32x512xf32>
    %21 = arith.truncf %20 : vector<32x512xf32> to vector<32x512xbf16>
    %cst_14 = arith.constant dense<0.000000e+00> : vector<32x512xf32>
    %22 = tpu.matmul %21, %2, %cst_14 {dimension_numbers = #tpu.dot_dimension_numbers<[1], [0], [0], [1], [0, 0, 1, 1], [], []>} : vector<32x512xbf16>, vector<512x512xbf16>, vector<32x512xf32> -> vector<32x512xf32>
    %23 = arith.truncf %22 : vector<32x512xf32> to vector<32x512xbf16>
    %cst_15 = arith.constant dense<0.000000e+00> : vector<32x512xf32>
    %24 = tpu.matmul %3, %23, %cst_15 {dimension_numbers = #tpu.dot_dimension_numbers<[1], [0], [0], [1], [0, 0, 1, 1], [], []>} : vector<32x32xbf16>, vector<32x512xbf16>, vector<32x512xf32> -> vector<32x512xf32>
    %cst_16 = arith.constant 0.000000e+00 : f32
    %25 = vector.broadcast %cst_16 : f32 to vector<32x512xf32>
    %26 = arith.maximumf %24, %25 : vector<32x512xf32>
    %27 = arith.truncf %26 : vector<32x512xf32> to vector<32x512xbf16>
    %cst_17 = arith.constant dense<0.000000e+00> : vector<32x512xf32>
    %28 = tpu.matmul %27, %2, %cst_17 {dimension_numbers = #tpu.dot_dimension_numbers<[1], [0], [0], [1], [0, 0, 1, 1], [], []>} : vector<32x512xbf16>, vector<512x512xbf16>, vector<32x512xf32> -> vector<32x512xf32>
    %29 = arith.truncf %28 : vector<32x512xf32> to vector<32x512xbf16>
    %cst_18 = arith.constant dense<0.000000e+00> : vector<32x512xf32>
    %30 = tpu.matmul %3, %29, %cst_18 {dimension_numbers = #tpu.dot_dimension_numbers<[1], [0], [0], [1], [0, 0, 1, 1], [], []>} : vector<32x32xbf16>, vector<32x512xbf16>, vector<32x512xf32> -> vector<32x512xf32>
    %cst_19 = arith.constant 0.000000e+00 : f32
    %31 = vector.broadcast %cst_19 : f32 to vector<32x512xf32>
    %32 = arith.maximumf %30, %31 : vector<32x512xf32>
    %33 = arith.truncf %32 : vector<32x512xf32> to vector<32x512xbf16>
    %c0_20 = arith.constant 0 : index
    %c0_21 = arith.constant 0 : index
    %34 = vector.load %arg4[%c0_20, %c0_21] : memref<512x32xbf16, #tpu.memory_space<vmem>>, vector<512x32xbf16>
    %cst_22 = arith.constant dense<0.000000e+00> : vector<32x32xf32>
    %35 = tpu.matmul %33, %34, %cst_22 {dimension_numbers = #tpu.dot_dimension_numbers<[1], [0], [0], [1], [0, 0, 1, 1], [], []>} : vector<32x512xbf16>, vector<512x32xbf16>, vector<32x32xf32> -> vector<32x32xf32>
    %36 = vector.extract_strided_slice %35 {offsets = [0, 0], sizes = [32, 16], strides = [1, 1]} : vector<32x32xf32> to vector<32x16xf32>
    %37 = vector.extract_strided_slice %35 {offsets = [0, 16], sizes = [32, 16], strides = [1, 1]} : vector<32x32xf32> to vector<32x16xf32>
    %c0_23 = arith.constant 0 : index
    %c0_24 = arith.constant 0 : index
    %38 = vector.load %arg5[%c0_23, %c0_24] : memref<64x2xf32, #tpu.memory_space<vmem>>, vector<64x2xf32>
    %39 = vector.extract_strided_slice %38 {offsets = [0, 0], sizes = [32, 2], strides = [1, 1]} : vector<64x2xf32> to vector<32x2xf32>
    %cst_25 = arith.constant dense<0.000000e+00> : vector<16x2xf32>
    %40 = tpu.matmul %36, %39, %cst_25 {dimension_numbers = #tpu.dot_dimension_numbers<[0], [0], [1], [1], [0, 1, 1, 1], [], []>} : vector<32x16xf32>, vector<32x2xf32>, vector<16x2xf32> -> vector<16x2xf32>
    %41 = vector.extract_strided_slice %38 {offsets = [32, 0], sizes = [32, 2], strides = [1, 1]} : vector<64x2xf32> to vector<32x2xf32>
    %cst_26 = arith.constant dense<0.000000e+00> : vector<16x2xf32>
    %42 = tpu.matmul %37, %41, %cst_26 {dimension_numbers = #tpu.dot_dimension_numbers<[0], [0], [1], [1], [0, 1, 1, 1], [], []>} : vector<32x16xf32>, vector<32x2xf32>, vector<16x2xf32> -> vector<16x2xf32>
    %43 = arith.addf %40, %42 : vector<16x2xf32>
    %c0_27 = arith.constant 0 : index
    %c0_28 = arith.constant 0 : index
    %44 = vector.load %arg6[%c0_27, %c0_28] : memref<1x2xf32, #tpu.memory_space<vmem>>, vector<1x2xf32>
    %45 = vector.broadcast %44 : vector<1x2xf32> to vector<16x2xf32>
    %46 = arith.addf %43, %45 : vector<16x2xf32>
    %c0_29 = arith.constant 0 : index
    %c0_30 = arith.constant 0 : index
    %c0_31 = arith.constant 0 : index
    %47 = vector.load %arg7[%c0_29, %c0_30, %c0_31] : memref<1x16x2xf32, #tpu.memory_space<vmem>>, vector<1x16x2xf32>
    %48 = vector.shape_cast %47 : vector<1x16x2xf32> to vector<16x2xf32>
    %49 = vector.shape_cast %46 : vector<16x2xf32> to vector<1x16x2xf32>
    tpu.vector_store %arg7[%c0_29, %c0_30, %c0_31], %49 {strides = array<i32>} : memref<1x16x2xf32, #tpu.memory_space<vmem>>, vector<1x16x2xf32>,
    return
  }
  func.func @transform_0(%arg0: i32) -> (i32, i32) {
    %c0_i32 = arith.constant 0 : i32
    %c0_i32_0 = arith.constant 0 : i32
    %c0_i32_1 = arith.constant 0 : i32
    return %c0_i32, %c0_i32_0 : i32, i32
  }
  func.func @transform_1(%arg0: i32) -> (i32, i32, i32) {
    %c0_i32 = arith.constant 0 : i32
    %c0_i32_0 = arith.constant 0 : i32
    %c0_i32_1 = arith.constant 0 : i32
    return %arg0, %c0_i32, %c0_i32_0 : i32, i32, i32
  }
  func.func @transform_2(%arg0: i32) -> (i32, i32) {
    %c0_i32 = arith.constant 0 : i32
    %c0_i32_0 = arith.constant 0 : i32
    %c0_i32_1 = arith.constant 0 : i32
    return %c0_i32, %c0_i32_0 : i32, i32
  }
  func.func @transform_3(%arg0: i32) -> (i32, i32) {
    %c0_i32 = arith.constant 0 : i32
    %c0_i32_0 = arith.constant 0 : i32
    %c0_i32_1 = arith.constant 0 : i32
    return %c0_i32, %c0_i32_0 : i32, i32
  }
  func.func @transform_4(%arg0: i32) -> (i32, i32) {
    %c0_i32 = arith.constant 0 : i32
    %c0_i32_0 = arith.constant 0 : i32
    %c0_i32_1 = arith.constant 0 : i32
    return %c0_i32, %c0_i32_0 : i32, i32
  }
  func.func @transform_5(%arg0: i32) -> (i32, i32) {
    %c0_i32 = arith.constant 0 : i32
    %c0_i32_0 = arith.constant 0 : i32
    %c0_i32_1 = arith.constant 0 : i32
    return %c0_i32, %c0_i32_0 : i32, i32
  }
  func.func @transform_6(%arg0: i32) -> (i32, i32, i32) {
    %c0_i32 = arith.constant 0 : i32
    %c0_i32_0 = arith.constant 0 : i32
    %c0_i32_1 = arith.constant 0 : i32
    return %arg0, %c0_i32, %c0_i32_0 : i32, i32, i32
  }
}

</mosaic_0001>

<bundles_post_ra>
// kernel: tpu_custom_call.1
= control target key start
LH: loop header
LB: loop body
LE: loop exit
PB: predicated region body
PF: predicated region fallthrough
CT: control target
= control target key end

     0   :  { %11 = vsyncpa [#allocation3], 0  ;;  %s6243_s0 = inlined_call_operand.vmem [shape: bf16[32,512], index: 0, kind: input, shape index: {}]   ;;  %s6244_s1 = inlined_call_operand.hbm [shape: bf16[2,512,512], index: 1, kind: input, shape index: {}]   ;;  %s6245_s2 = inlined_call_operand.vmem [shape: bf16[32,32], index: 2, kind: input, shape index: {}]   ;;  %s6246_s3 = inlined_call_operand.vmem [shape: bf16[512,32], index: 3, kind: input, shape index: {}]   ;;  %s6247_s4 = inlined_call_operand.vmem [shape: f32[64,2], index: 4, kind: input, shape index: {}]   ;;  %s6248_s5 = inlined_call_operand.vmem [shape: f32[1,2], index: 5, kind: input, shape index: {}]   ;;  %s6249_s6 = inlined_call_operand.vmem [shape: f32[2,16,2], index: 6, kind: output, shape index: {}]  }
   0x1   :  { %13 = vsyncpa [#allocation3 + $0x1], 0  ;;  %s4466_s21 = smov 0   ;;  %s4468_s22 = smov 0  }
   0x2   :  { %s4470_s23 = smov 0   ;;  %s4472_s24 = smov 0  }
   0x3 LB: > { %s4485_s25 = sadd.s32 4294967295, %s4424_s24   ;;  %s4488_s26 = sadd.s32 1, %s4424_s24   ;;  %s4424_s24 = sphi %s4472_s24, %s6912_s24   ;;  %s4420_s23 = sphi %s4470_s23, %s6911_s23   ;;  %s4416_s22 = sphi %s4468_s22, %s6910_s22   ;;  %s4412_s21 = sphi %s4466_s21, %s6909_s21  }
   0x4   : > { %s44_s27 = ssub.s32 %s4424_s24, %s4488_s26  ;;  %s47_s28 = sadd.s32 1, %s4420_s23 }
   0x5   : > { %p45_p0 = scmp.eq.s32.totalorder %s44_s27, 0  ;;  %p54_p1 = scmp.ne.s32.totalorder %s4420_s23, %s4416_s22 }
   0x6   : > { %p55_p2 = scmp.eq.s32.totalorder %s4424_s24, 0  ;;  %p60_p3 = scmp.ne.s32.totalorder %s4416_s22, %s4412_s21 }
   0x7   : > { %s4498_s29 = scalar_select %p45_p0, %s4420_s23, %s47_s28  }
   0x8   : > { %p56_p4 = por %p55_p2, %p54_p1  ;;  %p61_p5 = scmp.eq.s32.totalorder %s4485_s25, 0 }
   0x9   : > { %p3946_p6 = scmp.lt.s32.totalorder %s4424_s24, 2  ;;  %s209_s7 = sand.u32 1, %s4420_s23  }
   0xa   : > { %p4502_p7 = por %p61_p5, %p60_p3  ;;  %s3546_s8 = sshll.u32 %s209_s7, 10 }
   0xb   : > { %s3750_s9 = sshll.u32 %s4424_s24, 14  ;;  %s213_s13 = scalar_lea.vmem [#allocation2], %s3546_s8 }
   0xc   : > { %s4511_s12 = scalar_lea.hbm %s6244_s1, %s3750_s9  ;;  %s220_s14 = sshll.u32 %s213_s13, 4  ;;  %s4513_s14 = int_to_ptr.vmem [resolvable:$true] %s220_s14 }
   0xd   : > { %p4515_p8 = pnand %p3946_p6, %p56_p4  ;;  %s4520_s16 = scalar_lea.sflag [#allocation3], %s209_s7 }
   0xe   : > { %s4360_s17 = scalar_lea.hbm %s4511_s12, 16384  ;;  %s4365_s20 = scalar_lea.hbm %s6244_s1, 32768 }
   0xf   : > { %p4361_p10 = scmp.ne.s32.totalorder %s4511_s12, %s4360_s17  ;;  %p4362_p11 = pneg %p4515_p8 }
  0x10   : > { %p4366_p0 = scmp.lt.u32.totalorder %s4511_s12, %s6244_s1  ;;  %p4367_p1 = scmp.lt.u32.totalorder %s4365_s20, %s4360_s17 }
  0x11   : > { %p4363_p12 = pnand %p4362_p11, %p4361_p10  ;;  %p4369_p3 = scmp.lt.u32.totalorder %s4360_s17, %s4511_s12 }
  0x12   : > { %p4368_p2 = por %p4367_p1, %p4366_p0 }
  0x13   : > { %p4364_p13 = pneg %p4363_p12 }
  0x14   : > { %p4370_p4 = por %p4369_p3, %p4368_p2 }
  0x16   : > { %p4371_p5 = pnand %p4370_p4, %p4364_p13 }
  0x18   : > { %4374 = shalt.err (!%p4371_p5)
}
  0x19   : > { %s4375_s28 = scalar_lea.vmem %s4513_s14, 16384  ;;  %s4426_s7 = smov [#allocation2]  }
  0x1a   : > { %p4376_p6 = scmp.ne.s32.totalorder %s4513_s14, %s4375_s28  ;;  %s4380_s8 = sshll.u32 %s4426_s7, 4  ;;  %s4381_s8 = int_to_ptr.vmem [resolvable:$false] %s4380_s8 }
  0x1b   : > { %s4382_s9 = scalar_lea.vmem %s4381_s8, 32768  ;;  %p4383_p9 = scmp.lt.s32.totalorder %s4513_s14, %s4381_s8 }
  0x1c   : > { %p4378_p10 = pnand %p4376_p6, %p4362_p11  ;;  %p4384_p0 = scmp.lt.s32.totalorder %s4382_s9, %s4375_s28 }
  0x1e   : > { %p4379_p12 = pneg %p4378_p10  ;;  %p4385_p1 = por %p4384_p0, %p4383_p9 }
  0x20   : > { %p4386_p2 = pnand %p4385_p1, %p4379_p12 }
  0x22   : > { %4389 = shalt.err (!%p4386_p2)
}
  0x23   : > { %s4427_s10 = smov 256   ;;  %s4428_s11 = smov 16  }
  0x24   : > { %3945 = dma.hbm_to_vmem [thread:$0]  (!%p4515_p8), %s4511_s12, 16384, %s4513_s14, %s4520_s16, %s4427_s10, %s4427_s10, %s4428_s11  }
  0x25   : > { %p228_p11 = scmp.lt.s32.totalorder %s4424_s24, 3  ;;  %p6513_p13 = scmp.ge.s32.totalorder %s4424_s24, 1 }
  0x27   : > { %p229_p3 = pnand %p6513_p13, %p228_p11 }
  0x29   : > { %232 = sbr.rel (%p229_p3) target bundleno = 3365 (0xd25), region = 44 }
  0x30   : > { %s234_s13 = sand.u32 1, %s4416_s22  }
  0x31   : > { %s3550_s17 = sshll.u32 %s234_s13, 10  ;;  %s235_s18 = scalar_lea.sflag [#allocation3], %s234_s13 }
  0x32   : > { %s4552_s19 = scalar_lea.vmem [#allocation2], %s3550_s17 }
  0x33   : > { %4407 = dma.done.wait (%p4502_p7), %s235_s18, 16384  }
  0x34   : > { %4409 = vsyncadd (%p4502_p7), %s235_s18, 4294950912  ;;  %v3984_v0 = vld [vmem:[%s4552_s19 + $0x4] ss:$16 sps:$4 sm:$0xff]   ;;  %v3986_v1 = vld [vmem:[%s4552_s19 + $0xc] ss:$16 sps:$4 sm:$0xff]   ;;  %vm1323_vm0 = vcmask 261120  }
  0x35   : > { %1093 = vmatprep.subr.bf16.mxu0 %v3984_v0  ;;  %v3988_v2 = vld [vmem:[%s4552_s19] ss:$16 sps:$4 sm:$0xff]   ;;  %v3989_v3 = vld [vmem:[%s4552_s19 + $0x8] ss:$16 sps:$4 sm:$0xff]   ;;  %1199 = vmatprep.subr.bf16.mxu1 %v3986_v1  ;;  %v3990_v4 = vld [vmem:[%s4552_s19 + $0x24] ss:$16 sps:$4 sm:$0xff]  }
  0x36   : > { %1094 = vmatpush1.bf16.msra.mxu0 %v3988_v2  ;;  %1200 = vmatpush1.bf16.msra.mxu1 %v3989_v3  ;;  %v3992_v5 = vld [vmem:[%s4552_s19 + $0x2c] ss:$16 sps:$4 sm:$0xff]   ;;  %v3994_v6 = vld [vmem:[%s4552_s19 + $0x20] ss:$16 sps:$4 sm:$0xff]   ;;  %v3995_v7 = vld [vmem:[%s4552_s19 + $0x28] ss:$16 sps:$4 sm:$0xff]  }
  0x37   : > { %1095 = vmatprep.subr.bf16.mxu0 %v3990_v4  ;;  %1201 = vmatprep.subr.bf16.mxu1 %v3992_v5  ;;  %v4567_v8 = vld [vmem:[%s4552_s19 + $0x44] ss:$16 sps:$4 sm:$0xff]   ;;  %v4570_v9 = vld [vmem:[%s4552_s19 + $0x4c] ss:$16 sps:$4 sm:$0xff]   ;;  %v4573_v10 = vld [vmem:[%s4552_s19 + $0x40] ss:$16 sps:$4 sm:$0xff]  }
  0x38   : > { %v4576_v11 = vld [vmem:[%s4552_s19 + $0x48] ss:$16 sps:$4 sm:$0xff]   ;;  %v4579_v12 = vld [vmem:[%s4552_s19 + $0x64] ss:$16 sps:$4 sm:$0xff]   ;;  %v4584_v13 = vld [vmem:[%s4552_s19 + $0x6c] ss:$16 sps:$4 sm:$0xff]  }
  0x39   : > { %v4587_v14 = vld [vmem:[%s4552_s19 + $0x60] ss:$16 sps:$4 sm:$0xff]   ;;  %v4592_v15 = vld [vmem:[%s4552_s19 + $0x68] ss:$16 sps:$4 sm:$0xff]   ;;  %v4595_v16 = vld [vmem:[%s4552_s19 + $0x84] ss:$16 sps:$4 sm:$0xff]  }
  0x3a   : > { %1096 = vmatpush1.bf16.msra.mxu0 %v3994_v6  ;;  %1202 = vmatpush1.bf16.msra.mxu1 %v3995_v7  ;;  %v4600_v17 = vld [vmem:[%s4552_s19 + $0x8c] ss:$16 sps:$4 sm:$0xff]   ;;  %v4603_v18 = vld [vmem:[%s4552_s19 + $0x80] ss:$16 sps:$4 sm:$0xff]   ;;  %v4606_v19 = vld [vmem:[%s4552_s19 + $0x88] ss:$16 sps:$4 sm:$0xff]  }
  0x3b   : > { %1097 = vmatprep.subr.bf16.mxu0 %v4567_v8  ;;  %1203 = vmatprep.subr.bf16.mxu1 %v4570_v9  ;;  %v4611_v20 = vld [vmem:[%s4552_s19 + $0xa4] ss:$16 sps:$4 sm:$0xff]   ;;  %v4616_v21 = vld [vmem:[%s4552_s19 + $0xac] ss:$16 sps:$4 sm:$0xff]   ;;  %v4619_v22 = vld [vmem:[%s4552_s19 + $0xa0] ss:$16 sps:$4 sm:$0xff]  }
  0x3c   : > { %v4624_v23 = vld [vmem:[%s4552_s19 + $0xa8] ss:$16 sps:$4 sm:$0xff]   ;;  %v4627_v24 = vld [vmem:[%s4552_s19 + $0xc4] ss:$16 sps:$4 sm:$0xff]   ;;  %v4632_v25 = vld [vmem:[%s4552_s19 + $0xcc] ss:$16 sps:$4 sm:$0xff]  }
  0x3d   : > { %v4635_v26 = vld [vmem:[%s4552_s19 + $0xc0] ss:$16 sps:$4 sm:$0xff]   ;;  %v4638_v27 = vld [vmem:[%s4552_s19 + $0xc8] ss:$16 sps:$4 sm:$0xff]   ;;  %v4643_v28 = vld [vmem:[%s4552_s19 + $0xe4] ss:$16 sps:$4 sm:$0xff]  }
  0x3e   : > { %1098 = vmatpush1.bf16.msra.mxu0 %v4573_v10  ;;  %1204 = vmatpush1.bf16.msra.mxu1 %v4576_v11  ;;  %v4648_v29 = vld [vmem:[%s4552_s19 + $0xec] ss:$16 sps:$4 sm:$0xff]   ;;  %v4651_v30 = vld [vmem:[%s4552_s19 + $0xe0] ss:$16 sps:$4 sm:$0xff]   ;;  %v4656_v31 = vld [vmem:[%s4552_s19 + $0xe8] ss:$16 sps:$4 sm:$0xff]  }
  0x3f   : > { %1099 = vmatprep.subr.bf16.mxu0 %v4579_v12  ;;  %1205 = vmatprep.subr.bf16.mxu1 %v4584_v13  ;;  %v4659_v32 = vld [vmem:[%s4552_s19 + $0x104] ss:$16 sps:$4 sm:$0xff]   ;;  %v4664_v33 = vld [vmem:[%s4552_s19 + $0x10c] ss:$16 sps:$4 sm:$0xff]   ;;  %v4667_v34 = vld [vmem:[%s4552_s19 + $0x100] ss:$16 sps:$4 sm:$0xff]  }
  0x40   : > { %v4670_v35 = vld [vmem:[%s4552_s19 + $0x108] ss:$16 sps:$4 sm:$0xff]   ;;  %v4675_v36 = vld [vmem:[%s4552_s19 + $0x124] ss:$16 sps:$4 sm:$0xff]   ;;  %v4680_v37 = vld [vmem:[%s4552_s19 + $0x12c] ss:$16 sps:$4 sm:$0xff]  }
  0x41   : > { %v4683_v38 = vld [vmem:[%s4552_s19 + $0x120] ss:$16 sps:$4 sm:$0xff]   ;;  %v4688_v39 = vld [vmem:[%s4552_s19 + $0x128] ss:$16 sps:$4 sm:$0xff]   ;;  %v4691_v40 = vld [vmem:[%s4552_s19 + $0x144] ss:$16 sps:$4 sm:$0xff]  }
  0x42   : > { %1100 = vmatpush1.bf16.msra.mxu0 %v4587_v14  ;;  %1206 = vmatpush1.bf16.msra.mxu1 %v4592_v15  ;;  %v4696_v41 = vld [vmem:[%s4552_s19 + $0x14c] ss:$16 sps:$4 sm:$0xff]   ;;  %v4699_v42 = vld [vmem:[%s4552_s19 + $0x140] ss:$16 sps:$4 sm:$0xff]   ;;  %v4702_v43 = vld [vmem:[%s4552_s19 + $0x148] ss:$16 sps:$4 sm:$0xff]  }
  0x43   : > { %1101 = vmatprep.subr.bf16.mxu0 %v4595_v16  ;;  %1207 = vmatprep.subr.bf16.mxu1 %v4600_v17  ;;  %v4707_v44 = vld [vmem:[%s4552_s19 + $0x164] ss:$16 sps:$4 sm:$0xff]   ;;  %v4712_v45 = vld [vmem:[%s4552_s19 + $0x16c] ss:$16 sps:$4 sm:$0xff]   ;;  %v4715_v46 = vld [vmem:[%s4552_s19 + $0x160] ss:$16 sps:$4 sm:$0xff]  }
  0x44   : > { %v4718_v47 = vld [vmem:[%s4552_s19 + $0x168] ss:$16 sps:$4 sm:$0xff]   ;;  %v4082_v48 = vld [vmem:[%s6243_s0 + $0x4] ss:$16 sps:$4 sm:$0xff]   ;;  %v4731_v50 = vld [vmem:[%s4552_s19 + $0x18c] ss:$16 sps:$4 sm:$0xff]  }
  0x45   : > { %v4726_v49 = vld [vmem:[%s4552_s19 + $0x184] ss:$16 sps:$4 sm:$0xff]   ;;  %1125 = vmatprep.mubr.bf16.mxu0 %v4082_v48  ;;  %1231 = vmatprep.mubr.bf16.mxu1 %v4082_v48  ;;  %v4734_v51 = vld [vmem:[%s4552_s19 + $0x180] ss:$16 sps:$4 sm:$0xff]   ;;  %v4739_v52 = vld [vmem:[%s4552_s19 + $0x188] ss:$16 sps:$4 sm:$0xff]  }
  0x46   : > { %1102 = vmatpush1.bf16.msra.mxu0 %v4603_v18  ;;  %1208 = vmatpush1.bf16.msra.mxu1 %v4606_v19  ;;  %v4742_v53 = vld [vmem:[%s4552_s19 + $0x1a4] ss:$16 sps:$4 sm:$0xff]   ;;  %v4747_v54 = vld [vmem:[%s4552_s19 + $0x1ac] ss:$16 sps:$4 sm:$0xff]   ;;  %v4750_v55 = vld [vmem:[%s4552_s19 + $0x1a0] ss:$16 sps:$4 sm:$0xff]  }
  0x47   : > { %1103 = vmatprep.subr.bf16.mxu0 %v4611_v20  ;;  %1209 = vmatprep.subr.bf16.mxu1 %v4616_v21  ;;  %6514 = vst [vmem:[#allocation5_spill] sm:$0xff] %v4742_v53  ;;  %6515 = vst [vmem:[#allocation6_spill] sm:$0xff] %v4747_v54  ;;  %v4753_v56 = vld [vmem:[%s4552_s19 + $0x1a8] ss:$16 sps:$4 sm:$0xff]   ;;  %v4758_v57 = vld [vmem:[%s4552_s19 + $0x1c4] ss:$16 sps:$4 sm:$0xff]  }
  0x48   : > { %6516 = vst [vmem:[#allocation7_spill] sm:$0xff] %v4750_v55  ;;  %6517 = vst [vmem:[#allocation8_spill] sm:$0xff] %v4753_v56  ;;  %v4763_v58 = vld [vmem:[%s4552_s19 + $0x1cc] ss:$16 sps:$4 sm:$0xff]   ;;  %v4766_v59 = vld [vmem:[%s4552_s19 + $0x1c0] ss:$16 sps:$4 sm:$0xff]  }
  0x49   : > { %6518 = vst [vmem:[#allocation9_spill] sm:$0xff] %v4758_v57  ;;  %6519 = vst [vmem:[#allocation10_spill] sm:$0xff] %v4763_v58  ;;  %v4771_v60 = vld [vmem:[%s4552_s19 + $0x1c8] ss:$16 sps:$4 sm:$0xff]   ;;  %v4774_v61 = vld [vmem:[%s4552_s19 + $0x1e4] ss:$16 sps:$4 sm:$0xff]  }
  0x4a   : > { %1104 = vmatpush1.bf16.msra.mxu0 %v4619_v22  ;;  %1210 = vmatpush1.bf16.msra.mxu1 %v4624_v23  ;;  %6520 = vst [vmem:[#allocation11_spill] sm:$0xff] %v4766_v59  ;;  %6521 = vst [vmem:[#allocation12_spill] sm:$0xff] %v4771_v60  ;;  %v4779_v62 = vld [vmem:[%s4552_s19 + $0x1ec] ss:$16 sps:$4 sm:$0xff]   ;;  %v4782_v63 = vld [vmem:[%s4552_s19 + $0x1e0] ss:$16 sps:$4 sm:$0xff]  }
  0x4b   : > { %1105 = vmatprep.subr.bf16.mxu0 %v4627_v24  ;;  %1211 = vmatprep.subr.bf16.mxu1 %v4632_v25  ;;  %6522 = vst [vmem:[#allocation13_spill] sm:$0xff] %v4774_v61  ;;  %6523 = vst [vmem:[#allocation14_spill] sm:$0xff] %v4779_v62  ;;  %v4785_v0 = vld [vmem:[%s4552_s19 + $0x1e8] ss:$16 sps:$4 sm:$0xff]   ;;  %v4790_v1 = vld [vmem:[%s4552_s19 + $0x204] ss:$16 sps:$4 sm:$0xff]  }
  0x4c   : > { %6524 = vst [vmem:[#allocation15_spill] sm:$0xff] %v4782_v63  ;;  %6525 = vst [vmem:[#allocation16_spill] sm:$0xff] %v4785_v0  ;;  %v4795_v2 = vld [vmem:[%s4552_s19 + $0x20c] ss:$16 sps:$4 sm:$0xff]   ;;  %v4080_v3 = vld [vmem:[%s6243_s0] ss:$16 sps:$4 sm:$0xff]  }
  0x4d   : > { %6526 = vst [vmem:[#allocation17_spill] sm:$0xff] %v4790_v1  ;;  %6527 = vst [vmem:[#allocation18_spill] sm:$0xff] %v4795_v2  ;;  %v4801_v4 = vld [vmem:[%s4552_s19 + $0x200] ss:$16 sps:$4 sm:$0xff]   ;;  %v4806_v5 = vld [vmem:[%s4552_s19 + $0x208] ss:$16 sps:$4 sm:$0xff]  }
  0x4e   : > { %1106 = vmatpush1.bf16.msra.mxu0 %v4635_v26  ;;  %1212 = vmatpush1.bf16.msra.mxu1 %v4638_v27  ;;  %6528 = vst [vmem:[#allocation19_spill] sm:$0xff] %v4801_v4  ;;  %6529 = vst [vmem:[#allocation20_spill] sm:$0xff] %v4806_v5  ;;  %v4809_v6 = vld [vmem:[%s4552_s19 + $0x224] ss:$16 sps:$4 sm:$0xff]   ;;  %v4814_v7 = vld [vmem:[%s4552_s19 + $0x22c] ss:$16 sps:$4 sm:$0xff]  }
  0x4f   : > { %1107 = vmatprep.subr.bf16.mxu0 %v4643_v28  ;;  %1213 = vmatprep.subr.bf16.mxu1 %v4648_v29  ;;  %6530 = vst [vmem:[#allocation21_spill] sm:$0xff] %v4809_v6  ;;  %6531 = vst [vmem:[#allocation22_spill] sm:$0xff] %v4814_v7  ;;  %v4817_v48 = vld [vmem:[%s4552_s19 + $0x220] ss:$16 sps:$4 sm:$0xff]   ;;  %s4430_s24 = smov 112   ;;  %p267_p7 = scmp.lt.s32.totalorder %s4485_s25, 1 }
  0x50   : > { %6532 = vst [vmem:[#allocation23_spill] sm:$0xff] %v4817_v48  ;;  %vm3473_vm1 = vcmask 15360  }
  0x51   : > { %s6914_s25 = smov (!%p267_p7, %s4485_s25), 1 }
  0x52   : > { %1108 = vmatpush1.bf16.msra.mxu0 %v4651_v30  ;;  %1214 = vmatpush1.bf16.msra.mxu1 %v4656_v31  ;;  %s3751_s7 = sshll.u32 %s6914_s25, 4 }
  0x53   : > { %1109 = vmatprep.subr.bf16.mxu0 %v4659_v32  ;;  %1215 = vmatprep.subr.bf16.mxu1 %v4664_v33  ;;  %s271_s13 = scalar_lea.vmem %s6249_s6, %s3751_s7 }
  0x56   : > { %1110 = vmatpush1.bf16.msra.mxu0 %v4667_v34  ;;  %1216 = vmatpush1.bf16.msra.mxu1 %v4670_v35 }
  0x57   : > { %1111 = vmatprep.subr.bf16.mxu0 %v4675_v36  ;;  %1217 = vmatprep.subr.bf16.mxu1 %v4680_v37 }
  0x5a   : > { %1112 = vmatpush1.bf16.msra.mxu0 %v4683_v38  ;;  %1218 = vmatpush1.bf16.msra.mxu1 %v4688_v39 }
  0x5b   : > { %1113 = vmatprep.subr.bf16.mxu0 %v4691_v40  ;;  %1219 = vmatprep.subr.bf16.mxu1 %v4696_v41 }
  0x5e   : > { %1114 = vmatpush1.bf16.msra.mxu0 %v4699_v42  ;;  %1220 = vmatpush1.bf16.msra.mxu1 %v4702_v43 }
  0x5f   : > { %1115 = vmatprep.subr.bf16.mxu0 %v4707_v44  ;;  %1221 = vmatprep.subr.bf16.mxu1 %v4712_v45 }
  0x62   : > { %1116 = vmatpush1.bf16.msra.mxu0 %v4715_v46  ;;  %1222 = vmatpush1.bf16.msra.mxu1 %v4718_v47 }
  0x63   : > { %1117 = vmatprep.subr.bf16.mxu0 %v4726_v49  ;;  %1223 = vmatprep.subr.bf16.mxu1 %v4731_v50 }
  0x66   : > { %1118 = vmatpush1.bf16.msra.mxu0 %v4734_v51  ;;  %1224 = vmatpush1.bf16.msra.mxu1 %v4739_v52 }
  0x67   : > { %1119 = vmatprep.subr.bf16.mxu0 %v4742_v53  ;;  %1225 = vmatprep.subr.bf16.mxu1 %v4747_v54 }
  0x6a   : > { %1120 = vmatpush1.bf16.msra.mxu0 %v4750_v55  ;;  %1226 = vmatpush1.bf16.msra.mxu1 %v4753_v56 }
  0x6b   : > { %1121 = vmatprep.subr.bf16.mxu0 %v4758_v57  ;;  %1227 = vmatprep.subr.bf16.mxu1 %v4763_v58 }
  0x6e   : > { %1122 = vmatpush1.bf16.msra.mxu0 %v4766_v59  ;;  %1228 = vmatpush1.bf16.msra.mxu1 %v4771_v60  ;;  %v4947_v60 = vld [vmem:[%s4552_s19 + $0x32c] ss:$16 sps:$4 sm:$0xff]  }
  0x6f   : > { %1123 = vmatprep.subr.bf16.mxu0 %v4774_v61  ;;  %1229 = vmatprep.subr.bf16.mxu1 %v4779_v62  ;;  %v4906_v62 = vld [vmem:[%s4552_s19 + $0x2c8] ss:$16 sps:$4 sm:$0xff]   ;;  %v4944_v61 = vld [vmem:[%s4552_s19 + $0x324] ss:$16 sps:$4 sm:$0xff]   ;;  %6563 = vst [vmem:[#allocation54_spill] sm:$0xff] %v4947_v60 }
  0x70   : > { %6553 = vst [vmem:[#allocation44_spill] sm:$0xff] %v4906_v62  ;;  %6562 = vst [vmem:[#allocation53_spill] sm:$0xff] %v4944_v61 }
  0x72   : > { %1124 = vmatpush1.bf16.msra.mxu0 %v4782_v63  ;;  %1230 = vmatpush1.bf16.msra.mxu1 %v4785_v0  ;;  %v4820_v0 = vld [vmem:[%s4552_s19 + $0x228] ss:$16 sps:$4 sm:$0xff]  }
  0x73   : > { %1146 = vmatprep.subr.bf16.mxu0 %v4790_v1  ;;  %1252 = vmatprep.subr.bf16.mxu1 %v4795_v2  ;;  %6533 = vst [vmem:[#allocation24_spill] sm:$0xff] %v4820_v0  ;;  %v4825_v1 = vld [vmem:[%s4552_s19 + $0x244] ss:$16 sps:$4 sm:$0xff]   ;;  %v4830_v2 = vld [vmem:[%s4552_s19 + $0x24c] ss:$16 sps:$4 sm:$0xff]  }
  0x74   : > { %6534 = vst [vmem:[#allocation25_spill] sm:$0xff] %v4825_v1  ;;  %6535 = vst [vmem:[#allocation26_spill] sm:$0xff] %v4830_v2  ;;  %v4852_v63 = vld [vmem:[%s4552_s19 + $0x268] ss:$16 sps:$4 sm:$0xff]  }
  0x75   : > { %1126 = vmatmul.mubr.bf16.vlgmr.msra.gmra.mrb[0].mxu0 %v4080_v3  ;;  %1232 = vmatmul.mubr.bf16.vlgmr.msra.gmra.mrb[0].mxu1 %v4080_v3  ;;  %v4833_v3 = vld [vmem:[%s4552_s19 + $0x240] ss:$16 sps:$4 sm:$0xff]   ;;  %6541 = vst [vmem:[#allocation32_spill] sm:$0xff] %v4852_v63 }
  0x76   : > { %1147 = vmatpush1.bf16.msra.mxu0 %v4801_v4  ;;  %1253 = vmatpush1.bf16.msra.mxu1 %v4806_v5  ;;  %6536 = vst [vmem:[#allocation27_spill] sm:$0xff] %v4833_v3  ;;  %v4838_v4 = vld [vmem:[%s4552_s19 + $0x248] ss:$16 sps:$4 sm:$0xff]   ;;  %v4841_v5 = vld [vmem:[%s4552_s19 + $0x264] ss:$16 sps:$4 sm:$0xff]  }
  0x77   : > { %1148 = vmatprep.subr.bf16.mxu0 %v4809_v6  ;;  %1254 = vmatprep.subr.bf16.mxu1 %v4814_v7  ;;  %6537 = vst [vmem:[#allocation28_spill] sm:$0xff] %v4838_v4  ;;  %6538 = vst [vmem:[#allocation29_spill] sm:$0xff] %v4841_v5  ;;  %v4846_v7 = vld [vmem:[%s4552_s19 + $0x26c] ss:$16 sps:$4 sm:$0xff]   ;;  %v4849_v6 = vld [vmem:[%s4552_s19 + $0x260] ss:$16 sps:$4 sm:$0xff]  }
  0x78   : > { %6539 = vst [vmem:[#allocation30_spill] sm:$0xff] %v4846_v7  ;;  %6540 = vst [vmem:[#allocation31_spill] sm:$0xff] %v4849_v6 }
  0x7a   : > { %1149 = vmatpush1.bf16.msra.mxu0 %v4817_v48  ;;  %1255 = vmatpush1.bf16.msra.mxu1 %v4820_v0  ;;  %v4857_v0 = vld [vmem:[%s4552_s19 + $0x284] ss:$16 sps:$4 sm:$0xff]   ;;  %v4900_v48 = vld [vmem:[%s4552_s19 + $0x2cc] ss:$16 sps:$4 sm:$0xff]  }
  0x7b   : > { %1150 = vmatprep.subr.bf16.mxu0 %v4825_v1  ;;  %1256 = vmatprep.subr.bf16.mxu1 %v4830_v2  ;;  %6542 = vst [vmem:[#allocation33_spill] sm:$0xff] %v4857_v0  ;;  %v4862_v2 = vld [vmem:[%s4552_s19 + $0x28c] ss:$16 sps:$4 sm:$0xff]   ;;  %v4865_v1 = vld [vmem:[%s4552_s19 + $0x280] ss:$16 sps:$4 sm:$0xff]   ;;  %6551 = vst [vmem:[#allocation42_spill] sm:$0xff] %v4900_v48 }
  0x7c   : > { %6543 = vst [vmem:[#allocation34_spill] sm:$0xff] %v4862_v2  ;;  %6544 = vst [vmem:[#allocation35_spill] sm:$0xff] %v4865_v1 }
  0x7e   : > { %1151 = vmatpush1.bf16.msra.mxu0 %v4833_v3  ;;  %1257 = vmatpush1.bf16.msra.mxu1 %v4838_v4  ;;  %v4870_v3 = vld [vmem:[%s4552_s19 + $0x288] ss:$16 sps:$4 sm:$0xff]   ;;  %v4873_v4 = vld [vmem:[%s4552_s19 + $0x2a4] ss:$16 sps:$4 sm:$0xff]  }
  0x7f   : > { %1152 = vmatprep.subr.bf16.mxu0 %v4841_v5  ;;  %1258 = vmatprep.subr.bf16.mxu1 %v4846_v7  ;;  %6545 = vst [vmem:[#allocation36_spill] sm:$0xff] %v4870_v3  ;;  %6546 = vst [vmem:[#allocation37_spill] sm:$0xff] %v4873_v4  ;;  %v4878_v7 = vld [vmem:[%s4552_s19 + $0x2ac] ss:$16 sps:$4 sm:$0xff]   ;;  %v4881_v5 = vld [vmem:[%s4552_s19 + $0x2a0] ss:$16 sps:$4 sm:$0xff]  }
  0x80   : > { %6547 = vst [vmem:[#allocation38_spill] sm:$0xff] %v4878_v7  ;;  %6548 = vst [vmem:[#allocation39_spill] sm:$0xff] %v4881_v5 }
  0x82   : > { %1153 = vmatpush1.bf16.msra.mxu0 %v4849_v6  ;;  %1259 = vmatpush1.bf16.msra.mxu1 %v4852_v63  ;;  %v4167_v6 = vld [vmem:[%s6243_s0 + $0x24] ss:$16 sps:$4 sm:$0xff]   ;;  %v4169_v63 = vld [vmem:[%s6243_s0 + $0x20] ss:$16 sps:$4 sm:$0xff]  }
  0x83   : > { %1154 = vmatprep.subr.bf16.mxu0 %v4857_v0  ;;  %1260 = vmatprep.subr.bf16.mxu1 %v4862_v2  ;;  %v4892_v0 = vld [vmem:[%s4552_s19 + $0x2a8] ss:$16 sps:$4 sm:$0xff]   ;;  %v4895_v2 = vld [vmem:[%s4552_s19 + $0x2c4] ss:$16 sps:$4 sm:$0xff]  }
  0x84   : > { %6549 = vst [vmem:[#allocation40_spill] sm:$0xff] %v4892_v0  ;;  %6550 = vst [vmem:[#allocation41_spill] sm:$0xff] %v4895_v2  ;;  %1135 = vmatprep.mubr.bf16.mxu0 %v4167_v6  ;;  %1241 = vmatprep.mubr.bf16.mxu1 %v4167_v6  ;;  %v4184_v6 = vld [vmem:[%s6243_s0 + $0xc] ss:$16 sps:$4 sm:$0xff]  }
  0x85   : > { %1136 = vmatmul.mubr.bf16.gmra.mrb[4].mxu0 %v4169_v63  ;;  %1242 = vmatmul.mubr.bf16.gmra.mrb[4].mxu1 %v4169_v63  ;;  %v4925_v63 = vld [vmem:[%s4552_s19 + $0x2e8] ss:$16 sps:$4 sm:$0xff]  }
  0x86   : > { %1155 = vmatpush1.bf16.msra.mxu0 %v4865_v1  ;;  %1261 = vmatpush1.bf16.msra.mxu1 %v4870_v3  ;;  %v4903_v1 = vld [vmem:[%s4552_s19 + $0x2c0] ss:$16 sps:$4 sm:$0xff]   ;;  %v4909_v3 = vld [vmem:[%s4552_s19 + $0x2e4] ss:$16 sps:$4 sm:$0xff]   ;;  %6557 = vst [vmem:[#allocation48_spill] sm:$0xff] %v4925_v63 }
  0x87   : > { %1156 = vmatprep.subr.bf16.mxu0 %v4873_v4  ;;  %1262 = vmatprep.subr.bf16.mxu1 %v4878_v7  ;;  %6552 = vst [vmem:[#allocation43_spill] sm:$0xff] %v4903_v1  ;;  %6554 = vst [vmem:[#allocation45_spill] sm:$0xff] %v4909_v3  ;;  %v4914_v7 = vld [vmem:[%s4552_s19 + $0x2ec] ss:$16 sps:$4 sm:$0xff]   ;;  %v4922_v4 = vld [vmem:[%s4552_s19 + $0x2e0] ss:$16 sps:$4 sm:$0xff]  }
  0x88   : > { %6555 = vst [vmem:[#allocation46_spill] sm:$0xff] %v4914_v7  ;;  %6556 = vst [vmem:[#allocation47_spill] sm:$0xff] %v4922_v4  ;;  %1178 = vmatprep.mubr.bf16.mxu0 %v4184_v6  ;;  %1284 = vmatprep.mubr.bf16.mxu1 %v4184_v6  ;;  %v4954_v6 = vld [vmem:[%s4552_s19 + $0x320] ss:$16 sps:$4 sm:$0xff]  }
  0x89   : > { %6564 = vst [vmem:[#allocation55_spill] sm:$0xff] %v4954_v6 }
  0x8a   : > { %1157 = vmatpush1.bf16.msra.mxu0 %v4881_v5  ;;  %1263 = vmatpush1.bf16.msra.mxu1 %v4892_v0  ;;  %v4928_v5 = vld [vmem:[%s4552_s19 + $0x304] ss:$16 sps:$4 sm:$0xff]   ;;  %v4931_v0 = vld [vmem:[%s4552_s19 + $0x30c] ss:$16 sps:$4 sm:$0xff]  }
  0x8b   : > { %1158 = vmatprep.subr.bf16.mxu0 %v4895_v2  ;;  %1264 = vmatprep.subr.bf16.mxu1 %v4900_v48  ;;  %6558 = vst [vmem:[#allocation49_spill] sm:$0xff] %v4928_v5  ;;  %6559 = vst [vmem:[#allocation50_spill] sm:$0xff] %v4931_v0  ;;  %v4938_v48 = vld [vmem:[%s4552_s19 + $0x300] ss:$16 sps:$4 sm:$0xff]   ;;  %v4941_v2 = vld [vmem:[%s4552_s19 + $0x308] ss:$16 sps:$4 sm:$0xff]  }
  0x8c   : > { %6560 = vst [vmem:[#allocation51_spill] sm:$0xff] %v4938_v48  ;;  %6561 = vst [vmem:[#allocation52_spill] sm:$0xff] %v4941_v2 }
  0x8e   : > { %1159 = vmatpush1.bf16.msra.mxu0 %v4903_v1  ;;  %1265 = vmatpush1.bf16.msra.mxu1 %v4906_v62  ;;  %v4963_v62 = vld [vmem:[%s4552_s19 + $0x34c] ss:$16 sps:$4 sm:$0xff]  }
  0x8f   : > { %1160 = vmatprep.subr.bf16.mxu0 %v4909_v3  ;;  %1266 = vmatprep.subr.bf16.mxu1 %v4914_v7  ;;  %v4957_v7 = vld [vmem:[%s4552_s19 + $0x328] ss:$16 sps:$4 sm:$0xff]   ;;  %v4960_v3 = vld [vmem:[%s4552_s19 + $0x344] ss:$16 sps:$4 sm:$0xff]   ;;  %6567 = vst [vmem:[#allocation58_spill] sm:$0xff] %v4963_v62 }
  0x90   : > { %6565 = vst [vmem:[#allocation56_spill] sm:$0xff] %v4957_v7  ;;  %6566 = vst [vmem:[#allocation57_spill] sm:$0xff] %v4960_v3 }
  0x92   : > { %1161 = vmatpush1.bf16.msra.mxu0 %v4922_v4  ;;  %1267 = vmatpush1.bf16.msra.mxu1 %v4925_v63  ;;  %v4976_v63 = vld [vmem:[%s4552_s19 + $0x364] ss:$16 sps:$4 sm:$0xff]   ;;  %v4979_v4 = vld [vmem:[%s4552_s19 + $0x36c] ss:$16 sps:$4 sm:$0xff]  }
  0x93   : > { %1162 = vmatprep.subr.bf16.mxu0 %v4928_v5  ;;  %1268 = vmatprep.subr.bf16.mxu1 %v4931_v0  ;;  %v4970_v0 = vld [vmem:[%s4552_s19 + $0x340] ss:$16 sps:$4 sm:$0xff]   ;;  %v4973_v5 = vld [vmem:[%s4552_s19 + $0x348] ss:$16 sps:$4 sm:$0xff]   ;;  %6570 = vst [vmem:[#allocation61_spill] sm:$0xff] %v4976_v63  ;;  %6571 = vst [vmem:[#allocation62_spill] sm:$0xff] %v4979_v4 }
  0x94   : > { %6568 = vst [vmem:[#allocation59_spill] sm:$0xff] %v4970_v0  ;;  %6569 = vst [vmem:[#allocation60_spill] sm:$0xff] %v4973_v5 }
  0x96   : > { %1163 = vmatpush1.bf16.msra.mxu0 %v4938_v48  ;;  %1269 = vmatpush1.bf16.msra.mxu1 %v4941_v2  ;;  %v4992_v2 = vld [vmem:[%s4552_s19 + $0x384] ss:$16 sps:$4 sm:$0xff]   ;;  %v4995_v48 = vld [vmem:[%s4552_s19 + $0x38c] ss:$16 sps:$4 sm:$0xff]  }
  0x97   : > { %1164 = vmatprep.subr.bf16.mxu0 %v4944_v61  ;;  %1270 = vmatprep.subr.bf16.mxu1 %v4947_v60  ;;  %v4986_v60 = vld [vmem:[%s4552_s19 + $0x360] ss:$16 sps:$4 sm:$0xff]   ;;  %v4989_v61 = vld [vmem:[%s4552_s19 + $0x368] ss:$16 sps:$4 sm:$0xff]   ;;  %6574 = vst [vmem:[#allocation65_spill] sm:$0xff] %v4992_v2  ;;  %6575 = vst [vmem:[#allocation66_spill] sm:$0xff] %v4995_v48 }
  0x98   : > { %6572 = vst [vmem:[#allocation63_spill] sm:$0xff] %v4986_v60  ;;  %6573 = vst [vmem:[#allocation64_spill] sm:$0xff] %v4989_v61 }
  0x9a   : > { %1165 = vmatpush1.bf16.msra.mxu0 %v4954_v6  ;;  %1271 = vmatpush1.bf16.msra.mxu1 %v4957_v7 }
  0x9b   : > { %1166 = vmatprep.subr.bf16.mxu0 %v4960_v3  ;;  %1272 = vmatprep.subr.bf16.mxu1 %v4963_v62  ;;  %v5002_v62 = vld [vmem:[%s4552_s19 + $0x380] ss:$16 sps:$4 sm:$0xff]   ;;  %v5005_v3 = vld [vmem:[%s4552_s19 + $0x388] ss:$16 sps:$4 sm:$0xff]  }
  0x9c   : > { %6576 = vst [vmem:[#allocation67_spill] sm:$0xff] %v5002_v62  ;;  %6577 = vst [vmem:[#allocation68_spill] sm:$0xff] %v5005_v3 }
  0x9e   : > { %1167 = vmatpush1.bf16.msra.mxu0 %v4970_v0  ;;  %1273 = vmatpush1.bf16.msra.mxu1 %v4973_v5  ;;  %v5012_v5 = vld [vmem:[%s4552_s19 + $0x3a4] ss:$16 sps:$4 sm:$0xff]  }
  0x9f   : > { %1168 = vmatprep.subr.bf16.mxu0 %v4976_v63  ;;  %1274 = vmatprep.subr.bf16.mxu1 %v4979_v4  ;;  %6578 = vst [vmem:[#allocation69_spill] sm:$0xff] %v5012_v5  ;;  %v5015_v63 = vld [vmem:[%s4552_s19 + $0x3ac] ss:$16 sps:$4 sm:$0xff]   ;;  %v5020_v4 = vld [vmem:[%s4552_s19 + $0x3a0] ss:$16 sps:$4 sm:$0xff]  }
  0xa0   : > { %6579 = vst [vmem:[#allocation70_spill] sm:$0xff] %v5015_v63  ;;  %6580 = vst [vmem:[#allocation71_spill] sm:$0xff] %v5020_v4 }
  0xa2   : > { %1169 = vmatpush1.bf16.msra.mxu0 %v4986_v60  ;;  %1275 = vmatpush1.bf16.msra.mxu1 %v4989_v61  ;;  %v5023_v60 = vld [vmem:[%s4552_s19 + $0x3a8] ss:$16 sps:$4 sm:$0xff]   ;;  %v5044_v61 = vld [vmem:[%s4552_s19 + $0x3e4] ss:$16 sps:$4 sm:$0xff]  }
  0xa3   : > { %1170 = vmatprep.subr.bf16.mxu0 %v4992_v2  ;;  %1276 = vmatprep.subr.bf16.mxu1 %v4995_v48  ;;  %6581 = vst [vmem:[#allocation72_spill] sm:$0xff] %v5023_v60  ;;  %v5028_v48 = vld [vmem:[%s4552_s19 + $0x3c4] ss:$16 sps:$4 sm:$0xff]   ;;  %v5031_v2 = vld [vmem:[%s4552_s19 + $0x3cc] ss:$16 sps:$4 sm:$0xff]   ;;  %6586 = vst [vmem:[#allocation77_spill] sm:$0xff] %v5044_v61 }
  0xa4   : > { %6582 = vst [vmem:[#allocation73_spill] sm:$0xff] %v5028_v48  ;;  %6583 = vst [vmem:[#allocation74_spill] sm:$0xff] %v5031_v2 }
  0xa6   : > { %1171 = vmatpush1.bf16.msra.mxu0 %v5002_v62  ;;  %1277 = vmatpush1.bf16.msra.mxu1 %v5005_v3  ;;  %v5036_v62 = vld [vmem:[%s4552_s19 + $0x3c0] ss:$16 sps:$4 sm:$0xff]   ;;  %v5039_v3 = vld [vmem:[%s4552_s19 + $0x3c8] ss:$16 sps:$4 sm:$0xff]  }
  0xa7   : > { %1172 = vmatprep.subr.bf16.mxu0 %v5012_v5  ;;  %1278 = vmatprep.subr.bf16.mxu1 %v5015_v63  ;;  %6584 = vst [vmem:[#allocation75_spill] sm:$0xff] %v5036_v62  ;;  %6585 = vst [vmem:[#allocation76_spill] sm:$0xff] %v5039_v3  ;;  %v5047_v5 = vld [vmem:[%s4552_s19 + $0x3ec] ss:$16 sps:$4 sm:$0xff]   ;;  %v5052_v63 = vld [vmem:[%s4552_s19 + $0x3e0] ss:$16 sps:$4 sm:$0xff]  }
  0xa8   : > { %6587 = vst [vmem:[#allocation78_spill] sm:$0xff] %v5047_v5  ;;  %6588 = vst [vmem:[#allocation79_spill] sm:$0xff] %v5052_v63 }
  0xaa   : > { %1173 = vmatpush1.bf16.msra.mxu0 %v5020_v4  ;;  %1279 = vmatpush1.bf16.msra.mxu1 %v5023_v60  ;;  %v5055_v4 = vld [vmem:[%s4552_s19 + $0x3e8] ss:$16 sps:$4 sm:$0xff]  }
  0xab   : > { %1174 = vmatprep.subr.bf16.mxu0 %v5028_v48  ;;  %1280 = vmatprep.subr.bf16.mxu1 %v5031_v2  ;;  %6589 = vst [vmem:[#allocation80_spill] sm:$0xff] %v5055_v4  ;;  %v4182_v2 = vld [vmem:[%s6243_s0 + $0x8] ss:$16 sps:$4 sm:$0xff]  }
  0xae   : > { %1175 = vmatpush1.bf16.msra.mxu0 %v5036_v62  ;;  %1281 = vmatpush1.bf16.msra.mxu1 %v5039_v3  ;;  %v4185_v3 = vld [vmem:[%s6243_s0 + $0x2c] ss:$16 sps:$4 sm:$0xff]  }
  0xaf   : > { %1176 = vmatprep.subr.bf16.mxu0 %v5044_v61  ;;  %1282 = vmatprep.subr.bf16.mxu1 %v5047_v5  ;;  %v4187_v5 = vld [vmem:[%s6243_s0 + $0x28] ss:$16 sps:$4 sm:$0xff]   ;;  %v6340_v61 = vmov 0  }
  0xb2   : > { %1177 = vmatpush1.bf16.msra.mxu0 %v5052_v63  ;;  %1283 = vmatpush1.bf16.msra.mxu1 %v5055_v4 }
  0xb5   : > { %1179 = vmatmul.mubr.bf16.vlgmr.msra.gmra.mrb[0].mxu0 %v4182_v2  ;;  %1285 = vmatmul.mubr.bf16.vlgmr.msra.gmra.mrb[0].mxu1 %v4182_v2 }
  0xb6   : > { %1188 = vmatprep.mubr.bf16.mxu0 %v4185_v3  ;;  %1294 = vmatprep.mubr.bf16.mxu1 %v4185_v3 }
  0xbd   : > { %1189 = vmatmul.mubr.bf16.gmra.mrb[4].mxu0 %v4187_v5  ;;  %1295 = vmatmul.mubr.bf16.gmra.mrb[4].mxu1 %v4187_v5 }
  0xbe   : > { %1362 = vmatprep.mubr.bf16.mxu0 %v6340_v61  ;;  %1415 = vmatprep.mubr.bf16.mxu1 %v6340_v61 }
 0x188   : > { %v1180_v4 = vpop.f32.mrb[0].mxu0  ;;  %v1286_v63 = vpop.f32.mrb[0].mxu1 }
 0x189   : > { %v1182_v62 = vpop.f32.mrb[1].mxu0  ;;  %v1288_v48 = vpop.f32.mrb[1].mxu1 }
 0x18a   : > { %v1184_v60 = vpop.f32.mrb[2].mxu0  ;;  %v1290_v0 = vpop.f32.mrb[2].mxu1 }
 0x18b   : > { %v1305_v2 = vpack.c.bf16 %v1184_v60, %v1180_v4  ;;  %v1307_v7 = vpack.c.bf16 %v1290_v0, %v1286_v63  ;;  %v1186_v3 = vpop.f32.mrb[3].mxu0  ;;  %v1292_v6 = vpop.f32.mrb[3].mxu1 }
 0x18c   : > { %v1306_v1 = vpack.c.bf16 %v1186_v3, %v1182_v62  ;;  %v1308_v59 = vpack.c.bf16 %v1292_v6, %v1288_v48  ;;  %v5117_v48 = vld [vmem:[%s4552_s19 + $0x28] ss:$16 sps:$4 sm:$0xff]  }
 0x18d   : > { %v6608_v3 = vld [vmem:[#allocation22_spill] sm:$0xff] }
 0x18e   : > { %1330 = vmatprep.subr.bf16.mxu0 %v1306_v1  ;;  %1383 = vmatprep.subr.bf16.mxu1 %v1308_v59  ;;  %v5075_v59 = vld [vmem:[%s6245_s2] sm:$0xff]   ;;  %v5110_v1 = vld [vmem:[%s6245_s2 + $0x8] sm:$0xff]  }
 0x18f   : > { %1331 = vmatpush1.bf16.msra.mxu0 %v1305_v2  ;;  %1384 = vmatpush1.bf16.msra.mxu1 %v1307_v7  ;;  %v5113_v7 = vld [vmem:[%s4552_s19 + $0x20] ss:$16 sps:$4 sm:$0xff]  }
 0x190   : > { %v1190_v5 = vpop.f32.mrb[4].mxu0  ;;  %v1296_v58 = vpop.f32.mrb[4].mxu1  ;;  %v6607_v2 = vld [vmem:[#allocation21_spill] sm:$0xff] }
 0x191   : > { %v1192_v57 = vpop.f32.mrb[5].mxu0  ;;  %v1298_v61 = vpop.f32.mrb[5].mxu1 }
 0x192   : > { %v1194_v56 = vpop.f32.mrb[6].mxu0  ;;  %v1300_v55 = vpop.f32.mrb[6].mxu1 }
 0x193   : > { %v1309_v54 = vpack.c.bf16 %v1194_v56, %v1190_v5  ;;  %v1196_v53 = vpop.f32.mrb[7].mxu0  ;;  %v1311_v60 = vpack.c.bf16 %v1300_v55, %v1296_v58  ;;  %v1302_v0 = vpop.f32.mrb[7].mxu1  ;;  %v5078_v56 = vld [vmem:[%s4552_s19 + $0x4] ss:$16 sps:$4 sm:$0xff]   ;;  %v5092_v55 = vld [vmem:[%s4552_s19] ss:$16 sps:$4 sm:$0xff]  }
 0x194   : > { %v1310_v4 = vpack.c.bf16 %v1196_v53, %v1192_v57  ;;  %v1312_v62 = vpack.c.bf16 %v1302_v0, %v1298_v61  ;;  %v5082_v53 = vld [vmem:[%s4552_s19 + $0xc] ss:$16 sps:$4 sm:$0xff]   ;;  %v5096_v57 = vld [vmem:[%s4552_s19 + $0x8] ss:$16 sps:$4 sm:$0xff]   ;;  %v5100_v58 = vld [vmem:[%s4552_s19 + $0x24] ss:$16 sps:$4 sm:$0xff]  }
 0x195   : > { %v5104_v61 = vld [vmem:[%s4552_s19 + $0x2c] ss:$16 sps:$4 sm:$0xff]  }
 0x196   : > { %1332 = vmatprep.subr.bf16.mxu0 %v1310_v4  ;;  %1385 = vmatprep.subr.bf16.mxu1 %v1312_v62 }
 0x197   : > { %1333 = vmatpush1.bf16.msra.mxu0 %v1309_v54  ;;  %1386 = vmatpush1.bf16.msra.mxu1 %v1311_v60  ;;  %v6590_v54 = vmov 0  }
 0x198   : > { %1460 = vmatprep.subr.bf16.mxu0 %v5078_v56  ;;  %1566 = vmatprep.subr.bf16.mxu1 %v5082_v53 }
 0x19a   : > { %3691 = vmatmul.mubr.msk.bf16.vlgmr.msra.gmra.mrb[8].mxu0 %vm1323_vm0, %v5075_v59  ;;  %3693 = vmatmul.mubr.msk.bf16.vlgmr.msra.gmra.mrb[8].mxu1 %vm1323_vm0, %v5075_v59 }
 0x19b   : > { %1372 = vmatprep.mubr.bf16.mxu0 %v6590_v54  ;;  %1425 = vmatprep.mubr.bf16.mxu1 %v6590_v54 }
 0x19c   : > { %1461 = vmatpush1.bf16.msra.mxu0 %v5092_v55  ;;  %1567 = vmatpush1.bf16.msra.mxu1 %v5096_v57 }
 0x19d   : > { %1462 = vmatprep.subr.bf16.mxu0 %v5100_v58  ;;  %1568 = vmatprep.subr.bf16.mxu1 %v5104_v61 }
 0x1a0   : > { %1463 = vmatpush1.bf16.msra.mxu0 %v5113_v7  ;;  %1569 = vmatpush1.bf16.msra.mxu1 %v5117_v48 }
 0x1a1   : > { %1464 = vmatprep.subr.bf16.mxu0 %v4567_v8  ;;  %1570 = vmatprep.subr.bf16.mxu1 %v4570_v9  ;;  %v6591_v8 = vld [vmem:[#allocation5_spill] sm:$0xff]  ;;  %v6592_v9 = vld [vmem:[#allocation6_spill] sm:$0xff] }
 0x1a2   : > { %3692 = vmatmul.mubr.msk.bf16.gmra.mrb[12].mxu0 %vm1323_vm0, %v5110_v1  ;;  %3694 = vmatmul.mubr.msk.bf16.gmra.mrb[12].mxu1 %vm1323_vm0, %v5110_v1 }
 0x1a4   : > { %1465 = vmatpush1.bf16.msra.mxu0 %v4573_v10  ;;  %1571 = vmatpush1.bf16.msra.mxu1 %v4576_v11  ;;  %v6593_v10 = vld [vmem:[#allocation7_spill] sm:$0xff]  ;;  %v6594_v11 = vld [vmem:[#allocation8_spill] sm:$0xff] }
 0x1a5   : > { %1466 = vmatprep.subr.bf16.mxu0 %v4579_v12  ;;  %1572 = vmatprep.subr.bf16.mxu1 %v4584_v13  ;;  %v6595_v12 = vld [vmem:[#allocation9_spill] sm:$0xff]  ;;  %v6596_v13 = vld [vmem:[#allocation10_spill] sm:$0xff] }
 0x1a8   : > { %1467 = vmatpush1.bf16.msra.mxu0 %v4587_v14  ;;  %1573 = vmatpush1.bf16.msra.mxu1 %v4592_v15  ;;  %v6597_v14 = vld [vmem:[#allocation11_spill] sm:$0xff]  ;;  %v6598_v15 = vld [vmem:[#allocation12_spill] sm:$0xff] }
 0x1a9   : > { %1468 = vmatprep.subr.bf16.mxu0 %v4595_v16  ;;  %1574 = vmatprep.subr.bf16.mxu1 %v4600_v17  ;;  %v6599_v16 = vld [vmem:[#allocation13_spill] sm:$0xff]  ;;  %v6600_v17 = vld [vmem:[#allocation14_spill] sm:$0xff] }
 0x1ac   : > { %1469 = vmatpush1.bf16.msra.mxu0 %v4603_v18  ;;  %1575 = vmatpush1.bf16.msra.mxu1 %v4606_v19  ;;  %v6601_v18 = vld [vmem:[#allocation15_spill] sm:$0xff]  ;;  %v6602_v19 = vld [vmem:[#allocation16_spill] sm:$0xff] }
 0x1ad   : > { %1470 = vmatprep.subr.bf16.mxu0 %v4611_v20  ;;  %1576 = vmatprep.subr.bf16.mxu1 %v4616_v21  ;;  %v6603_v20 = vld [vmem:[#allocation17_spill] sm:$0xff]  ;;  %v6604_v21 = vld [vmem:[#allocation18_spill] sm:$0xff] }
 0x1b0   : > { %1471 = vmatpush1.bf16.msra.mxu0 %v4619_v22  ;;  %1577 = vmatpush1.bf16.msra.mxu1 %v4624_v23 }
 0x1b1   : > { %1472 = vmatprep.subr.bf16.mxu0 %v4627_v24  ;;  %1578 = vmatprep.subr.bf16.mxu1 %v4632_v25 }
 0x1b4   : > { %1473 = vmatpush1.bf16.msra.mxu0 %v4635_v26  ;;  %1579 = vmatpush1.bf16.msra.mxu1 %v4638_v27 }
 0x1b5   : > { %1474 = vmatprep.subr.bf16.mxu0 %v4643_v28  ;;  %1580 = vmatprep.subr.bf16.mxu1 %v4648_v29 }
 0x1b8   : > { %1475 = vmatpush1.bf16.msra.mxu0 %v4651_v30  ;;  %1581 = vmatpush1.bf16.msra.mxu1 %v4656_v31 }
 0x1b9   : > { %1476 = vmatprep.subr.bf16.mxu0 %v4659_v32  ;;  %1582 = vmatprep.subr.bf16.mxu1 %v4664_v33 }
 0x1bc   : > { %1477 = vmatpush1.bf16.msra.mxu0 %v4667_v34  ;;  %1583 = vmatpush1.bf16.msra.mxu1 %v4670_v35 }
 0x1bd   : > { %1478 = vmatprep.subr.bf16.mxu0 %v4675_v36  ;;  %1584 = vmatprep.subr.bf16.mxu1 %v4680_v37 }
 0x1c0   : > { %1479 = vmatpush1.bf16.msra.mxu0 %v4683_v38  ;;  %1585 = vmatpush1.bf16.msra.mxu1 %v4688_v39 }
 0x1c1   : > { %1480 = vmatprep.subr.bf16.mxu0 %v4691_v40  ;;  %1586 = vmatprep.subr.bf16.mxu1 %v4696_v41 }
 0x1c4   : > { %1481 = vmatpush1.bf16.msra.mxu0 %v4699_v42  ;;  %1587 = vmatpush1.bf16.msra.mxu1 %v4702_v43 }
 0x1c5   : > { %1482 = vmatprep.subr.bf16.mxu0 %v4707_v44  ;;  %1588 = vmatprep.subr.bf16.mxu1 %v4712_v45 }
 0x1c8   : > { %1483 = vmatpush1.bf16.msra.mxu0 %v4715_v46  ;;  %1589 = vmatpush1.bf16.msra.mxu1 %v4718_v47 }
 0x1c9   : > { %1484 = vmatprep.subr.bf16.mxu0 %v4726_v49  ;;  %1590 = vmatprep.subr.bf16.mxu1 %v4731_v50  ;;  %v6605_v49 = vld [vmem:[#allocation19_spill] sm:$0xff]  ;;  %v6606_v50 = vld [vmem:[#allocation20_spill] sm:$0xff] }
 0x1cc   : > { %1485 = vmatpush1.bf16.msra.mxu0 %v4734_v51  ;;  %1591 = vmatpush1.bf16.msra.mxu1 %v4739_v52 }
 0x1cd   : > { %1486 = vmatprep.subr.bf16.mxu0 %v6591_v8  ;;  %1592 = vmatprep.subr.bf16.mxu1 %v6592_v9 }
 0x1d0   : > { %1487 = vmatpush1.bf16.msra.mxu0 %v6593_v10  ;;  %1593 = vmatpush1.bf16.msra.mxu1 %v6594_v11  ;;  %v6609_v11 = vld [vmem:[#allocation23_spill] sm:$0xff] }
 0x1d1   : > { %1488 = vmatprep.subr.bf16.mxu0 %v6595_v12  ;;  %1594 = vmatprep.subr.bf16.mxu1 %v6596_v13  ;;  %v6610_v12 = vld [vmem:[#allocation24_spill] sm:$0xff] }
 0x1d4   : > { %1489 = vmatpush1.bf16.msra.mxu0 %v6597_v14  ;;  %1595 = vmatpush1.bf16.msra.mxu1 %v6598_v15  ;;  %v6611_v15 = vld [vmem:[#allocation25_spill] sm:$0xff] }
 0x1d5   : > { %1490 = vmatprep.subr.bf16.mxu0 %v6599_v16  ;;  %1596 = vmatprep.subr.bf16.mxu1 %v6600_v17  ;;  %v6612_v16 = vld [vmem:[#allocation26_spill] sm:$0xff]  ;;  %v6613_v17 = vld [vmem:[#allocation27_spill] sm:$0xff] }
 0x1d8   : > { %1491 = vmatpush1.bf16.msra.mxu0 %v6601_v18  ;;  %1597 = vmatpush1.bf16.msra.mxu1 %v6602_v19  ;;  %v6614_v18 = vld [vmem:[#allocation28_spill] sm:$0xff]  ;;  %v6615_v19 = vld [vmem:[#allocation29_spill] sm:$0xff] }
 0x1d9   : > { %1513 = vmatprep.subr.bf16.mxu0 %v6603_v20  ;;  %1619 = vmatprep.subr.bf16.mxu1 %v6604_v21  ;;  %v6616_v20 = vld [vmem:[#allocation30_spill] sm:$0xff]  ;;  %v6617_v21 = vld [vmem:[#allocation31_spill] sm:$0xff] }
 0x26d   : > { %v1364_v22 = vpop.f32.mrb[8].mxu0  ;;  %v1417_v23 = vpop.f32.mrb[8].mxu1 }
 0x26e   : > { %v1366_v24 = vpop.f32.mrb[9].mxu0  ;;  %v1438_v25 = vmax.f32 %v1417_v23, 0.0  ;;  %v1419_v26 = vpop.f32.mrb[9].mxu1  ;;  %v1436_v30 = vmax.f32 %v1364_v22, 0.0  ;;  %v6618_v22 = vld [vmem:[#allocation32_spill] sm:$0xff]  ;;  %v6619_v23 = vld [vmem:[#allocation33_spill] sm:$0xff] }
 0x26f   : > { %v1368_v27 = vpop.f32.mrb[10].mxu0  ;;  %v1439_v28 = vmax.f32 %v1419_v26, 0.0  ;;  %v1421_v29 = vpop.f32.mrb[10].mxu1  ;;  %v1437_v35 = vmax.f32 %v1366_v24, 0.0  ;;  %v6620_v24 = vld [vmem:[#allocation34_spill] sm:$0xff]  ;;  %v6622_v26 = vld [vmem:[#allocation36_spill] sm:$0xff] }
 0x270   : > { %v1440_v31 = vmax.f32 %v1368_v27, 0.0  ;;  %v1370_v32 = vpop.f32.mrb[11].mxu0  ;;  %v1442_v33 = vmax.f32 %v1421_v29, 0.0  ;;  %v1423_v34 = vpop.f32.mrb[11].mxu1  ;;  %v6623_v27 = vld [vmem:[#allocation37_spill] sm:$0xff]  ;;  %v6625_v29 = vld [vmem:[#allocation39_spill] sm:$0xff] }
 0x271   : > { %v1441_v36 = vmax.f32 %v1370_v32, 0.0  ;;  %v1443_v37 = vmax.f32 %v1423_v34, 0.0  ;;  %v6628_v32 = vld [vmem:[#allocation42_spill] sm:$0xff]  ;;  %v6630_v34 = vld [vmem:[#allocation44_spill] sm:$0xff] }
 0x272   : > { %v1452_v38 = vpack.c.bf16 %v1440_v31, %v1436_v30  ;;  %v5182_v39 = vpack.c.bf16 %v1442_v33, %v1438_v25  ;;  %v6621_v25 = vld [vmem:[#allocation35_spill] sm:$0xff]  ;;  %v6626_v30 = vld [vmem:[#allocation40_spill] sm:$0xff]  ;;  %v6627_v31 = vld [vmem:[#allocation41_spill] sm:$0xff] }
 0x273   : > { %v1453_v40 = vpack.c.bf16 %v1441_v36, %v1437_v35  ;;  %v1455_v41 = vpack.c.bf16 %v1443_v37, %v1439_v28  ;;  %v6624_v28 = vld [vmem:[#allocation38_spill] sm:$0xff]  ;;  %v6629_v33 = vld [vmem:[#allocation43_spill] sm:$0xff]  ;;  %v6631_v35 = vld [vmem:[#allocation45_spill] sm:$0xff] }
 0x274   : > { %v6632_v36 = vld [vmem:[#allocation46_spill] sm:$0xff]  ;;  %v6633_v37 = vld [vmem:[#allocation47_spill] sm:$0xff] }
 0x275   : > { %1492 = vmatprep.mubr.bf16.mxu0 %v1453_v40  ;;  %1598 = vmatprep.mubr.bf16.mxu1 %v1453_v40  ;;  %v1374_v42 = vpop.f32.mrb[12].mxu0  ;;  %v1427_v43 = vpop.f32.mrb[12].mxu1  ;;  %v6635_v40 = vld [vmem:[#allocation49_spill] sm:$0xff] }
 0x276   : > { %1493 = vmatmul.mubr.bf16.vlgmr.msra.gmra.mrb[16].mxu0 %v1452_v38  ;;  %1599 = vmatmul.mubr.bf16.vlgmr.msra.gmra.mrb[16].mxu1 %v1452_v38  ;;  %v1444_v44 = vmax.f32 %v1374_v42, 0.0  ;;  %v1376_v45 = vpop.f32.mrb[13].mxu0  ;;  %v1446_v46 = vmax.f32 %v1427_v43, 0.0  ;;  %v1429_v47 = vpop.f32.mrb[13].mxu1  ;;  %v6634_v38 = vld [vmem:[#allocation48_spill] sm:$0xff]  ;;  %v6637_v42 = vld [vmem:[#allocation51_spill] sm:$0xff] }
 0x277   : > { %1514 = vmatpush1.bf16.msra.mxu0 %v6605_v49  ;;  %1620 = vmatpush1.bf16.msra.mxu1 %v6606_v50  ;;  %v1445_v51 = vmax.f32 %v1376_v45, 0.0  ;;  %v1378_v52 = vpop.f32.mrb[14].mxu0  ;;  %v1447_v63 = vmax.f32 %v1429_v47, 0.0  ;;  %v1431_v6 = vpop.f32.mrb[14].mxu1  ;;  %v6638_v43 = vld [vmem:[#allocation52_spill] sm:$0xff]  ;;  %v6640_v45 = vld [vmem:[#allocation54_spill] sm:$0xff] }
 0x278   : > { %1515 = vmatprep.subr.bf16.mxu0 %v6607_v2  ;;  %1621 = vmatprep.subr.bf16.mxu1 %v6608_v3  ;;  %v1448_v5 = vmax.f32 %v1378_v52, 0.0  ;;  %v1380_v60 = vpop.f32.mrb[15].mxu0  ;;  %v1450_v0 = vmax.f32 %v1431_v6, 0.0  ;;  %v1433_v4 = vpop.f32.mrb[15].mxu1  ;;  %v6642_v47 = vld [vmem:[#allocation56_spill] sm:$0xff]  ;;  %v6643_v49 = vld [vmem:[#allocation57_spill] sm:$0xff] }
 0x279   : > { %v1449_v62 = vmax.f32 %v1380_v60, 0.0  ;;  %v1451_v8 = vmax.f32 %v1433_v4, 0.0  ;;  %v6644_v50 = vld [vmem:[#allocation58_spill] sm:$0xff]  ;;  %v6646_v52 = vld [vmem:[#allocation60_spill] sm:$0xff]  ;;  %v6649_v2 = vld [vmem:[#allocation63_spill] sm:$0xff] }
 0x27a   : > { %v1456_v9 = vpack.c.bf16 %v1448_v5, %v1444_v44  ;;  %v5188_v10 = vpack.c.bf16 %v1450_v0, %v1446_v46  ;;  %v6639_v44 = vld [vmem:[#allocation53_spill] sm:$0xff]  ;;  %v6641_v46 = vld [vmem:[#allocation55_spill] sm:$0xff]  ;;  %v6648_v6 = vld [vmem:[#allocation62_spill] sm:$0xff] }
 0x27b   : > { %1516 = vmatpush1.bf16.msra.mxu0 %v6609_v11  ;;  %1622 = vmatpush1.bf16.msra.mxu1 %v6610_v12  ;;  %v1457_v13 = vpack.c.bf16 %v1449_v62, %v1445_v51  ;;  %v5192_v14 = vpack.c.bf16 %v1451_v8, %v1447_v63  ;;  %v6645_v51 = vld [vmem:[#allocation59_spill] sm:$0xff]  ;;  %v6647_v63 = vld [vmem:[#allocation61_spill] sm:$0xff]  ;;  %v6650_v3 = vld [vmem:[#allocation64_spill] sm:$0xff] }
 0x27c   : > { %1517 = vmatprep.subr.bf16.mxu0 %v6611_v15  ;;  %1623 = vmatprep.subr.bf16.mxu1 %v6612_v16  ;;  %v6651_v5 = vld [vmem:[#allocation65_spill] sm:$0xff]  ;;  %v6652_v60 = vld [vmem:[#allocation66_spill] sm:$0xff]  ;;  %v6653_v0 = vld [vmem:[#allocation67_spill] sm:$0xff] }
 0x27d   : > { %1502 = vmatprep.mubr.bf16.mxu0 %v1457_v13  ;;  %1608 = vmatprep.mubr.bf16.mxu1 %v1457_v13  ;;  %v6654_v4 = vld [vmem:[#allocation68_spill] sm:$0xff]  ;;  %v6655_v62 = vld [vmem:[#allocation69_spill] sm:$0xff]  ;;  %v6656_v8 = vld [vmem:[#allocation70_spill] sm:$0xff] }
 0x27e   : > { %1503 = vmatmul.mubr.bf16.gmra.mrb[20].mxu0 %v1456_v9  ;;  %1609 = vmatmul.mubr.bf16.gmra.mrb[20].mxu1 %v1456_v9  ;;  %v6657_v9 = vld [vmem:[#allocation71_spill] sm:$0xff]  ;;  %v6658_v11 = vld [vmem:[#allocation72_spill] sm:$0xff]  ;;  %v6659_v12 = vld [vmem:[#allocation73_spill] sm:$0xff] }
 0x27f   : > { %1518 = vmatpush1.bf16.msra.mxu0 %v6613_v17  ;;  %1624 = vmatpush1.bf16.msra.mxu1 %v6614_v18  ;;  %v6660_v13 = vld [vmem:[#allocation74_spill] sm:$0xff]  ;;  %v6661_v15 = vld [vmem:[#allocation75_spill] sm:$0xff]  ;;  %v6662_v16 = vld [vmem:[#allocation76_spill] sm:$0xff] }
 0x280   : > { %1519 = vmatprep.subr.bf16.mxu0 %v6615_v19  ;;  %1625 = vmatprep.subr.bf16.mxu1 %v6616_v20  ;;  %v6663_v17 = vld [vmem:[#allocation77_spill] sm:$0xff]  ;;  %v6664_v18 = vld [vmem:[#allocation78_spill] sm:$0xff]  ;;  %v6665_v19 = vld [vmem:[#allocation79_spill] sm:$0xff] }
 0x281   : > { %1545 = vmatprep.mubr.bf16.mxu0 %v1455_v41  ;;  %1651 = vmatprep.mubr.bf16.mxu1 %v1455_v41  ;;  %v6636_v41 = vld [vmem:[#allocation50_spill] sm:$0xff]  ;;  %v6666_v20 = vld [vmem:[#allocation80_spill] sm:$0xff] }
 0x283   : > { %1520 = vmatpush1.bf16.msra.mxu0 %v6617_v21  ;;  %1626 = vmatpush1.bf16.msra.mxu1 %v6618_v22 }
 0x284   : > { %1521 = vmatprep.subr.bf16.mxu0 %v6619_v23  ;;  %1627 = vmatprep.subr.bf16.mxu1 %v6620_v24 }
 0x287   : > { %1522 = vmatpush1.bf16.msra.mxu0 %v6621_v25  ;;  %1628 = vmatpush1.bf16.msra.mxu1 %v6622_v26 }
 0x288   : > { %1523 = vmatprep.subr.bf16.mxu0 %v6623_v27  ;;  %1629 = vmatprep.subr.bf16.mxu1 %v6624_v28 }
 0x28b   : > { %1524 = vmatpush1.bf16.msra.mxu0 %v6625_v29  ;;  %1630 = vmatpush1.bf16.msra.mxu1 %v6626_v30 }
 0x28c   : > { %1525 = vmatprep.subr.bf16.mxu0 %v6627_v31  ;;  %1631 = vmatprep.subr.bf16.mxu1 %v6628_v32 }
 0x28f   : > { %1526 = vmatpush1.bf16.msra.mxu0 %v6629_v33  ;;  %1632 = vmatpush1.bf16.msra.mxu1 %v6630_v34 }
 0x290   : > { %1527 = vmatprep.subr.bf16.mxu0 %v6631_v35  ;;  %1633 = vmatprep.subr.bf16.mxu1 %v6632_v36 }
 0x293   : > { %1528 = vmatpush1.bf16.msra.mxu0 %v6633_v37  ;;  %1634 = vmatpush1.bf16.msra.mxu1 %v6634_v38 }
 0x294   : > { %1529 = vmatprep.subr.bf16.mxu0 %v6635_v40  ;;  %1635 = vmatprep.subr.bf16.mxu1 %v6636_v41 }
 0x297   : > { %1530 = vmatpush1.bf16.msra.mxu0 %v6637_v42  ;;  %1636 = vmatpush1.bf16.msra.mxu1 %v6638_v43  ;;  %v5273_v43 = vld [vmem:[%s4552_s19 + $0x44] ss:$16 sps:$4 sm:$0xff]  }
 0x298   : > { %1531 = vmatprep.subr.bf16.mxu0 %v6639_v44  ;;  %1637 = vmatprep.subr.bf16.mxu1 %v6640_v45  ;;  %v5277_v44 = vld [vmem:[%s4552_s19 + $0x4c] ss:$16 sps:$4 sm:$0xff]   ;;  %v5285_v45 = vld [vmem:[%s4552_s19 + $0x40] ss:$16 sps:$4 sm:$0xff]  }
 0x29b   : > { %1532 = vmatpush1.bf16.msra.mxu0 %v6641_v46  ;;  %1638 = vmatpush1.bf16.msra.mxu1 %v6642_v47  ;;  %v5289_v46 = vld [vmem:[%s4552_s19 + $0x48] ss:$16 sps:$4 sm:$0xff]   ;;  %v5293_v47 = vld [vmem:[%s4552_s19 + $0x64] ss:$16 sps:$4 sm:$0xff]  }
 0x29c   : > { %1533 = vmatprep.subr.bf16.mxu0 %v6643_v49  ;;  %1639 = vmatprep.subr.bf16.mxu1 %v6644_v50  ;;  %v5297_v49 = vld [vmem:[%s4552_s19 + $0x6c] ss:$16 sps:$4 sm:$0xff]   ;;  %v5301_v50 = vld [vmem:[%s4552_s19 + $0x60] ss:$16 sps:$4 sm:$0xff]  }
 0x29f   : > { %1534 = vmatpush1.bf16.msra.mxu0 %v6645_v51  ;;  %1640 = vmatpush1.bf16.msra.mxu1 %v6646_v52  ;;  %v5305_v51 = vld [vmem:[%s4552_s19 + $0x68] ss:$16 sps:$4 sm:$0xff]   ;;  %v5309_v52 = vld [vmem:[%s4552_s19 + $0x84] ss:$16 sps:$4 sm:$0xff]  }
 0x2a0   : > { %1535 = vmatprep.subr.bf16.mxu0 %v6647_v63  ;;  %1641 = vmatprep.subr.bf16.mxu1 %v6648_v6  ;;  %v5313_v63 = vld [vmem:[%s4552_s19 + $0x8c] ss:$16 sps:$4 sm:$0xff]   ;;  %v5317_v6 = vld [vmem:[%s4552_s19 + $0x80] ss:$16 sps:$4 sm:$0xff]  }
 0x2a3   : > { %1536 = vmatpush1.bf16.msra.mxu0 %v6649_v2  ;;  %1642 = vmatpush1.bf16.msra.mxu1 %v6650_v3 }
 0x2a4   : > { %1537 = vmatprep.subr.bf16.mxu0 %v6651_v5  ;;  %1643 = vmatprep.subr.bf16.mxu1 %v6652_v60 }
 0x2a7   : > { %1538 = vmatpush1.bf16.msra.mxu0 %v6653_v0  ;;  %1644 = vmatpush1.bf16.msra.mxu1 %v6654_v4 }
 0x2a8   : > { %1539 = vmatprep.subr.bf16.mxu0 %v6655_v62  ;;  %1645 = vmatprep.subr.bf16.mxu1 %v6656_v8 }
 0x2ab   : > { %1540 = vmatpush1.bf16.msra.mxu0 %v6657_v9  ;;  %1646 = vmatpush1.bf16.msra.mxu1 %v6658_v11 }
 0x2ac   : > { %1541 = vmatprep.subr.bf16.mxu0 %v6659_v12  ;;  %1647 = vmatprep.subr.bf16.mxu1 %v6660_v13 }
 0x2af   : > { %1542 = vmatpush1.bf16.msra.mxu0 %v6661_v15  ;;  %1648 = vmatpush1.bf16.msra.mxu1 %v6662_v16 }
 0x2b0   : > { %1543 = vmatprep.subr.bf16.mxu0 %v6663_v17  ;;  %1649 = vmatprep.subr.bf16.mxu1 %v6664_v18 }
 0x2b3   : > { %1544 = vmatpush1.bf16.msra.mxu0 %v6665_v19  ;;  %1650 = vmatpush1.bf16.msra.mxu1 %v6666_v20 }
 0x2b6   : > { %1546 = vmatmul.mubr.bf16.vlgmr.msra.gmra.mrb[16].mxu0 %v5182_v39  ;;  %1652 = vmatmul.mubr.bf16.vlgmr.msra.gmra.mrb[16].mxu1 %v5182_v39 }
 0x2b7   : > { %1555 = vmatprep.mubr.bf16.mxu0 %v5192_v14  ;;  %1661 = vmatprep.mubr.bf16.mxu1 %v5192_v14 }
 0x2be   : > { %1556 = vmatmul.mubr.bf16.gmra.mrb[20].mxu0 %v5188_v10  ;;  %1662 = vmatmul.mubr.bf16.gmra.mrb[20].mxu1 %v5188_v10 }
 0x2bf   : > { %1712 = vmatprep.mubr.bf16.mxu0 %v6590_v54  ;;  %1765 = vmatprep.mubr.bf16.mxu1 %v6590_v54 }
 0x389   : > { %v1547_v21 = vpop.f32.mrb[16].mxu0  ;;  %v1653_v22 = vpop.f32.mrb[16].mxu1 }
 0x38a   : > { %v1549_v23 = vpop.f32.mrb[17].mxu0  ;;  %v1655_v24 = vpop.f32.mrb[17].mxu1 }
 0x38b   : > { %v1551_v25 = vpop.f32.mrb[18].mxu0  ;;  %v1657_v26 = vpop.f32.mrb[18].mxu1 }
 0x38c   : > { %v1672_v27 = vpack.c.bf16 %v1551_v25, %v1547_v21  ;;  %v1674_v39 = vpack.c.bf16 %v1657_v26, %v1653_v22  ;;  %v1553_v28 = vpop.f32.mrb[19].mxu0  ;;  %v1659_v29 = vpop.f32.mrb[19].mxu1  ;;  %v5321_v21 = vld [vmem:[%s4552_s19 + $0x88] ss:$16 sps:$4 sm:$0xff]   ;;  %v5325_v22 = vld [vmem:[%s4552_s19 + $0xa4] ss:$16 sps:$4 sm:$0xff]  }
 0x38d   : > { %v1673_v30 = vpack.c.bf16 %v1553_v28, %v1549_v23  ;;  %v1675_v14 = vpack.c.bf16 %v1659_v29, %v1655_v24  ;;  %v5329_v23 = vld [vmem:[%s4552_s19 + $0xac] ss:$16 sps:$4 sm:$0xff]   ;;  %v5333_v24 = vld [vmem:[%s4552_s19 + $0xa0] ss:$16 sps:$4 sm:$0xff]   ;;  %v5337_v25 = vld [vmem:[%s4552_s19 + $0xa8] ss:$16 sps:$4 sm:$0xff]  }
 0x38e   : > { %6667 = vst [vmem:[#allocation5_spill] sm:$0xff] %v5337_v25  ;;  %v5341_v26 = vld [vmem:[%s4552_s19 + $0xc4] ss:$16 sps:$4 sm:$0xff]   ;;  %v5353_v28 = vld [vmem:[%s4552_s19 + $0xc8] ss:$16 sps:$4 sm:$0xff]  }
 0x38f   : > { %1680 = vmatprep.subr.bf16.mxu0 %v1673_v30  ;;  %1733 = vmatprep.subr.bf16.mxu1 %v1675_v14  ;;  %6668 = vst [vmem:[#allocation6_spill] sm:$0xff] %v5341_v26  ;;  %6671 = vst [vmem:[#allocation9_spill] sm:$0xff] %v5353_v28  ;;  %v5357_v29 = vld [vmem:[%s4552_s19 + $0xe4] ss:$16 sps:$4 sm:$0xff]   ;;  %v5361_v30 = vld [vmem:[%s4552_s19 + $0xec] ss:$16 sps:$4 sm:$0xff]  }
 0x390   : > { %1681 = vmatpush1.bf16.msra.mxu0 %v1672_v27  ;;  %1734 = vmatpush1.bf16.msra.mxu1 %v1674_v39  ;;  %v5345_v27 = vld [vmem:[%s4552_s19 + $0xcc] ss:$16 sps:$4 sm:$0xff]   ;;  %v5349_v39 = vld [vmem:[%s4552_s19 + $0xc0] ss:$16 sps:$4 sm:$0xff]   ;;  %6672 = vst [vmem:[#allocation10_spill] sm:$0xff] %v5357_v29  ;;  %6673 = vst [vmem:[#allocation11_spill] sm:$0xff] %v5361_v30 }
 0x391   : > { %v1557_v10 = vpop.f32.mrb[20].mxu0  ;;  %v1663_v31 = vpop.f32.mrb[20].mxu1  ;;  %6669 = vst [vmem:[#allocation7_spill] sm:$0xff] %v5345_v27  ;;  %6670 = vst [vmem:[#allocation8_spill] sm:$0xff] %v5349_v39  ;;  %v5365_v14 = vld [vmem:[%s4552_s19 + $0xe0] ss:$16 sps:$4 sm:$0xff]  }
 0x392   : > { %v1559_v32 = vpop.f32.mrb[21].mxu0  ;;  %v1665_v33 = vpop.f32.mrb[21].mxu1  ;;  %6674 = vst [vmem:[#allocation12_spill] sm:$0xff] %v5365_v14 }
 0x393   : > { %v1561_v34 = vpop.f32.mrb[22].mxu0  ;;  %v1667_v35 = vpop.f32.mrb[22].mxu1 }
 0x394   : > { %v1676_v36 = vpack.c.bf16 %v1561_v34, %v1557_v10  ;;  %v1678_v37 = vpack.c.bf16 %v1667_v35, %v1663_v31  ;;  %v1563_v38 = vpop.f32.mrb[23].mxu0  ;;  %v1669_v40 = vpop.f32.mrb[23].mxu1  ;;  %v5369_v10 = vld [vmem:[%s4552_s19 + $0xe8] ss:$16 sps:$4 sm:$0xff]   ;;  %v5373_v31 = vld [vmem:[%s4552_s19 + $0x104] ss:$16 sps:$4 sm:$0xff]  }
 0x395   : > { %v1677_v41 = vpack.c.bf16 %v1563_v38, %v1559_v32  ;;  %v1679_v42 = vpack.c.bf16 %v1669_v40, %v1665_v33  ;;  %6675 = vst [vmem:[#allocation13_spill] sm:$0xff] %v5369_v10  ;;  %6676 = vst [vmem:[#allocation14_spill] sm:$0xff] %v5373_v31  ;;  %v5377_v32 = vld [vmem:[%s4552_s19 + $0x10c] ss:$16 sps:$4 sm:$0xff]   ;;  %v5381_v33 = vld [vmem:[%s4552_s19 + $0x100] ss:$16 sps:$4 sm:$0xff]  }
 0x396   : > { %6677 = vst [vmem:[#allocation15_spill] sm:$0xff] %v5377_v32  ;;  %6678 = vst [vmem:[#allocation16_spill] sm:$0xff] %v5381_v33  ;;  %v5385_v34 = vld [vmem:[%s4552_s19 + $0x108] ss:$16 sps:$4 sm:$0xff]   ;;  %v5389_v35 = vld [vmem:[%s4552_s19 + $0x124] ss:$16 sps:$4 sm:$0xff]  }
 0x397   : > { %1682 = vmatprep.subr.bf16.mxu0 %v1677_v41  ;;  %1735 = vmatprep.subr.bf16.mxu1 %v1679_v42  ;;  %6679 = vst [vmem:[#allocation17_spill] sm:$0xff] %v5385_v34  ;;  %6680 = vst [vmem:[#allocation18_spill] sm:$0xff] %v5389_v35  ;;  %v5401_v38 = vld [vmem:[%s4552_s19 + $0x128] ss:$16 sps:$4 sm:$0xff]   ;;  %v5405_v40 = vld [vmem:[%s4552_s19 + $0x144] ss:$16 sps:$4 sm:$0xff]  }
 0x398   : > { %1683 = vmatpush1.bf16.msra.mxu0 %v1676_v36  ;;  %1736 = vmatpush1.bf16.msra.mxu1 %v1678_v37  ;;  %v5393_v36 = vld [vmem:[%s4552_s19 + $0x12c] ss:$16 sps:$4 sm:$0xff]   ;;  %v5397_v37 = vld [vmem:[%s4552_s19 + $0x120] ss:$16 sps:$4 sm:$0xff]   ;;  %6683 = vst [vmem:[#allocation21_spill] sm:$0xff] %v5401_v38  ;;  %6684 = vst [vmem:[#allocation22_spill] sm:$0xff] %v5405_v40 }
 0x399   : > { %1810 = vmatprep.subr.bf16.mxu0 %v5078_v56  ;;  %1916 = vmatprep.subr.bf16.mxu1 %v5082_v53  ;;  %6681 = vst [vmem:[#allocation19_spill] sm:$0xff] %v5393_v36  ;;  %6682 = vst [vmem:[#allocation20_spill] sm:$0xff] %v5397_v37  ;;  %v5409_v41 = vld [vmem:[%s4552_s19 + $0x14c] ss:$16 sps:$4 sm:$0xff]   ;;  %v5413_v42 = vld [vmem:[%s4552_s19 + $0x140] ss:$16 sps:$4 sm:$0xff]  }
 0x39a   : > { %6685 = vst [vmem:[#allocation23_spill] sm:$0xff] %v5409_v41  ;;  %6686 = vst [vmem:[#allocation24_spill] sm:$0xff] %v5413_v42 }
 0x39b   : > { %3695 = vmatmul.mubr.msk.bf16.vlgmr.msra.gmra.mrb[24].mxu0 %vm1323_vm0, %v5075_v59  ;;  %3697 = vmatmul.mubr.msk.bf16.vlgmr.msra.gmra.mrb[24].mxu1 %vm1323_vm0, %v5075_v59 }
 0x39c   : > { %1722 = vmatprep.mubr.bf16.mxu0 %v6590_v54  ;;  %1775 = vmatprep.mubr.bf16.mxu1 %v6590_v54 }
 0x39d   : > { %1811 = vmatpush1.bf16.msra.mxu0 %v5092_v55  ;;  %1917 = vmatpush1.bf16.msra.mxu1 %v5096_v57 }
 0x39e   : > { %1812 = vmatprep.subr.bf16.mxu0 %v5100_v58  ;;  %1918 = vmatprep.subr.bf16.mxu1 %v5104_v61 }
 0x3a1   : > { %1813 = vmatpush1.bf16.msra.mxu0 %v5113_v7  ;;  %1919 = vmatpush1.bf16.msra.mxu1 %v5117_v48 }
 0x3a2   : > { %1814 = vmatprep.subr.bf16.mxu0 %v5273_v43  ;;  %1920 = vmatprep.subr.bf16.mxu1 %v5277_v44 }
 0x3a3   : > { %3696 = vmatmul.mubr.msk.bf16.gmra.mrb[28].mxu0 %vm1323_vm0, %v5110_v1  ;;  %3698 = vmatmul.mubr.msk.bf16.gmra.mrb[28].mxu1 %vm1323_vm0, %v5110_v1 }
 0x3a5   : > { %1815 = vmatpush1.bf16.msra.mxu0 %v5285_v45  ;;  %1921 = vmatpush1.bf16.msra.mxu1 %v5289_v46 }
 0x3a6   : > { %1816 = vmatprep.subr.bf16.mxu0 %v5293_v47  ;;  %1922 = vmatprep.subr.bf16.mxu1 %v5297_v49 }
 0x3a9   : > { %1817 = vmatpush1.bf16.msra.mxu0 %v5301_v50  ;;  %1923 = vmatpush1.bf16.msra.mxu1 %v5305_v51 }
 0x3aa   : > { %1818 = vmatprep.subr.bf16.mxu0 %v5309_v52  ;;  %1924 = vmatprep.subr.bf16.mxu1 %v5313_v63 }
 0x3ad   : > { %1819 = vmatpush1.bf16.msra.mxu0 %v5317_v6  ;;  %1925 = vmatpush1.bf16.msra.mxu1 %v5321_v21 }
 0x3ae   : > { %1820 = vmatprep.subr.bf16.mxu0 %v5325_v22  ;;  %1926 = vmatprep.subr.bf16.mxu1 %v5329_v23 }
 0x3b1   : > { %1821 = vmatpush1.bf16.msra.mxu0 %v5333_v24  ;;  %1927 = vmatpush1.bf16.msra.mxu1 %v5337_v25 }
 0x3b2   : > { %1822 = vmatprep.subr.bf16.mxu0 %v5341_v26  ;;  %1928 = vmatprep.subr.bf16.mxu1 %v5345_v27 }
 0x3b5   : > { %1823 = vmatpush1.bf16.msra.mxu0 %v5349_v39  ;;  %1929 = vmatpush1.bf16.msra.mxu1 %v5353_v28 }
 0x3b6   : > { %1824 = vmatprep.subr.bf16.mxu0 %v5357_v29  ;;  %1930 = vmatprep.subr.bf16.mxu1 %v5361_v30 }
 0x3b9   : > { %1825 = vmatpush1.bf16.msra.mxu0 %v5365_v14  ;;  %1931 = vmatpush1.bf16.msra.mxu1 %v5369_v10 }
 0x3ba   : > { %1826 = vmatprep.subr.bf16.mxu0 %v5373_v31  ;;  %1932 = vmatprep.subr.bf16.mxu1 %v5377_v32 }
 0x3bd   : > { %1827 = vmatpush1.bf16.msra.mxu0 %v5381_v33  ;;  %1933 = vmatpush1.bf16.msra.mxu1 %v5385_v34 }
 0x3be   : > { %1828 = vmatprep.subr.bf16.mxu0 %v5389_v35  ;;  %1934 = vmatprep.subr.bf16.mxu1 %v5393_v36  ;;  %v5485_v36 = vld [vmem:[%s4552_s19 + $0x1e4] ss:$16 sps:$4 sm:$0xff]  }
 0x3bf   : > { %6704 = vst [vmem:[#allocation42_spill] sm:$0xff] %v5485_v36 }
 0x3c1   : > { %1829 = vmatpush1.bf16.msra.mxu0 %v5397_v37  ;;  %1935 = vmatpush1.bf16.msra.mxu1 %v5401_v38  ;;  %v5417_v37 = vld [vmem:[%s4552_s19 + $0x148] ss:$16 sps:$4 sm:$0xff]   ;;  %v5421_v38 = vld [vmem:[%s4552_s19 + $0x164] ss:$16 sps:$4 sm:$0xff]  }
 0x3c2   : > { %1830 = vmatprep.subr.bf16.mxu0 %v5405_v40  ;;  %1936 = vmatprep.subr.bf16.mxu1 %v5409_v41  ;;  %6687 = vst [vmem:[#allocation25_spill] sm:$0xff] %v5417_v37  ;;  %6688 = vst [vmem:[#allocation26_spill] sm:$0xff] %v5421_v38  ;;  %v5425_v40 = vld [vmem:[%s4552_s19 + $0x16c] ss:$16 sps:$4 sm:$0xff]   ;;  %v5429_v41 = vld [vmem:[%s4552_s19 + $0x160] ss:$16 sps:$4 sm:$0xff]  }
 0x3c3   : > { %6689 = vst [vmem:[#allocation27_spill] sm:$0xff] %v5425_v40  ;;  %6690 = vst [vmem:[#allocation28_spill] sm:$0xff] %v5429_v41 }
 0x3c5   : > { %1831 = vmatpush1.bf16.msra.mxu0 %v5413_v42  ;;  %1937 = vmatpush1.bf16.msra.mxu1 %v5417_v37  ;;  %v5433_v42 = vld [vmem:[%s4552_s19 + $0x168] ss:$16 sps:$4 sm:$0xff]   ;;  %v5437_v37 = vld [vmem:[%s4552_s19 + $0x184] ss:$16 sps:$4 sm:$0xff]  }
 0x3c6   : > { %1832 = vmatprep.subr.bf16.mxu0 %v5421_v38  ;;  %1938 = vmatprep.subr.bf16.mxu1 %v5425_v40  ;;  %6691 = vst [vmem:[#allocation29_spill] sm:$0xff] %v5433_v42  ;;  %6692 = vst [vmem:[#allocation30_spill] sm:$0xff] %v5437_v37  ;;  %v5441_v38 = vld [vmem:[%s4552_s19 + $0x18c] ss:$16 sps:$4 sm:$0xff]   ;;  %v5445_v40 = vld [vmem:[%s4552_s19 + $0x180] ss:$16 sps:$4 sm:$0xff]  }
 0x3c7   : > { %6693 = vst [vmem:[#allocation31_spill] sm:$0xff] %v5441_v38  ;;  %6694 = vst [vmem:[#allocation32_spill] sm:$0xff] %v5445_v40 }
 0x3c9   : > { %1833 = vmatpush1.bf16.msra.mxu0 %v5429_v41  ;;  %1939 = vmatpush1.bf16.msra.mxu1 %v5433_v42  ;;  %v5449_v41 = vld [vmem:[%s4552_s19 + $0x188] ss:$16 sps:$4 sm:$0xff]   ;;  %v5453_v42 = vld [vmem:[%s4552_s19 + $0x1a4] ss:$16 sps:$4 sm:$0xff]  }
 0x3ca   : > { %1834 = vmatprep.subr.bf16.mxu0 %v5437_v37  ;;  %1940 = vmatprep.subr.bf16.mxu1 %v5441_v38  ;;  %6695 = vst [vmem:[#allocation33_spill] sm:$0xff] %v5449_v41  ;;  %6696 = vst [vmem:[#allocation34_spill] sm:$0xff] %v5453_v42  ;;  %v5457_v37 = vld [vmem:[%s4552_s19 + $0x1ac] ss:$16 sps:$4 sm:$0xff]   ;;  %v5461_v38 = vld [vmem:[%s4552_s19 + $0x1a0] ss:$16 sps:$4 sm:$0xff]  }
 0x3cb   : > { %6697 = vst [vmem:[#allocation35_spill] sm:$0xff] %v5457_v37  ;;  %6698 = vst [vmem:[#allocation36_spill] sm:$0xff] %v5461_v38 }
 0x3cd   : > { %1835 = vmatpush1.bf16.msra.mxu0 %v5445_v40  ;;  %1941 = vmatpush1.bf16.msra.mxu1 %v5449_v41  ;;  %v5465_v40 = vld [vmem:[%s4552_s19 + $0x1a8] ss:$16 sps:$4 sm:$0xff]   ;;  %v5469_v41 = vld [vmem:[%s4552_s19 + $0x1c4] ss:$16 sps:$4 sm:$0xff]  }
 0x3ce   : > { %1836 = vmatprep.subr.bf16.mxu0 %v5453_v42  ;;  %1942 = vmatprep.subr.bf16.mxu1 %v5457_v37  ;;  %6699 = vst [vmem:[#allocation37_spill] sm:$0xff] %v5465_v40  ;;  %6700 = vst [vmem:[#allocation38_spill] sm:$0xff] %v5469_v41  ;;  %v5473_v42 = vld [vmem:[%s4552_s19 + $0x1cc] ss:$16 sps:$4 sm:$0xff]   ;;  %v5477_v37 = vld [vmem:[%s4552_s19 + $0x1c0] ss:$16 sps:$4 sm:$0xff]  }
 0x3cf   : > { %6701 = vst [vmem:[#allocation39_spill] sm:$0xff] %v5473_v42  ;;  %6702 = vst [vmem:[#allocation40_spill] sm:$0xff] %v5477_v37 }
 0x3d1   : > { %1837 = vmatpush1.bf16.msra.mxu0 %v5461_v38  ;;  %1943 = vmatpush1.bf16.msra.mxu1 %v5465_v40  ;;  %v5481_v38 = vld [vmem:[%s4552_s19 + $0x1c8] ss:$16 sps:$4 sm:$0xff]   ;;  %v5489_v40 = vld [vmem:[%s4552_s19 + $0x1ec] ss:$16 sps:$4 sm:$0xff]  }
 0x3d2   : > { %1838 = vmatprep.subr.bf16.mxu0 %v5469_v41  ;;  %1944 = vmatprep.subr.bf16.mxu1 %v5473_v42  ;;  %6703 = vst [vmem:[#allocation41_spill] sm:$0xff] %v5481_v38  ;;  %6705 = vst [vmem:[#allocation43_spill] sm:$0xff] %v5489_v40  ;;  %v5493_v41 = vld [vmem:[%s4552_s19 + $0x1e0] ss:$16 sps:$4 sm:$0xff]   ;;  %v5497_v42 = vld [vmem:[%s4552_s19 + $0x1e8] ss:$16 sps:$4 sm:$0xff]  }
 0x3d3   : > { %6706 = vst [vmem:[#allocation44_spill] sm:$0xff] %v5493_v41  ;;  %6707 = vst [vmem:[#allocation45_spill] sm:$0xff] %v5497_v42 }
 0x3d5   : > { %1839 = vmatpush1.bf16.msra.mxu0 %v5477_v37  ;;  %1945 = vmatpush1.bf16.msra.mxu1 %v5481_v38  ;;  %v5501_v37 = vld [vmem:[%s4552_s19 + $0x204] ss:$16 sps:$4 sm:$0xff]   ;;  %v5505_v38 = vld [vmem:[%s4552_s19 + $0x20c] ss:$16 sps:$4 sm:$0xff]  }
 0x3d6   : > { %1840 = vmatprep.subr.bf16.mxu0 %v5485_v36  ;;  %1946 = vmatprep.subr.bf16.mxu1 %v5489_v40  ;;  %6708 = vst [vmem:[#allocation46_spill] sm:$0xff] %v5501_v37  ;;  %6709 = vst [vmem:[#allocation47_spill] sm:$0xff] %v5505_v38 }
 0x3d9   : > { %1841 = vmatpush1.bf16.msra.mxu0 %v5493_v41  ;;  %1947 = vmatpush1.bf16.msra.mxu1 %v5497_v42 }
 0x3da   : > { %1863 = vmatprep.subr.bf16.mxu0 %v5501_v37  ;;  %1969 = vmatprep.subr.bf16.mxu1 %v5505_v38 }
 0x46e   : > { %v1714_v36 = vpop.f32.mrb[24].mxu0  ;;  %v1767_v35 = vpop.f32.mrb[24].mxu1 }
 0x46f   : > { %v1716_v34 = vpop.f32.mrb[25].mxu0  ;;  %v1788_v40 = vmax.f32 %v1767_v35, 0.0  ;;  %v1769_v33 = vpop.f32.mrb[25].mxu1  ;;  %v1786_v10 = vmax.f32 %v1714_v36, 0.0 }
 0x470   : > { %v1718_v32 = vpop.f32.mrb[26].mxu0  ;;  %v1789_v31 = vmax.f32 %v1769_v33, 0.0  ;;  %v1771_v41 = vpop.f32.mrb[26].mxu1  ;;  %v1787_v28 = vmax.f32 %v1716_v34, 0.0 }
 0x471   : > { %v1790_v14 = vmax.f32 %v1718_v32, 0.0  ;;  %v1720_v30 = vpop.f32.mrb[27].mxu0  ;;  %v1792_v42 = vmax.f32 %v1771_v41, 0.0  ;;  %v1773_v29 = vpop.f32.mrb[27].mxu1  ;;  %v5511_v41 = vld [vmem:[%s4552_s19 + $0x200] ss:$16 sps:$4 sm:$0xff]  }
 0x472   : > { %v1791_v39 = vmax.f32 %v1720_v30, 0.0  ;;  %v1793_v37 = vmax.f32 %v1773_v29, 0.0  ;;  %v5515_v29 = vld [vmem:[%s4552_s19 + $0x208] ss:$16 sps:$4 sm:$0xff]  }
 0x473   : > { %v1802_v27 = vpack.c.bf16 %v1790_v14, %v1786_v10  ;;  %v5508_v38 = vpack.c.bf16 %v1792_v42, %v1788_v40  ;;  %6710 = vst [vmem:[#allocation48_spill] sm:$0xff] %v5515_v29  ;;  %v5519_v10 = vld [vmem:[%s4552_s19 + $0x224] ss:$16 sps:$4 sm:$0xff]  }
 0x474   : > { %v1803_v26 = vpack.c.bf16 %v1791_v39, %v1787_v28  ;;  %v1805_v25 = vpack.c.bf16 %v1793_v37, %v1789_v31  ;;  %6711 = vst [vmem:[#allocation49_spill] sm:$0xff] %v5519_v10 }
 0x476   : > { %1842 = vmatprep.mubr.bf16.mxu0 %v1803_v26  ;;  %1948 = vmatprep.mubr.bf16.mxu1 %v1803_v26  ;;  %v1724_v35 = vpop.f32.mrb[28].mxu0  ;;  %v1777_v33 = vpop.f32.mrb[28].mxu1 }
 0x477   : > { %1843 = vmatmul.mubr.bf16.vlgmr.msra.gmra.mrb[32].mxu0 %v1802_v27  ;;  %1949 = vmatmul.mubr.bf16.vlgmr.msra.gmra.mrb[32].mxu1 %v1802_v27  ;;  %v1794_v32 = vmax.f32 %v1724_v35, 0.0  ;;  %v1726_v36 = vpop.f32.mrb[29].mxu0  ;;  %v1796_v34 = vmax.f32 %v1777_v33, 0.0  ;;  %v1779_v30 = vpop.f32.mrb[29].mxu1  ;;  %v5523_v27 = vld [vmem:[%s4552_s19 + $0x22c] ss:$16 sps:$4 sm:$0xff]  }
 0x478   : > { %1864 = vmatpush1.bf16.msra.mxu0 %v5511_v41  ;;  %1970 = vmatpush1.bf16.msra.mxu1 %v5515_v29  ;;  %v1795_v39 = vmax.f32 %v1726_v36, 0.0  ;;  %v1728_v26 = vpop.f32.mrb[30].mxu0  ;;  %v1797_v28 = vmax.f32 %v1779_v30, 0.0  ;;  %v1781_v14 = vpop.f32.mrb[30].mxu1  ;;  %v5529_v29 = vld [vmem:[%s4552_s19 + $0x220] ss:$16 sps:$4 sm:$0xff]  }
 0x479   : > { %1865 = vmatprep.subr.bf16.mxu0 %v5519_v10  ;;  %1971 = vmatprep.subr.bf16.mxu1 %v5523_v27  ;;  %v1798_v31 = vmax.f32 %v1728_v26, 0.0  ;;  %v1730_v37 = vpop.f32.mrb[31].mxu0  ;;  %v1800_v40 = vmax.f32 %v1781_v14, 0.0  ;;  %v1783_v42 = vpop.f32.mrb[31].mxu1  ;;  %v5533_v10 = vld [vmem:[%s4552_s19 + $0x228] ss:$16 sps:$4 sm:$0xff]  }
 0x47a   : > { %v1799_v35 = vmax.f32 %v1730_v37, 0.0  ;;  %v1801_v33 = vmax.f32 %v1783_v42, 0.0  ;;  %v5539_v37 = vld [vmem:[%s4552_s19 + $0x244] ss:$16 sps:$4 sm:$0xff]   ;;  %v5567_v42 = vld [vmem:[%s4552_s19 + $0x268] ss:$16 sps:$4 sm:$0xff]  }
 0x47b   : > { %v1806_v36 = vpack.c.bf16 %v1798_v31, %v1794_v32  ;;  %v5526_v30 = vpack.c.bf16 %v1800_v40, %v1796_v34  ;;  %v5543_v32 = vld [vmem:[%s4552_s19 + $0x24c] ss:$16 sps:$4 sm:$0xff]   ;;  %v5547_v34 = vld [vmem:[%s4552_s19 + $0x240] ss:$16 sps:$4 sm:$0xff]   ;;  %6712 = vst [vmem:[#allocation50_spill] sm:$0xff] %v5567_v42 }
 0x47c   : > { %1866 = vmatpush1.bf16.msra.mxu0 %v5529_v29  ;;  %1972 = vmatpush1.bf16.msra.mxu1 %v5533_v10  ;;  %v1807_v26 = vpack.c.bf16 %v1799_v35, %v1795_v39  ;;  %v5536_v14 = vpack.c.bf16 %v1801_v33, %v1797_v28  ;;  %v5551_v39 = vld [vmem:[%s4552_s19 + $0x248] ss:$16 sps:$4 sm:$0xff]   ;;  %v5555_v28 = vld [vmem:[%s4552_s19 + $0x264] ss:$16 sps:$4 sm:$0xff]   ;;  %v5559_v31 = vld [vmem:[%s4552_s19 + $0x26c] ss:$16 sps:$4 sm:$0xff]  }
 0x47d   : > { %1867 = vmatprep.subr.bf16.mxu0 %v5539_v37  ;;  %1973 = vmatprep.subr.bf16.mxu1 %v5543_v32  ;;  %v5563_v40 = vld [vmem:[%s4552_s19 + $0x260] ss:$16 sps:$4 sm:$0xff]   ;;  %v5571_v35 = vld [vmem:[%s4552_s19 + $0x284] ss:$16 sps:$4 sm:$0xff]   ;;  %v5575_v33 = vld [vmem:[%s4552_s19 + $0x28c] ss:$16 sps:$4 sm:$0xff]  }
 0x47e   : > { %1852 = vmatprep.mubr.bf16.mxu0 %v1807_v26  ;;  %1958 = vmatprep.mubr.bf16.mxu1 %v1807_v26  ;;  %6713 = vst [vmem:[#allocation51_spill] sm:$0xff] %v5571_v35  ;;  %6714 = vst [vmem:[#allocation52_spill] sm:$0xff] %v5575_v33  ;;  %v5587_v26 = vld [vmem:[%s4552_s19 + $0x2a4] ss:$16 sps:$4 sm:$0xff]  }
 0x47f   : > { %1853 = vmatmul.mubr.bf16.gmra.mrb[36].mxu0 %v1806_v36  ;;  %1959 = vmatmul.mubr.bf16.gmra.mrb[36].mxu1 %v1806_v36  ;;  %v5583_v36 = vld [vmem:[%s4552_s19 + $0x288] ss:$16 sps:$4 sm:$0xff]   ;;  %6717 = vst [vmem:[#allocation55_spill] sm:$0xff] %v5587_v26 }
 0x480   : > { %1868 = vmatpush1.bf16.msra.mxu0 %v5547_v34  ;;  %1974 = vmatpush1.bf16.msra.mxu1 %v5551_v39  ;;  %6716 = vst [vmem:[#allocation54_spill] sm:$0xff] %v5583_v36 }
 0x481   : > { %1869 = vmatprep.subr.bf16.mxu0 %v5555_v28  ;;  %1975 = vmatprep.subr.bf16.mxu1 %v5559_v31 }
 0x482   : > { %1895 = vmatprep.mubr.bf16.mxu0 %v1805_v25  ;;  %2001 = vmatprep.mubr.bf16.mxu1 %v1805_v25  ;;  %v5579_v25 = vld [vmem:[%s4552_s19 + $0x280] ss:$16 sps:$4 sm:$0xff]  }
 0x483   : > { %6715 = vst [vmem:[#allocation53_spill] sm:$0xff] %v5579_v25 }
 0x484   : > { %1870 = vmatpush1.bf16.msra.mxu0 %v5563_v40  ;;  %1976 = vmatpush1.bf16.msra.mxu1 %v5567_v42  ;;  %v5667_v42 = vld [vmem:[%s4552_s19 + $0x344] ss:$16 sps:$4 sm:$0xff]  }
 0x485   : > { %1871 = vmatprep.subr.bf16.mxu0 %v5571_v35  ;;  %1977 = vmatprep.subr.bf16.mxu1 %v5575_v33  ;;  %v5591_v35 = vld [vmem:[%s4552_s19 + $0x2ac] ss:$16 sps:$4 sm:$0xff]   ;;  %v5595_v33 = vld [vmem:[%s4552_s19 + $0x2a0] ss:$16 sps:$4 sm:$0xff]   ;;  %6737 = vst [vmem:[#allocation75_spill] sm:$0xff] %v5667_v42 }
 0x486   : > { %6718 = vst [vmem:[#allocation56_spill] sm:$0xff] %v5591_v35  ;;  %6719 = vst [vmem:[#allocation57_spill] sm:$0xff] %v5595_v33 }
 0x488   : > { %1872 = vmatpush1.bf16.msra.mxu0 %v5579_v25  ;;  %1978 = vmatpush1.bf16.msra.mxu1 %v5583_v36  ;;  %v5599_v25 = vld [vmem:[%s4552_s19 + $0x2a8] ss:$16 sps:$4 sm:$0xff]   ;;  %v5603_v36 = vld [vmem:[%s4552_s19 + $0x2c4] ss:$16 sps:$4 sm:$0xff]  }
 0x489   : > { %1873 = vmatprep.subr.bf16.mxu0 %v5587_v26  ;;  %1979 = vmatprep.subr.bf16.mxu1 %v5591_v35  ;;  %6720 = vst [vmem:[#allocation58_spill] sm:$0xff] %v5599_v25  ;;  %6721 = vst [vmem:[#allocation59_spill] sm:$0xff] %v5603_v36  ;;  %v5607_v26 = vld [vmem:[%s4552_s19 + $0x2cc] ss:$16 sps:$4 sm:$0xff]   ;;  %v5611_v35 = vld [vmem:[%s4552_s19 + $0x2c0] ss:$16 sps:$4 sm:$0xff]  }
 0x48a   : > { %6722 = vst [vmem:[#allocation60_spill] sm:$0xff] %v5607_v26  ;;  %6723 = vst [vmem:[#allocation61_spill] sm:$0xff] %v5611_v35 }
 0x48c   : > { %1874 = vmatpush1.bf16.msra.mxu0 %v5595_v33  ;;  %1980 = vmatpush1.bf16.msra.mxu1 %v5599_v25  ;;  %v5615_v33 = vld [vmem:[%s4552_s19 + $0x2c8] ss:$16 sps:$4 sm:$0xff]   ;;  %v5619_v25 = vld [vmem:[%s4552_s19 + $0x2e4] ss:$16 sps:$4 sm:$0xff]  }
 0x48d   : > { %1875 = vmatprep.subr.bf16.mxu0 %v5603_v36  ;;  %1981 = vmatprep.subr.bf16.mxu1 %v5607_v26  ;;  %6724 = vst [vmem:[#allocation62_spill] sm:$0xff] %v5615_v33  ;;  %6725 = vst [vmem:[#allocation63_spill] sm:$0xff] %v5619_v25  ;;  %v5623_v36 = vld [vmem:[%s4552_s19 + $0x2ec] ss:$16 sps:$4 sm:$0xff]   ;;  %v5627_v26 = vld [vmem:[%s4552_s19 + $0x2e0] ss:$16 sps:$4 sm:$0xff]  }
 0x48e   : > { %6726 = vst [vmem:[#allocation64_spill] sm:$0xff] %v5623_v36  ;;  %6727 = vst [vmem:[#allocation65_spill] sm:$0xff] %v5627_v26 }
 0x490   : > { %1876 = vmatpush1.bf16.msra.mxu0 %v5611_v35  ;;  %1982 = vmatpush1.bf16.msra.mxu1 %v5615_v33  ;;  %v5631_v35 = vld [vmem:[%s4552_s19 + $0x2e8] ss:$16 sps:$4 sm:$0xff]   ;;  %v5635_v33 = vld [vmem:[%s4552_s19 + $0x304] ss:$16 sps:$4 sm:$0xff]  }
 0x491   : > { %1877 = vmatprep.subr.bf16.mxu0 %v5619_v25  ;;  %1983 = vmatprep.subr.bf16.mxu1 %v5623_v36  ;;  %6728 = vst [vmem:[#allocation66_spill] sm:$0xff] %v5631_v35  ;;  %6729 = vst [vmem:[#allocation67_spill] sm:$0xff] %v5635_v33  ;;  %v5639_v25 = vld [vmem:[%s4552_s19 + $0x30c] ss:$16 sps:$4 sm:$0xff]   ;;  %v5643_v36 = vld [vmem:[%s4552_s19 + $0x300] ss:$16 sps:$4 sm:$0xff]  }
 0x492   : > { %6730 = vst [vmem:[#allocation68_spill] sm:$0xff] %v5639_v25  ;;  %6731 = vst [vmem:[#allocation69_spill] sm:$0xff] %v5643_v36 }
 0x494   : > { %1878 = vmatpush1.bf16.msra.mxu0 %v5627_v26  ;;  %1984 = vmatpush1.bf16.msra.mxu1 %v5631_v35  ;;  %v5647_v26 = vld [vmem:[%s4552_s19 + $0x308] ss:$16 sps:$4 sm:$0xff]   ;;  %v5651_v35 = vld [vmem:[%s4552_s19 + $0x324] ss:$16 sps:$4 sm:$0xff]  }
 0x495   : > { %1879 = vmatprep.subr.bf16.mxu0 %v5635_v33  ;;  %1985 = vmatprep.subr.bf16.mxu1 %v5639_v25  ;;  %6732 = vst [vmem:[#allocation70_spill] sm:$0xff] %v5647_v26  ;;  %6733 = vst [vmem:[#allocation71_spill] sm:$0xff] %v5651_v35  ;;  %v5655_v33 = vld [vmem:[%s4552_s19 + $0x32c] ss:$16 sps:$4 sm:$0xff]   ;;  %v5659_v25 = vld [vmem:[%s4552_s19 + $0x320] ss:$16 sps:$4 sm:$0xff]  }
 0x496   : > { %6734 = vst [vmem:[#allocation72_spill] sm:$0xff] %v5655_v33  ;;  %6735 = vst [vmem:[#allocation73_spill] sm:$0xff] %v5659_v25 }
 0x498   : > { %1880 = vmatpush1.bf16.msra.mxu0 %v5643_v36  ;;  %1986 = vmatpush1.bf16.msra.mxu1 %v5647_v26  ;;  %v5663_v36 = vld [vmem:[%s4552_s19 + $0x328] ss:$16 sps:$4 sm:$0xff]   ;;  %v5671_v26 = vld [vmem:[%s4552_s19 + $0x34c] ss:$16 sps:$4 sm:$0xff]  }
 0x499   : > { %1881 = vmatprep.subr.bf16.mxu0 %v5651_v35  ;;  %1987 = vmatprep.subr.bf16.mxu1 %v5655_v33  ;;  %6736 = vst [vmem:[#allocation74_spill] sm:$0xff] %v5663_v36  ;;  %6738 = vst [vmem:[#allocation76_spill] sm:$0xff] %v5671_v26  ;;  %v5675_v35 = vld [vmem:[%s4552_s19 + $0x340] ss:$16 sps:$4 sm:$0xff]   ;;  %v5679_v33 = vld [vmem:[%s4552_s19 + $0x348] ss:$16 sps:$4 sm:$0xff]  }
 0x49a   : > { %6739 = vst [vmem:[#allocation77_spill] sm:$0xff] %v5675_v35  ;;  %6740 = vst [vmem:[#allocation78_spill] sm:$0xff] %v5679_v33 }
 0x49c   : > { %1882 = vmatpush1.bf16.msra.mxu0 %v5659_v25  ;;  %1988 = vmatpush1.bf16.msra.mxu1 %v5663_v36  ;;  %v5683_v25 = vld [vmem:[%s4552_s19 + $0x364] ss:$16 sps:$4 sm:$0xff]   ;;  %v5687_v36 = vld [vmem:[%s4552_s19 + $0x36c] ss:$16 sps:$4 sm:$0xff]  }
 0x49d   : > { %1883 = vmatprep.subr.bf16.mxu0 %v5667_v42  ;;  %1989 = vmatprep.subr.bf16.mxu1 %v5671_v26  ;;  %6741 = vst [vmem:[#allocation79_spill] sm:$0xff] %v5683_v25  ;;  %6742 = vst [vmem:[#allocation80_spill] sm:$0xff] %v5687_v36 }
 0x4a0   : > { %1884 = vmatpush1.bf16.msra.mxu0 %v5675_v35  ;;  %1990 = vmatpush1.bf16.msra.mxu1 %v5679_v33 }
 0x4a1   : > { %1885 = vmatprep.subr.bf16.mxu0 %v5683_v25  ;;  %1991 = vmatprep.subr.bf16.mxu1 %v5687_v36 }
 0x4a4   : > { %1886 = vmatpush1.bf16.msra.mxu0 %v6649_v2  ;;  %1992 = vmatpush1.bf16.msra.mxu1 %v6650_v3 }
 0x4a5   : > { %1887 = vmatprep.subr.bf16.mxu0 %v6651_v5  ;;  %1993 = vmatprep.subr.bf16.mxu1 %v6652_v60 }
 0x4a8   : > { %1888 = vmatpush1.bf16.msra.mxu0 %v6653_v0  ;;  %1994 = vmatpush1.bf16.msra.mxu1 %v6654_v4 }
 0x4a9   : > { %1889 = vmatprep.subr.bf16.mxu0 %v6655_v62  ;;  %1995 = vmatprep.subr.bf16.mxu1 %v6656_v8 }
 0x4ac   : > { %1890 = vmatpush1.bf16.msra.mxu0 %v6657_v9  ;;  %1996 = vmatpush1.bf16.msra.mxu1 %v6658_v11 }
 0x4ad   : > { %1891 = vmatprep.subr.bf16.mxu0 %v6659_v12  ;;  %1997 = vmatprep.subr.bf16.mxu1 %v6660_v13 }
 0x4b0   : > { %1892 = vmatpush1.bf16.msra.mxu0 %v6661_v15  ;;  %1998 = vmatpush1.bf16.msra.mxu1 %v6662_v16 }
 0x4b1   : > { %1893 = vmatprep.subr.bf16.mxu0 %v6663_v17  ;;  %1999 = vmatprep.subr.bf16.mxu1 %v6664_v18 }
 0x4b4   : > { %1894 = vmatpush1.bf16.msra.mxu0 %v6665_v19  ;;  %2000 = vmatpush1.bf16.msra.mxu1 %v6666_v20 }
 0x4b7   : > { %1896 = vmatmul.mubr.bf16.vlgmr.msra.gmra.mrb[32].mxu0 %v5508_v38  ;;  %2002 = vmatmul.mubr.bf16.vlgmr.msra.gmra.mrb[32].mxu1 %v5508_v38 }
 0x4b8   : > { %1905 = vmatprep.mubr.bf16.mxu0 %v5536_v14  ;;  %2011 = vmatprep.mubr.bf16.mxu1 %v5536_v14 }
 0x4bf   : > { %1906 = vmatmul.mubr.bf16.gmra.mrb[36].mxu0 %v5526_v30  ;;  %2012 = vmatmul.mubr.bf16.gmra.mrb[36].mxu1 %v5526_v30 }
 0x4c0   : > { %2062 = vmatprep.mubr.bf16.mxu0 %v6590_v54  ;;  %2115 = vmatprep.mubr.bf16.mxu1 %v6590_v54 }
 0x58a   : > { %v1897_v2 = vpop.f32.mrb[32].mxu0  ;;  %v2003_v3 = vpop.f32.mrb[32].mxu1 }
 0x58b   : > { %v1899_v5 = vpop.f32.mrb[33].mxu0  ;;  %v2005_v60 = vpop.f32.mrb[33].mxu1 }
 0x58c   : > { %v1901_v0 = vpop.f32.mrb[34].mxu0  ;;  %v2007_v4 = vpop.f32.mrb[34].mxu1 }
 0x58d   : > { %v2022_v62 = vpack.c.bf16 %v1901_v0, %v1897_v2  ;;  %v2024_v8 = vpack.c.bf16 %v2007_v4, %v2003_v3  ;;  %v1903_v9 = vpop.f32.mrb[35].mxu0  ;;  %v2009_v11 = vpop.f32.mrb[35].mxu1  ;;  %v6756_v0 = vld [vmem:[#allocation18_spill] sm:$0xff]  ;;  %v6757_v4 = vld [vmem:[#allocation19_spill] sm:$0xff] }
 0x58e   : > { %v2023_v12 = vpack.c.bf16 %v1903_v9, %v1899_v5  ;;  %v2025_v13 = vpack.c.bf16 %v2009_v11, %v2005_v60  ;;  %v6754_v5 = vld [vmem:[#allocation16_spill] sm:$0xff]  ;;  %v6755_v60 = vld [vmem:[#allocation17_spill] sm:$0xff]  ;;  %v6760_v9 = vld [vmem:[#allocation22_spill] sm:$0xff] }
 0x58f   : > { %v6761_v11 = vld [vmem:[#allocation23_spill] sm:$0xff] }
 0x590   : > { %2030 = vmatprep.subr.bf16.mxu0 %v2023_v12  ;;  %2083 = vmatprep.subr.bf16.mxu1 %v2025_v13  ;;  %v6762_v12 = vld [vmem:[#allocation24_spill] sm:$0xff]  ;;  %v6763_v13 = vld [vmem:[#allocation25_spill] sm:$0xff] }
 0x591   : > { %2031 = vmatpush1.bf16.msra.mxu0 %v2022_v62  ;;  %2084 = vmatpush1.bf16.msra.mxu1 %v2024_v8  ;;  %v6758_v62 = vld [vmem:[#allocation20_spill] sm:$0xff]  ;;  %v6759_v8 = vld [vmem:[#allocation21_spill] sm:$0xff] }
 0x592   : > { %v1907_v15 = vpop.f32.mrb[36].mxu0  ;;  %v2013_v16 = vpop.f32.mrb[36].mxu1 }
 0x593   : > { %v1909_v17 = vpop.f32.mrb[37].mxu0  ;;  %v2015_v18 = vpop.f32.mrb[37].mxu1 }
 0x594   : > { %v1911_v19 = vpop.f32.mrb[38].mxu0  ;;  %v2017_v20 = vpop.f32.mrb[38].mxu1 }
 0x595   : > { %v2026_v38 = vpack.c.bf16 %v1911_v19, %v1907_v15  ;;  %v2028_v30 = vpack.c.bf16 %v2017_v20, %v2013_v16  ;;  %v1913_v14 = vpop.f32.mrb[39].mxu0  ;;  %v2019_v36 = vpop.f32.mrb[39].mxu1  ;;  %v6764_v15 = vld [vmem:[#allocation26_spill] sm:$0xff]  ;;  %v6765_v16 = vld [vmem:[#allocation27_spill] sm:$0xff] }
 0x596   : > { %v2027_v2 = vpack.c.bf16 %v1913_v14, %v1909_v17  ;;  %v2029_v3 = vpack.c.bf16 %v2019_v36, %v2015_v18  ;;  %v6753_v36 = vld [vmem:[#allocation15_spill] sm:$0xff]  ;;  %v6766_v17 = vld [vmem:[#allocation28_spill] sm:$0xff]  ;;  %v6767_v18 = vld [vmem:[#allocation29_spill] sm:$0xff] }
 0x597   : > { %v6768_v19 = vld [vmem:[#allocation30_spill] sm:$0xff]  ;;  %v6769_v20 = vld [vmem:[#allocation31_spill] sm:$0xff] }
 0x598   : > { %2032 = vmatprep.subr.bf16.mxu0 %v2027_v2  ;;  %2085 = vmatprep.subr.bf16.mxu1 %v2029_v3  ;;  %v6772_v14 = vld [vmem:[#allocation34_spill] sm:$0xff]  ;;  %v6773_v2 = vld [vmem:[#allocation35_spill] sm:$0xff]  ;;  %v6774_v3 = vld [vmem:[#allocation36_spill] sm:$0xff] }
 0x599   : > { %2033 = vmatpush1.bf16.msra.mxu0 %v2026_v38  ;;  %2086 = vmatpush1.bf16.msra.mxu1 %v2028_v30  ;;  %v6770_v38 = vld [vmem:[#allocation32_spill] sm:$0xff]  ;;  %v6771_v30 = vld [vmem:[#allocation33_spill] sm:$0xff] }
 0x59a   : > { %2160 = vmatprep.subr.bf16.mxu0 %v5078_v56  ;;  %2266 = vmatprep.subr.bf16.mxu1 %v5082_v53  ;;  %v6744_v56 = vld [vmem:[#allocation6_spill] sm:$0xff]  ;;  %v6745_v53 = vld [vmem:[#allocation7_spill] sm:$0xff] }
 0x59c   : > { %3699 = vmatmul.mubr.msk.bf16.vlgmr.msra.gmra.mrb[40].mxu0 %vm1323_vm0, %v5075_v59  ;;  %3701 = vmatmul.mubr.msk.bf16.vlgmr.msra.gmra.mrb[40].mxu1 %vm1323_vm0, %v5075_v59  ;;  %v6743_v59 = vld [vmem:[#allocation5_spill] sm:$0xff] }
 0x59d   : > { %2072 = vmatprep.mubr.bf16.mxu0 %v6590_v54  ;;  %2125 = vmatprep.mubr.bf16.mxu1 %v6590_v54 }
 0x59e   : > { %2161 = vmatpush1.bf16.msra.mxu0 %v5092_v55  ;;  %2267 = vmatpush1.bf16.msra.mxu1 %v5096_v57  ;;  %v6746_v55 = vld [vmem:[#allocation8_spill] sm:$0xff]  ;;  %v6747_v57 = vld [vmem:[#allocation9_spill] sm:$0xff] }
 0x59f   : > { %2162 = vmatprep.subr.bf16.mxu0 %v5100_v58  ;;  %2268 = vmatprep.subr.bf16.mxu1 %v5104_v61  ;;  %v6748_v58 = vld [vmem:[#allocation10_spill] sm:$0xff]  ;;  %v6749_v61 = vld [vmem:[#allocation11_spill] sm:$0xff] }
 0x5a2   : > { %2163 = vmatpush1.bf16.msra.mxu0 %v5113_v7  ;;  %2269 = vmatpush1.bf16.msra.mxu1 %v5117_v48  ;;  %v6751_v7 = vld [vmem:[#allocation13_spill] sm:$0xff]  ;;  %v6752_v48 = vld [vmem:[#allocation14_spill] sm:$0xff] }
 0x5a3   : > { %2164 = vmatprep.subr.bf16.mxu0 %v5273_v43  ;;  %2270 = vmatprep.subr.bf16.mxu1 %v5277_v44 }
 0x5a4   : > { %3700 = vmatmul.mubr.msk.bf16.gmra.mrb[44].mxu0 %vm1323_vm0, %v5110_v1  ;;  %3702 = vmatmul.mubr.msk.bf16.gmra.mrb[44].mxu1 %vm1323_vm0, %v5110_v1  ;;  %v6750_v1 = vld [vmem:[#allocation12_spill] sm:$0xff] }
 0x5a6   : > { %2165 = vmatpush1.bf16.msra.mxu0 %v5285_v45  ;;  %2271 = vmatpush1.bf16.msra.mxu1 %v5289_v46 }
 0x5a7   : > { %2166 = vmatprep.subr.bf16.mxu0 %v5293_v47  ;;  %2272 = vmatprep.subr.bf16.mxu1 %v5297_v49 }
 0x5aa   : > { %2167 = vmatpush1.bf16.msra.mxu0 %v5301_v50  ;;  %2273 = vmatpush1.bf16.msra.mxu1 %v5305_v51 }
 0x5ab   : > { %2168 = vmatprep.subr.bf16.mxu0 %v5309_v52  ;;  %2274 = vmatprep.subr.bf16.mxu1 %v5313_v63 }
 0x5ae   : > { %2169 = vmatpush1.bf16.msra.mxu0 %v5317_v6  ;;  %2275 = vmatpush1.bf16.msra.mxu1 %v5321_v21 }
 0x5af   : > { %2170 = vmatprep.subr.bf16.mxu0 %v5325_v22  ;;  %2276 = vmatprep.subr.bf16.mxu1 %v5329_v23 }
 0x5b2   : > { %2171 = vmatpush1.bf16.msra.mxu0 %v5333_v24  ;;  %2277 = vmatpush1.bf16.msra.mxu1 %v6743_v59 }
 0x5b3   : > { %2172 = vmatprep.subr.bf16.mxu0 %v6744_v56  ;;  %2278 = vmatprep.subr.bf16.mxu1 %v6745_v53 }
 0x5b6   : > { %2173 = vmatpush1.bf16.msra.mxu0 %v6746_v55  ;;  %2279 = vmatpush1.bf16.msra.mxu1 %v6747_v57 }
 0x5b7   : > { %2174 = vmatprep.subr.bf16.mxu0 %v6748_v58  ;;  %2280 = vmatprep.subr.bf16.mxu1 %v6749_v61 }
 0x5ba   : > { %2175 = vmatpush1.bf16.msra.mxu0 %v6750_v1  ;;  %2281 = vmatpush1.bf16.msra.mxu1 %v6751_v7 }
 0x5bb   : > { %2176 = vmatprep.subr.bf16.mxu0 %v6752_v48  ;;  %2282 = vmatprep.subr.bf16.mxu1 %v6753_v36 }
 0x5be   : > { %2177 = vmatpush1.bf16.msra.mxu0 %v6754_v5  ;;  %2283 = vmatpush1.bf16.msra.mxu1 %v6755_v60 }
 0x5bf   : > { %2178 = vmatprep.subr.bf16.mxu0 %v6756_v0  ;;  %2284 = vmatprep.subr.bf16.mxu1 %v6757_v4 }
 0x5c2   : > { %2179 = vmatpush1.bf16.msra.mxu0 %v6758_v62  ;;  %2285 = vmatpush1.bf16.msra.mxu1 %v6759_v8 }
 0x5c3   : > { %2180 = vmatprep.subr.bf16.mxu0 %v6760_v9  ;;  %2286 = vmatprep.subr.bf16.mxu1 %v6761_v11 }
 0x5c6   : > { %2181 = vmatpush1.bf16.msra.mxu0 %v6762_v12  ;;  %2287 = vmatpush1.bf16.msra.mxu1 %v6763_v13 }
 0x5c7   : > { %2182 = vmatprep.subr.bf16.mxu0 %v6764_v15  ;;  %2288 = vmatprep.subr.bf16.mxu1 %v6765_v16  ;;  %v6775_v15 = vld [vmem:[#allocation37_spill] sm:$0xff]  ;;  %v6776_v16 = vld [vmem:[#allocation38_spill] sm:$0xff] }
 0x5ca   : > { %2183 = vmatpush1.bf16.msra.mxu0 %v6766_v17  ;;  %2289 = vmatpush1.bf16.msra.mxu1 %v6767_v18  ;;  %v6777_v17 = vld [vmem:[#allocation39_spill] sm:$0xff]  ;;  %v6778_v18 = vld [vmem:[#allocation40_spill] sm:$0xff] }
 0x5cb   : > { %2184 = vmatprep.subr.bf16.mxu0 %v6768_v19  ;;  %2290 = vmatprep.subr.bf16.mxu1 %v6769_v20  ;;  %v6779_v19 = vld [vmem:[#allocation41_spill] sm:$0xff]  ;;  %v6780_v20 = vld [vmem:[#allocation42_spill] sm:$0xff] }
 0x5ce   : > { %2185 = vmatpush1.bf16.msra.mxu0 %v6770_v38  ;;  %2291 = vmatpush1.bf16.msra.mxu1 %v6771_v30  ;;  %v6781_v38 = vld [vmem:[#allocation43_spill] sm:$0xff]  ;;  %v6782_v30 = vld [vmem:[#allocation44_spill] sm:$0xff] }
 0x5cf   : > { %2186 = vmatprep.subr.bf16.mxu0 %v6772_v14  ;;  %2292 = vmatprep.subr.bf16.mxu1 %v6773_v2  ;;  %v6783_v14 = vld [vmem:[#allocation45_spill] sm:$0xff]  ;;  %v6784_v2 = vld [vmem:[#allocation46_spill] sm:$0xff] }
 0x5d2   : > { %2187 = vmatpush1.bf16.msra.mxu0 %v6774_v3  ;;  %2293 = vmatpush1.bf16.msra.mxu1 %v6775_v15  ;;  %v6785_v3 = vld [vmem:[#allocation47_spill] sm:$0xff] }
 0x5d3   : > { %2188 = vmatprep.subr.bf16.mxu0 %v6776_v16  ;;  %2294 = vmatprep.subr.bf16.mxu1 %v6777_v17 }
 0x5d6   : > { %2189 = vmatpush1.bf16.msra.mxu0 %v6778_v18  ;;  %2295 = vmatpush1.bf16.msra.mxu1 %v6779_v19 }
 0x5d7   : > { %2190 = vmatprep.subr.bf16.mxu0 %v6780_v20  ;;  %2296 = vmatprep.subr.bf16.mxu1 %v6781_v38 }
 0x5da   : > { %2191 = vmatpush1.bf16.msra.mxu0 %v6782_v30  ;;  %2297 = vmatpush1.bf16.msra.mxu1 %v6783_v14 }
 0x5db   : > { %2213 = vmatprep.subr.bf16.mxu0 %v6784_v2  ;;  %2319 = vmatprep.subr.bf16.mxu1 %v6785_v3 }
 0x66f   : > { %v2064_v15 = vpop.f32.mrb[40].mxu0  ;;  %v2117_v16 = vpop.f32.mrb[40].mxu1 }
 0x670   : > { %v2066_v13 = vpop.f32.mrb[41].mxu0  ;;  %v2138_v17 = vmax.f32 %v2117_v16, 0.0  ;;  %v2119_v12 = vpop.f32.mrb[41].mxu1  ;;  %v2136_v9 = vmax.f32 %v2064_v15, 0.0 }
 0x671   : > { %v2068_v18 = vpop.f32.mrb[42].mxu0  ;;  %v2139_v11 = vmax.f32 %v2119_v12, 0.0  ;;  %v2121_v19 = vpop.f32.mrb[42].mxu1  ;;  %v2137_v30 = vmax.f32 %v2066_v13, 0.0  ;;  %v6786_v13 = vld [vmem:[#allocation48_spill] sm:$0xff] }
 0x672   : > { %v2140_v20 = vmax.f32 %v2068_v18, 0.0  ;;  %v2070_v8 = vpop.f32.mrb[43].mxu0  ;;  %v2142_v38 = vmax.f32 %v2121_v19, 0.0  ;;  %v2123_v62 = vpop.f32.mrb[43].mxu1 }
 0x673   : > { %v2141_v4 = vmax.f32 %v2070_v8, 0.0  ;;  %v2143_v14 = vmax.f32 %v2123_v62, 0.0 }
 0x674   : > { %v2152_v0 = vpack.c.bf16 %v2140_v20, %v2136_v9  ;;  %v5792_v2 = vpack.c.bf16 %v2142_v38, %v2138_v17 }
 0x675   : > { %v2153_v3 = vpack.c.bf16 %v2141_v4, %v2137_v30  ;;  %v2155_v60 = vpack.c.bf16 %v2143_v14, %v2139_v11  ;;  %v6787_v4 = vld [vmem:[#allocation49_spill] sm:$0xff] }
 0x677   : > { %2192 = vmatprep.mubr.bf16.mxu0 %v2153_v3  ;;  %2298 = vmatprep.mubr.bf16.mxu1 %v2153_v3  ;;  %v2074_v16 = vpop.f32.mrb[44].mxu0  ;;  %v2127_v5 = vpop.f32.mrb[44].mxu1 }
 0x678   : > { %2193 = vmatmul.mubr.bf16.vlgmr.msra.gmra.mrb[48].mxu0 %v2152_v0  ;;  %2299 = vmatmul.mubr.bf16.vlgmr.msra.gmra.mrb[48].mxu1 %v2152_v0  ;;  %v2144_v12 = vmax.f32 %v2074_v16, 0.0  ;;  %v2076_v15 = vpop.f32.mrb[45].mxu0  ;;  %v2146_v18 = vmax.f32 %v2127_v5, 0.0  ;;  %v2129_v36 = vpop.f32.mrb[45].mxu1  ;;  %v6788_v16 = vld [vmem:[#allocation50_spill] sm:$0xff] }
 0x679   : > { %2214 = vmatpush1.bf16.msra.mxu0 %v5511_v41  ;;  %2320 = vmatpush1.bf16.msra.mxu1 %v6786_v13  ;;  %v2145_v62 = vmax.f32 %v2076_v15, 0.0  ;;  %v2078_v8 = vpop.f32.mrb[46].mxu0  ;;  %v2147_v9 = vmax.f32 %v2129_v36, 0.0  ;;  %v2131_v17 = vpop.f32.mrb[46].mxu1  ;;  %v6790_v15 = vld [vmem:[#allocation52_spill] sm:$0xff] }
 0x67a   : > { %2215 = vmatprep.subr.bf16.mxu0 %v6787_v4  ;;  %2321 = vmatprep.subr.bf16.mxu1 %v5523_v27  ;;  %v2148_v11 = vmax.f32 %v2078_v8, 0.0  ;;  %v2080_v19 = vpop.f32.mrb[47].mxu0  ;;  %v2150_v20 = vmax.f32 %v2131_v17, 0.0  ;;  %v2133_v0 = vpop.f32.mrb[47].mxu1  ;;  %v6793_v8 = vld [vmem:[#allocation55_spill] sm:$0xff]  ;;  %v6795_v17 = vld [vmem:[#allocation57_spill] sm:$0xff] }
 0x67b   : > { %v2149_v38 = vmax.f32 %v2080_v19, 0.0  ;;  %v2151_v30 = vmax.f32 %v2133_v0, 0.0  ;;  %v6798_v19 = vld [vmem:[#allocation60_spill] sm:$0xff]  ;;  %v6800_v0 = vld [vmem:[#allocation62_spill] sm:$0xff] }
 0x67c   : > { %v2156_v5 = vpack.c.bf16 %v2148_v11, %v2144_v12  ;;  %v5798_v14 = vpack.c.bf16 %v2150_v20, %v2146_v18  ;;  %v6789_v12 = vld [vmem:[#allocation51_spill] sm:$0xff]  ;;  %v6791_v18 = vld [vmem:[#allocation53_spill] sm:$0xff]  ;;  %v6796_v11 = vld [vmem:[#allocation58_spill] sm:$0xff] }
 0x67d   : > { %2216 = vmatpush1.bf16.msra.mxu0 %v5529_v29  ;;  %2322 = vmatpush1.bf16.msra.mxu1 %v5533_v10  ;;  %v2157_v3 = vpack.c.bf16 %v2149_v38, %v2145_v62  ;;  %v5802_v36 = vpack.c.bf16 %v2151_v30, %v2147_v9  ;;  %v6792_v62 = vld [vmem:[#allocation54_spill] sm:$0xff]  ;;  %v6794_v9 = vld [vmem:[#allocation56_spill] sm:$0xff]  ;;  %v6799_v20 = vld [vmem:[#allocation61_spill] sm:$0xff] }
 0x67e   : > { %2217 = vmatprep.subr.bf16.mxu0 %v5539_v37  ;;  %2323 = vmatprep.subr.bf16.mxu1 %v5543_v32  ;;  %v6801_v38 = vld [vmem:[#allocation63_spill] sm:$0xff]  ;;  %v6802_v30 = vld [vmem:[#allocation64_spill] sm:$0xff] }
 0x67f   : > { %2202 = vmatprep.mubr.bf16.mxu0 %v2157_v3  ;;  %2308 = vmatprep.mubr.bf16.mxu1 %v2157_v3  ;;  %v6804_v3 = vld [vmem:[#allocation66_spill] sm:$0xff] }
 0x680   : > { %2203 = vmatmul.mubr.bf16.gmra.mrb[52].mxu0 %v2156_v5  ;;  %2309 = vmatmul.mubr.bf16.gmra.mrb[52].mxu1 %v2156_v5  ;;  %v6803_v5 = vld [vmem:[#allocation65_spill] sm:$0xff] }
 0x681   : > { %2218 = vmatpush1.bf16.msra.mxu0 %v5547_v34  ;;  %2324 = vmatpush1.bf16.msra.mxu1 %v5551_v39 }
 0x682   : > { %2219 = vmatprep.subr.bf16.mxu0 %v5555_v28  ;;  %2325 = vmatprep.subr.bf16.mxu1 %v5559_v31 }
 0x683   : > { %2245 = vmatprep.mubr.bf16.mxu0 %v2155_v60  ;;  %2351 = vmatprep.mubr.bf16.mxu1 %v2155_v60  ;;  %v6797_v60 = vld [vmem:[#allocation59_spill] sm:$0xff] }
 0x685   : > { %2220 = vmatpush1.bf16.msra.mxu0 %v5563_v40  ;;  %2326 = vmatpush1.bf16.msra.mxu1 %v6788_v16 }
 0x686   : > { %2221 = vmatprep.subr.bf16.mxu0 %v6789_v12  ;;  %2327 = vmatprep.subr.bf16.mxu1 %v6790_v15 }
 0x689   : > { %2222 = vmatpush1.bf16.msra.mxu0 %v6791_v18  ;;  %2328 = vmatpush1.bf16.msra.mxu1 %v6792_v62 }
 0x68a   : > { %2223 = vmatprep.subr.bf16.mxu0 %v6793_v8  ;;  %2329 = vmatprep.subr.bf16.mxu1 %v6794_v9 }
 0x68d   : > { %2224 = vmatpush1.bf16.msra.mxu0 %v6795_v17  ;;  %2330 = vmatpush1.bf16.msra.mxu1 %v6796_v11  ;;  %v6805_v17 = vld [vmem:[#allocation67_spill] sm:$0xff]  ;;  %v6806_v11 = vld [vmem:[#allocation68_spill] sm:$0xff] }
 0x68e   : > { %2225 = vmatprep.subr.bf16.mxu0 %v6797_v60  ;;  %2331 = vmatprep.subr.bf16.mxu1 %v6798_v19  ;;  %v6807_v60 = vld [vmem:[#allocation69_spill] sm:$0xff]  ;;  %v6808_v19 = vld [vmem:[#allocation70_spill] sm:$0xff] }
 0x691   : > { %2226 = vmatpush1.bf16.msra.mxu0 %v6799_v20  ;;  %2332 = vmatpush1.bf16.msra.mxu1 %v6800_v0  ;;  %v6809_v0 = vld [vmem:[#allocation71_spill] sm:$0xff] }
 0x692   : > { %2227 = vmatprep.subr.bf16.mxu0 %v6801_v38  ;;  %2333 = vmatprep.subr.bf16.mxu1 %v6802_v30  ;;  %v6810_v38 = vld [vmem:[#allocation72_spill] sm:$0xff]  ;;  %v6811_v30 = vld [vmem:[#allocation73_spill] sm:$0xff] }
 0x695   : > { %2228 = vmatpush1.bf16.msra.mxu0 %v6803_v5  ;;  %2334 = vmatpush1.bf16.msra.mxu1 %v6804_v3  ;;  %v6812_v5 = vld [vmem:[#allocation74_spill] sm:$0xff] }
 0x696   : > { %2229 = vmatprep.subr.bf16.mxu0 %v6805_v17  ;;  %2335 = vmatprep.subr.bf16.mxu1 %v6806_v11 }
 0x699   : > { %2230 = vmatpush1.bf16.msra.mxu0 %v6807_v60  ;;  %2336 = vmatpush1.bf16.msra.mxu1 %v6808_v19 }
 0x69a   : > { %2231 = vmatprep.subr.bf16.mxu0 %v6809_v0  ;;  %2337 = vmatprep.subr.bf16.mxu1 %v6810_v38  ;;  %v6813_v0 = vld [vmem:[#allocation80_spill] sm:$0xff]  ;;  %v5843_v38 = vld [vmem:[%s4552_s19 + $0x360] ss:$16 sps:$4 sm:$0xff]  }
 0x69b   : > { %6814 = vst [vmem:[#allocation5_spill] sm:$0xff] %v5843_v38 }
 0x69d   : > { %2232 = vmatpush1.bf16.msra.mxu0 %v6811_v30  ;;  %2338 = vmatpush1.bf16.msra.mxu1 %v6812_v5  ;;  %v5847_v5 = vld [vmem:[%s4552_s19 + $0x368] ss:$16 sps:$4 sm:$0xff]  }
 0x69e   : > { %2233 = vmatprep.subr.bf16.mxu0 %v5667_v42  ;;  %2339 = vmatprep.subr.bf16.mxu1 %v5671_v26  ;;  %6815 = vst [vmem:[#allocation6_spill] sm:$0xff] %v5847_v5  ;;  %v5851_v26 = vld [vmem:[%s4552_s19 + $0x384] ss:$16 sps:$4 sm:$0xff]  }
 0x69f   : > { %6816 = vst [vmem:[#allocation7_spill] sm:$0xff] %v5851_v26 }
 0x6a1   : > { %2234 = vmatpush1.bf16.msra.mxu0 %v5675_v35  ;;  %2340 = vmatpush1.bf16.msra.mxu1 %v5679_v33  ;;  %v5855_v33 = vld [vmem:[%s4552_s19 + $0x38c] ss:$16 sps:$4 sm:$0xff]  }
 0x6a2   : > { %2235 = vmatprep.subr.bf16.mxu0 %v5683_v25  ;;  %2341 = vmatprep.subr.bf16.mxu1 %v6813_v0  ;;  %6817 = vst [vmem:[#allocation8_spill] sm:$0xff] %v5855_v33  ;;  %v5859_v0 = vld [vmem:[%s4552_s19 + $0x380] ss:$16 sps:$4 sm:$0xff]  }
 0x6a3   : > { %6818 = vst [vmem:[#allocation9_spill] sm:$0xff] %v5859_v0  ;;  %v5891_v25 = vld [vmem:[%s4552_s19 + $0x3c0] ss:$16 sps:$4 sm:$0xff]  }
 0x6a4   : > { %6826 = vst [vmem:[#allocation50_spill] sm:$0xff] %v5891_v25 }
 0x6a5   : > { %2236 = vmatpush1.bf16.msra.mxu0 %v5843_v38  ;;  %2342 = vmatpush1.bf16.msra.mxu1 %v5847_v5  ;;  %v5863_v38 = vld [vmem:[%s4552_s19 + $0x388] ss:$16 sps:$4 sm:$0xff]   ;;  %v5867_v5 = vld [vmem:[%s4552_s19 + $0x3a4] ss:$16 sps:$4 sm:$0xff]  }
 0x6a6   : > { %2237 = vmatprep.subr.bf16.mxu0 %v5851_v26  ;;  %2343 = vmatprep.subr.bf16.mxu1 %v5855_v33  ;;  %6819 = vst [vmem:[#allocation10_spill] sm:$0xff] %v5863_v38  ;;  %6820 = vst [vmem:[#allocation11_spill] sm:$0xff] %v5867_v5  ;;  %v5871_v26 = vld [vmem:[%s4552_s19 + $0x3ac] ss:$16 sps:$4 sm:$0xff]   ;;  %v5875_v33 = vld [vmem:[%s4552_s19 + $0x3a0] ss:$16 sps:$4 sm:$0xff]  }
 0x6a7   : > { %6821 = vst [vmem:[#allocation12_spill] sm:$0xff] %v5871_v26  ;;  %6822 = vst [vmem:[#allocation13_spill] sm:$0xff] %v5875_v33 }
 0x6a9   : > { %2238 = vmatpush1.bf16.msra.mxu0 %v5859_v0  ;;  %2344 = vmatpush1.bf16.msra.mxu1 %v5863_v38  ;;  %v5879_v0 = vld [vmem:[%s4552_s19 + $0x3a8] ss:$16 sps:$4 sm:$0xff]   ;;  %v5883_v38 = vld [vmem:[%s4552_s19 + $0x3c4] ss:$16 sps:$4 sm:$0xff]  }
 0x6aa   : > { %2239 = vmatprep.subr.bf16.mxu0 %v5867_v5  ;;  %2345 = vmatprep.subr.bf16.mxu1 %v5871_v26  ;;  %6823 = vst [vmem:[#allocation14_spill] sm:$0xff] %v5879_v0  ;;  %6824 = vst [vmem:[#allocation48_spill] sm:$0xff] %v5883_v38  ;;  %v5887_v5 = vld [vmem:[%s4552_s19 + $0x3cc] ss:$16 sps:$4 sm:$0xff]   ;;  %v5895_v26 = vld [vmem:[%s4552_s19 + $0x3c8] ss:$16 sps:$4 sm:$0xff]  }
 0x6ab   : > { %6825 = vst [vmem:[#allocation49_spill] sm:$0xff] %v5887_v5  ;;  %6827 = vst [vmem:[#allocation51_spill] sm:$0xff] %v5895_v26 }
 0x6ad   : > { %2240 = vmatpush1.bf16.msra.mxu0 %v5875_v33  ;;  %2346 = vmatpush1.bf16.msra.mxu1 %v5879_v0  ;;  %v5899_v33 = vld [vmem:[%s4552_s19 + $0x3e4] ss:$16 sps:$4 sm:$0xff]   ;;  %v5903_v0 = vld [vmem:[%s4552_s19 + $0x3ec] ss:$16 sps:$4 sm:$0xff]  }
 0x6ae   : > { %2241 = vmatprep.subr.bf16.mxu0 %v5883_v38  ;;  %2347 = vmatprep.subr.bf16.mxu1 %v5887_v5  ;;  %6828 = vst [vmem:[#allocation52_spill] sm:$0xff] %v5899_v33  ;;  %6829 = vst [vmem:[#allocation53_spill] sm:$0xff] %v5903_v0  ;;  %v5907_v38 = vld [vmem:[%s4552_s19 + $0x3e0] ss:$16 sps:$4 sm:$0xff]   ;;  %v5911_v5 = vld [vmem:[%s4552_s19 + $0x3e8] ss:$16 sps:$4 sm:$0xff]  }
 0x6af   : > { %6830 = vst [vmem:[#allocation54_spill] sm:$0xff] %v5907_v38  ;;  %6831 = vst [vmem:[#allocation81_spill] sm:$0xff] %v5911_v5 }
 0x6b1   : > { %2242 = vmatpush1.bf16.msra.mxu0 %v5891_v25  ;;  %2348 = vmatpush1.bf16.msra.mxu1 %v5895_v26 }
 0x6b2   : > { %2243 = vmatprep.subr.bf16.mxu0 %v5899_v33  ;;  %2349 = vmatprep.subr.bf16.mxu1 %v5903_v0 }
 0x6b5   : > { %2244 = vmatpush1.bf16.msra.mxu0 %v5907_v38  ;;  %2350 = vmatpush1.bf16.msra.mxu1 %v5911_v5 }
 0x6b8   : > { %2246 = vmatmul.mubr.bf16.vlgmr.msra.gmra.mrb[48].mxu0 %v5792_v2  ;;  %2352 = vmatmul.mubr.bf16.vlgmr.msra.gmra.mrb[48].mxu1 %v5792_v2 }
 0x6b9   : > { %2255 = vmatprep.mubr.bf16.mxu0 %v5802_v36  ;;  %2361 = vmatprep.mubr.bf16.mxu1 %v5802_v36 }
 0x6c0   : > { %2256 = vmatmul.mubr.bf16.gmra.mrb[52].mxu0 %v5798_v14  ;;  %2362 = vmatmul.mubr.bf16.gmra.mrb[52].mxu1 %v5798_v14 }
 0x6c1   : > { %2412 = vmatprep.mubr.bf16.mxu0 %v6590_v54  ;;  %2465 = vmatprep.mubr.bf16.mxu1 %v6590_v54 }
 0x78b   : > { %v2247_v38 = vpop.f32.mrb[48].mxu0  ;;  %v2353_v0 = vpop.f32.mrb[48].mxu1 }
 0x78c   : > { %v2249_v33 = vpop.f32.mrb[49].mxu0  ;;  %v2355_v5 = vpop.f32.mrb[49].mxu1 }
 0x78d   : > { %v2251_v26 = vpop.f32.mrb[50].mxu0  ;;  %v2357_v25 = vpop.f32.mrb[50].mxu1 }
 0x78e   : > { %v2372_v35 = vpack.c.bf16 %v2251_v26, %v2247_v38  ;;  %v2374_v2 = vpack.c.bf16 %v2357_v25, %v2353_v0  ;;  %v2253_v42 = vpop.f32.mrb[51].mxu0  ;;  %v2359_v30 = vpop.f32.mrb[51].mxu1  ;;  %v5946_v38 = vld [vmem:[%s6245_s2 + $0x8] sm:$0xff]  }
 0x78f   : > { %v2373_v19 = vpack.c.bf16 %v2253_v42, %v2249_v33  ;;  %v2375_v36 = vpack.c.bf16 %v2359_v30, %v2355_v5  ;;  %v4351_v33 = vld [vmem:[%s4552_s19 + $0xc] ss:$16 sps:$4 sm:$0xff]   ;;  %v6858_v5 = vld [vmem:[#allocation41_spill] sm:$0xff] }
 0x790   : > { %v6857_v30 = vld [vmem:[#allocation40_spill] sm:$0xff] }
 0x791   : > { %2380 = vmatprep.subr.bf16.mxu0 %v2373_v19  ;;  %2433 = vmatprep.subr.bf16.mxu1 %v2375_v36  ;;  %v4357_v19 = vld [vmem:[%s4552_s19 + $0x20] ss:$16 sps:$4 sm:$0xff]   ;;  %v6861_v36 = vld [vmem:[#allocation44_spill] sm:$0xff] }
 0x792   : > { %2381 = vmatpush1.bf16.msra.mxu0 %v2372_v35  ;;  %2434 = vmatpush1.bf16.msra.mxu1 %v2374_v2  ;;  %v4350_v35 = vld [vmem:[%s4552_s19 + $0x4] ss:$16 sps:$4 sm:$0xff]  }
 0x793   : > { %v2257_v14 = vpop.f32.mrb[52].mxu0  ;;  %v2363_v60 = vpop.f32.mrb[52].mxu1  ;;  %v6860_v2 = vld [vmem:[#allocation43_spill] sm:$0xff] }
 0x794   : > { %v2259_v11 = vpop.f32.mrb[53].mxu0  ;;  %v2365_v17 = vpop.f32.mrb[53].mxu1 }
 0x795   : > { %v2261_v3 = vpop.f32.mrb[54].mxu0  ;;  %v2367_v20 = vpop.f32.mrb[54].mxu1 }
 0x796   : > { %v2376_v9 = vpack.c.bf16 %v2261_v3, %v2257_v14  ;;  %v2378_v8 = vpack.c.bf16 %v2367_v20, %v2363_v60  ;;  %v2263_v26 = vpop.f32.mrb[55].mxu0  ;;  %v2369_v25 = vpop.f32.mrb[55].mxu1  ;;  %v5927_v60 = vld [vmem:[%s6245_s2] sm:$0xff]   ;;  %v4358_v20 = vld [vmem:[%s4552_s19 + $0x28] ss:$16 sps:$4 sm:$0xff]  }
 0x797   : > { %v2377_v0 = vpack.c.bf16 %v2263_v26, %v2259_v11  ;;  %v2379_v42 = vpack.c.bf16 %v2369_v25, %v2365_v17  ;;  %v4355_v17 = vld [vmem:[%s4552_s19 + $0x24] ss:$16 sps:$4 sm:$0xff]   ;;  %v4356_v11 = vld [vmem:[%s4552_s19 + $0x2c] ss:$16 sps:$4 sm:$0xff]  }
 0x798   : > { %v6859_v3 = vld [vmem:[#allocation42_spill] sm:$0xff]  ;;  %v6862_v14 = vld [vmem:[#allocation45_spill] sm:$0xff]  ;;  %v6864_v25 = vld [vmem:[#allocation47_spill] sm:$0xff] }
 0x799   : > { %2382 = vmatprep.subr.bf16.mxu0 %v2377_v0  ;;  %2435 = vmatprep.subr.bf16.mxu1 %v2379_v42  ;;  %v6863_v26 = vld [vmem:[#allocation46_spill] sm:$0xff] }
 0x79a   : > { %2383 = vmatpush1.bf16.msra.mxu0 %v2376_v9  ;;  %2436 = vmatpush1.bf16.msra.mxu1 %v2378_v8  ;;  %v4353_v8 = vld [vmem:[%s4552_s19] ss:$16 sps:$4 sm:$0xff]   ;;  %v4354_v9 = vld [vmem:[%s4552_s19 + $0x8] ss:$16 sps:$4 sm:$0xff]  }
 0x79b   : > { %2510 = vmatprep.subr.bf16.mxu0 %v4350_v35  ;;  %2616 = vmatprep.subr.bf16.mxu1 %v4351_v33 }
 0x79d   : > { %3703 = vmatmul.mubr.msk.bf16.vlgmr.msra.gmra.mrb[56].mxu0 %vm1323_vm0, %v5927_v60  ;;  %3705 = vmatmul.mubr.msk.bf16.vlgmr.msra.gmra.mrb[56].mxu1 %vm1323_vm0, %v5927_v60 }
 0x79e   : > { %2422 = vmatprep.mubr.bf16.mxu0 %v6590_v54  ;;  %2475 = vmatprep.mubr.bf16.mxu1 %v6590_v54 }
 0x79f   : > { %2511 = vmatpush1.bf16.msra.mxu0 %v4353_v8  ;;  %2617 = vmatpush1.bf16.msra.mxu1 %v4354_v9 }
 0x7a0   : > { %2512 = vmatprep.subr.bf16.mxu0 %v4355_v17  ;;  %2618 = vmatprep.subr.bf16.mxu1 %v4356_v11 }
 0x7a3   : > { %2513 = vmatpush1.bf16.msra.mxu0 %v4357_v19  ;;  %2619 = vmatpush1.bf16.msra.mxu1 %v4358_v20 }
 0x7a4   : > { %2514 = vmatprep.subr.bf16.mxu0 %v5273_v43  ;;  %2620 = vmatprep.subr.bf16.mxu1 %v5277_v44  ;;  %v6832_v43 = vld [vmem:[#allocation15_spill] sm:$0xff]  ;;  %v6833_v44 = vld [vmem:[#allocation16_spill] sm:$0xff] }
 0x7a5   : > { %3704 = vmatmul.mubr.msk.bf16.gmra.mrb[60].mxu0 %vm1323_vm0, %v5946_v38  ;;  %3706 = vmatmul.mubr.msk.bf16.gmra.mrb[60].mxu1 %vm1323_vm0, %v5946_v38 }
 0x7a7   : > { %2515 = vmatpush1.bf16.msra.mxu0 %v5285_v45  ;;  %2621 = vmatpush1.bf16.msra.mxu1 %v5289_v46  ;;  %v6834_v45 = vld [vmem:[#allocation17_spill] sm:$0xff]  ;;  %v6835_v46 = vld [vmem:[#allocation18_spill] sm:$0xff] }
 0x7a8   : > { %2516 = vmatprep.subr.bf16.mxu0 %v5293_v47  ;;  %2622 = vmatprep.subr.bf16.mxu1 %v5297_v49  ;;  %v6836_v47 = vld [vmem:[#allocation19_spill] sm:$0xff]  ;;  %v6837_v49 = vld [vmem:[#allocation20_spill] sm:$0xff] }
 0x7ab   : > { %2517 = vmatpush1.bf16.msra.mxu0 %v5301_v50  ;;  %2623 = vmatpush1.bf16.msra.mxu1 %v5305_v51  ;;  %v6838_v50 = vld [vmem:[#allocation21_spill] sm:$0xff]  ;;  %v6839_v51 = vld [vmem:[#allocation22_spill] sm:$0xff] }
 0x7ac   : > { %2518 = vmatprep.subr.bf16.mxu0 %v5309_v52  ;;  %2624 = vmatprep.subr.bf16.mxu1 %v5313_v63  ;;  %v6840_v52 = vld [vmem:[#allocation23_spill] sm:$0xff]  ;;  %v6841_v63 = vld [vmem:[#allocation24_spill] sm:$0xff] }
 0x7af   : > { %2519 = vmatpush1.bf16.msra.mxu0 %v5317_v6  ;;  %2625 = vmatpush1.bf16.msra.mxu1 %v5321_v21  ;;  %v6842_v6 = vld [vmem:[#allocation25_spill] sm:$0xff]  ;;  %v6843_v21 = vld [vmem:[#allocation26_spill] sm:$0xff] }
 0x7b0   : > { %2520 = vmatprep.subr.bf16.mxu0 %v5325_v22  ;;  %2626 = vmatprep.subr.bf16.mxu1 %v5329_v23  ;;  %v6844_v22 = vld [vmem:[#allocation27_spill] sm:$0xff]  ;;  %v6845_v23 = vld [vmem:[#allocation28_spill] sm:$0xff] }
 0x7b3   : > { %2521 = vmatpush1.bf16.msra.mxu0 %v5333_v24  ;;  %2627 = vmatpush1.bf16.msra.mxu1 %v6743_v59  ;;  %v6846_v24 = vld [vmem:[#allocation29_spill] sm:$0xff]  ;;  %v6847_v59 = vld [vmem:[#allocation30_spill] sm:$0xff] }
 0x7b4   : > { %2522 = vmatprep.subr.bf16.mxu0 %v6744_v56  ;;  %2628 = vmatprep.subr.bf16.mxu1 %v6745_v53  ;;  %v6848_v56 = vld [vmem:[#allocation31_spill] sm:$0xff]  ;;  %v6849_v53 = vld [vmem:[#allocation32_spill] sm:$0xff] }
 0x7b7   : > { %2523 = vmatpush1.bf16.msra.mxu0 %v6746_v55  ;;  %2629 = vmatpush1.bf16.msra.mxu1 %v6747_v57  ;;  %v6850_v55 = vld [vmem:[#allocation33_spill] sm:$0xff]  ;;  %v6851_v57 = vld [vmem:[#allocation34_spill] sm:$0xff] }
 0x7b8   : > { %2524 = vmatprep.subr.bf16.mxu0 %v6748_v58  ;;  %2630 = vmatprep.subr.bf16.mxu1 %v6749_v61  ;;  %v6852_v58 = vld [vmem:[#allocation35_spill] sm:$0xff]  ;;  %v6853_v61 = vld [vmem:[#allocation36_spill] sm:$0xff] }
 0x7bb   : > { %2525 = vmatpush1.bf16.msra.mxu0 %v6750_v1  ;;  %2631 = vmatpush1.bf16.msra.mxu1 %v6751_v7  ;;  %v6854_v1 = vld [vmem:[#allocation37_spill] sm:$0xff]  ;;  %v6855_v7 = vld [vmem:[#allocation38_spill] sm:$0xff] }
 0x7bc   : > { %2526 = vmatprep.subr.bf16.mxu0 %v6752_v48  ;;  %2632 = vmatprep.subr.bf16.mxu1 %v6832_v43  ;;  %v6856_v48 = vld [vmem:[#allocation39_spill] sm:$0xff] }
 0x7bf   : > { %2527 = vmatpush1.bf16.msra.mxu0 %v6833_v44  ;;  %2633 = vmatpush1.bf16.msra.mxu1 %v6834_v45 }
 0x7c0   : > { %2528 = vmatprep.subr.bf16.mxu0 %v6835_v46  ;;  %2634 = vmatprep.subr.bf16.mxu1 %v6836_v47 }
 0x7c3   : > { %2529 = vmatpush1.bf16.msra.mxu0 %v6837_v49  ;;  %2635 = vmatpush1.bf16.msra.mxu1 %v6838_v50 }
 0x7c4   : > { %2530 = vmatprep.subr.bf16.mxu0 %v6839_v51  ;;  %2636 = vmatprep.subr.bf16.mxu1 %v6840_v52 }
 0x7c7   : > { %2531 = vmatpush1.bf16.msra.mxu0 %v6841_v63  ;;  %2637 = vmatpush1.bf16.msra.mxu1 %v6842_v6 }
 0x7c8   : > { %2532 = vmatprep.subr.bf16.mxu0 %v6843_v21  ;;  %2638 = vmatprep.subr.bf16.mxu1 %v6844_v22 }
 0x7cb   : > { %2533 = vmatpush1.bf16.msra.mxu0 %v6845_v23  ;;  %2639 = vmatpush1.bf16.msra.mxu1 %v6846_v24 }
 0x7cc   : > { %2534 = vmatprep.subr.bf16.mxu0 %v6847_v59  ;;  %2640 = vmatprep.subr.bf16.mxu1 %v6848_v56 }
 0x7cf   : > { %2535 = vmatpush1.bf16.msra.mxu0 %v6849_v53  ;;  %2641 = vmatpush1.bf16.msra.mxu1 %v6850_v55 }
 0x7d0   : > { %2536 = vmatprep.subr.bf16.mxu0 %v6851_v57  ;;  %2642 = vmatprep.subr.bf16.mxu1 %v6852_v58 }
 0x7d3   : > { %2537 = vmatpush1.bf16.msra.mxu0 %v6853_v61  ;;  %2643 = vmatpush1.bf16.msra.mxu1 %v6854_v1 }
 0x7d4   : > { %2538 = vmatprep.subr.bf16.mxu0 %v6855_v7  ;;  %2644 = vmatprep.subr.bf16.mxu1 %v6856_v48 }
 0x7d7   : > { %2539 = vmatpush1.bf16.msra.mxu0 %v6857_v30  ;;  %2645 = vmatpush1.bf16.msra.mxu1 %v6858_v5 }
 0x7d8   : > { %2540 = vmatprep.subr.bf16.mxu0 %v6859_v3  ;;  %2646 = vmatprep.subr.bf16.mxu1 %v6860_v2  ;;  %v6881_v2 = vld [vmem:[#allocation71_spill] sm:$0xff] }
 0x7db   : > { %2541 = vmatpush1.bf16.msra.mxu0 %v6861_v36  ;;  %2647 = vmatpush1.bf16.msra.mxu1 %v6862_v14  ;;  %v6882_v36 = vld [vmem:[#allocation72_spill] sm:$0xff]  ;;  %v6883_v14 = vld [vmem:[#allocation73_spill] sm:$0xff] }
 0x7dc   : > { %2563 = vmatprep.subr.bf16.mxu0 %v6863_v26  ;;  %2669 = vmatprep.subr.bf16.mxu1 %v6864_v25  ;;  %v6884_v26 = vld [vmem:[#allocation74_spill] sm:$0xff]  ;;  %v6885_v25 = vld [vmem:[#allocation75_spill] sm:$0xff] }
 0x870   : > { %v2414_v0 = vpop.f32.mrb[56].mxu0  ;;  %v2467_v42 = vpop.f32.mrb[56].mxu1 }
 0x871   : > { %v2416_v35 = vpop.f32.mrb[57].mxu0  ;;  %v2488_v33 = vmax.f32 %v2467_v42, 0.0  ;;  %v2469_v8 = vpop.f32.mrb[57].mxu1  ;;  %v2486_v19 = vmax.f32 %v2414_v0, 0.0  ;;  %v6886_v0 = vld [vmem:[#allocation76_spill] sm:$0xff]  ;;  %v6887_v42 = vld [vmem:[#allocation77_spill] sm:$0xff] }
 0x872   : > { %v2418_v9 = vpop.f32.mrb[58].mxu0  ;;  %v2489_v17 = vmax.f32 %v2469_v8, 0.0  ;;  %v2471_v11 = vpop.f32.mrb[58].mxu1  ;;  %v2487_v46 = vmax.f32 %v2416_v35, 0.0  ;;  %v6888_v35 = vld [vmem:[#allocation78_spill] sm:$0xff]  ;;  %v6890_v8 = vld [vmem:[#allocation80_spill] sm:$0xff] }
 0x873   : > { %v2490_v20 = vmax.f32 %v2418_v9, 0.0  ;;  %v2420_v43 = vpop.f32.mrb[59].mxu0  ;;  %v2492_v44 = vmax.f32 %v2471_v11, 0.0  ;;  %v2473_v45 = vpop.f32.mrb[59].mxu1  ;;  %v6891_v9 = vld [vmem:[#allocation5_spill] sm:$0xff]  ;;  %v6893_v11 = vld [vmem:[#allocation7_spill] sm:$0xff] }
 0x874   : > { %v2491_v47 = vmax.f32 %v2420_v43, 0.0  ;;  %v2493_v49 = vmax.f32 %v2473_v45, 0.0  ;;  %v6896_v43 = vld [vmem:[#allocation10_spill] sm:$0xff]  ;;  %v6898_v45 = vld [vmem:[#allocation12_spill] sm:$0xff] }
 0x875   : > { %v2502_v50 = vpack.c.bf16 %v2490_v20, %v2486_v19  ;;  %v6008_v51 = vpack.c.bf16 %v2492_v44, %v2488_v33  ;;  %v6889_v33 = vld [vmem:[#allocation79_spill] sm:$0xff]  ;;  %v6894_v19 = vld [vmem:[#allocation8_spill] sm:$0xff]  ;;  %v6895_v20 = vld [vmem:[#allocation9_spill] sm:$0xff] }
 0x876   : > { %v2503_v52 = vpack.c.bf16 %v2491_v47, %v2487_v46  ;;  %v2505_v63 = vpack.c.bf16 %v2493_v49, %v2489_v17  ;;  %v6892_v17 = vld [vmem:[#allocation6_spill] sm:$0xff]  ;;  %v6897_v44 = vld [vmem:[#allocation11_spill] sm:$0xff]  ;;  %v6899_v46 = vld [vmem:[#allocation13_spill] sm:$0xff] }
 0x877   : > { %v6900_v47 = vld [vmem:[#allocation14_spill] sm:$0xff]  ;;  %v6901_v49 = vld [vmem:[#allocation48_spill] sm:$0xff] }
 0x878   : > { %2542 = vmatprep.mubr.bf16.mxu0 %v2503_v52  ;;  %2648 = vmatprep.mubr.bf16.mxu1 %v2503_v52  ;;  %v2424_v6 = vpop.f32.mrb[60].mxu0  ;;  %v2477_v21 = vpop.f32.mrb[60].mxu1  ;;  %v6903_v52 = vld [vmem:[#allocation50_spill] sm:$0xff] }
 0x879   : > { %2543 = vmatmul.mubr.bf16.vlgmr.msra.gmra.mrb[64].mxu0 %v2502_v50  ;;  %2649 = vmatmul.mubr.bf16.vlgmr.msra.gmra.mrb[64].mxu1 %v2502_v50  ;;  %v2494_v22 = vmax.f32 %v2424_v6, 0.0  ;;  %v2426_v23 = vpop.f32.mrb[61].mxu0  ;;  %v2496_v24 = vmax.f32 %v2477_v21, 0.0  ;;  %v2479_v59 = vpop.f32.mrb[61].mxu1  ;;  %v6902_v50 = vld [vmem:[#allocation49_spill] sm:$0xff]  ;;  %v6905_v6 = vld [vmem:[#allocation52_spill] sm:$0xff] }
 0x87a   : > { %2564 = vmatpush1.bf16.msra.mxu0 %v5511_v41  ;;  %2670 = vmatpush1.bf16.msra.mxu1 %v6786_v13  ;;  %v2495_v56 = vmax.f32 %v2426_v23, 0.0  ;;  %v2428_v53 = vpop.f32.mrb[62].mxu0  ;;  %v2497_v55 = vmax.f32 %v2479_v59, 0.0  ;;  %v2481_v57 = vpop.f32.mrb[62].mxu1  ;;  %v6906_v21 = vld [vmem:[#allocation53_spill] sm:$0xff] }
 0x87b   : > { %2565 = vmatprep.subr.bf16.mxu0 %v6787_v4  ;;  %2671 = vmatprep.subr.bf16.mxu1 %v5523_v27  ;;  %v2498_v58 = vmax.f32 %v2428_v53, 0.0  ;;  %v2430_v61 = vpop.f32.mrb[63].mxu0  ;;  %v2500_v1 = vmax.f32 %v2481_v57, 0.0  ;;  %v2483_v7 = vpop.f32.mrb[63].mxu1  ;;  %v6867_v27 = vld [vmem:[#allocation57_spill] sm:$0xff] }
 0x87c   : > { %v2499_v48 = vmax.f32 %v2430_v61, 0.0  ;;  %v2501_v30 = vmax.f32 %v2483_v7, 0.0  ;;  %v6875_v4 = vld [vmem:[#allocation65_spill] sm:$0xff] }
 0x87d   : > { %v2506_v5 = vpack.c.bf16 %v2498_v58, %v2494_v22  ;;  %v6014_v3 = vpack.c.bf16 %v2500_v1, %v2496_v24  ;;  %v6907_v22 = vld [vmem:[#allocation54_spill] sm:$0xff]  ;;  %v6908_v23 = vld [vmem:[#allocation81_spill] sm:$0xff] }
 0x87e   : > { %2566 = vmatpush1.bf16.msra.mxu0 %v5529_v29  ;;  %2672 = vmatpush1.bf16.msra.mxu1 %v5533_v10  ;;  %v2507_v41 = vpack.c.bf16 %v2499_v48, %v2495_v56  ;;  %v6018_v13 = vpack.c.bf16 %v2501_v30, %v2497_v55  ;;  %v6865_v29 = vld [vmem:[#allocation55_spill] sm:$0xff]  ;;  %v6866_v10 = vld [vmem:[#allocation56_spill] sm:$0xff] }
 0x87f   : > { %2567 = vmatprep.subr.bf16.mxu0 %v5539_v37  ;;  %2673 = vmatprep.subr.bf16.mxu1 %v5543_v32  ;;  %v6868_v37 = vld [vmem:[#allocation58_spill] sm:$0xff]  ;;  %v6869_v32 = vld [vmem:[#allocation59_spill] sm:$0xff] }
 0x880   : > { %2552 = vmatprep.mubr.bf16.mxu0 %v2507_v41  ;;  %2658 = vmatprep.mubr.bf16.mxu1 %v2507_v41 }
 0x881   : > { %2553 = vmatmul.mubr.bf16.gmra.mrb[68].mxu0 %v2506_v5  ;;  %2659 = vmatmul.mubr.bf16.gmra.mrb[68].mxu1 %v2506_v5 }
 0x882   : > { %2568 = vmatpush1.bf16.msra.mxu0 %v5547_v34  ;;  %2674 = vmatpush1.bf16.msra.mxu1 %v5551_v39  ;;  %v6870_v34 = vld [vmem:[#allocation60_spill] sm:$0xff]  ;;  %v6871_v39 = vld [vmem:[#allocation61_spill] sm:$0xff] }
 0x883   : > { %2569 = vmatprep.subr.bf16.mxu0 %v5555_v28  ;;  %2675 = vmatprep.subr.bf16.mxu1 %v5559_v31  ;;  %v6872_v28 = vld [vmem:[#allocation62_spill] sm:$0xff]  ;;  %v6873_v31 = vld [vmem:[#allocation63_spill] sm:$0xff] }
 0x884   : > { %2595 = vmatprep.mubr.bf16.mxu0 %v2505_v63  ;;  %2701 = vmatprep.mubr.bf16.mxu1 %v2505_v63  ;;  %v6904_v63 = vld [vmem:[#allocation51_spill] sm:$0xff] }
 0x886   : > { %2570 = vmatpush1.bf16.msra.mxu0 %v5563_v40  ;;  %2676 = vmatpush1.bf16.msra.mxu1 %v6788_v16  ;;  %v6874_v40 = vld [vmem:[#allocation64_spill] sm:$0xff]  ;;  %v6876_v16 = vld [vmem:[#allocation66_spill] sm:$0xff] }
 0x887   : > { %2571 = vmatprep.subr.bf16.mxu0 %v6789_v12  ;;  %2677 = vmatprep.subr.bf16.mxu1 %v6790_v15  ;;  %v6877_v12 = vld [vmem:[#allocation67_spill] sm:$0xff]  ;;  %v6878_v15 = vld [vmem:[#allocation68_spill] sm:$0xff] }
 0x88a   : > { %2572 = vmatpush1.bf16.msra.mxu0 %v6791_v18  ;;  %2678 = vmatpush1.bf16.msra.mxu1 %v6792_v62  ;;  %v6879_v18 = vld [vmem:[#allocation69_spill] sm:$0xff]  ;;  %v6880_v62 = vld [vmem:[#allocation70_spill] sm:$0xff] }
 0x88b   : > { %2573 = vmatprep.subr.bf16.mxu0 %v6865_v29  ;;  %2679 = vmatprep.subr.bf16.mxu1 %v6866_v10 }
 0x88e   : > { %2574 = vmatpush1.bf16.msra.mxu0 %v6867_v27  ;;  %2680 = vmatpush1.bf16.msra.mxu1 %v6868_v37 }
 0x88f   : > { %2575 = vmatprep.subr.bf16.mxu0 %v6869_v32  ;;  %2681 = vmatprep.subr.bf16.mxu1 %v6870_v34 }
 0x892   : > { %2576 = vmatpush1.bf16.msra.mxu0 %v6871_v39  ;;  %2682 = vmatpush1.bf16.msra.mxu1 %v6872_v28  ;;  %v4190_v28 = vld [vmem:[%s6246_s3 + $0x40] sm:$0xff]  }
 0x893   : > { %2577 = vmatprep.subr.bf16.mxu0 %v6873_v31  ;;  %2683 = vmatprep.subr.bf16.mxu1 %v6874_v40  ;;  %v4191_v31 = vld [vmem:[%s6246_s3 + $0xc0] sm:$0xff]  }
 0x894   : > { %v4192_v40 = vld [vmem:[%s6246_s3] sm:$0xff]  }
 0x896   : > { %2578 = vmatpush1.bf16.msra.mxu0 %v6875_v4  ;;  %2684 = vmatpush1.bf16.msra.mxu1 %v6876_v16  ;;  %v4193_v4 = vld [vmem:[%s6246_s3 + $0x80] sm:$0xff]   ;;  %v4194_v16 = vld [vmem:[%s6246_s3 + $0x48] sm:$0xff]  }
 0x897   : > { %2579 = vmatprep.subr.bf16.mxu0 %v6877_v12  ;;  %2685 = vmatprep.subr.bf16.mxu1 %v6878_v15  ;;  %v4195_v12 = vld [vmem:[%s6246_s3 + $0xc8] sm:$0xff]  }
 0x898   : > { %v4196_v15 = vld [vmem:[%s6246_s3 + $0x8] sm:$0xff]  }
 0x89a   : > { %2580 = vmatpush1.bf16.msra.mxu0 %v6879_v18  ;;  %2686 = vmatpush1.bf16.msra.mxu1 %v6880_v62  ;;  %v4197_v18 = vld [vmem:[%s6246_s3 + $0x88] sm:$0xff]   ;;  %v4200_v62 = vld [vmem:[%s6246_s3 + $0x10] sm:$0xff]  }
 0x89b   : > { %2581 = vmatprep.subr.bf16.mxu0 %v6881_v2  ;;  %2687 = vmatprep.subr.bf16.mxu1 %v6882_v36  ;;  %v4201_v2 = vld [vmem:[%s6246_s3 + $0x90] sm:$0xff]   ;;  %v4202_v36 = vld [vmem:[%s6246_s3 + $0x58] sm:$0xff]  }
 0x89e   : > { %2582 = vmatpush1.bf16.msra.mxu0 %v6883_v14  ;;  %2688 = vmatpush1.bf16.msra.mxu1 %v6884_v26  ;;  %v4203_v14 = vld [vmem:[%s6246_s3 + $0xd8] sm:$0xff]  }
 0x89f   : > { %2583 = vmatprep.subr.bf16.mxu0 %v6885_v25  ;;  %2689 = vmatprep.subr.bf16.mxu1 %v6886_v0  ;;  %v4204_v26 = vld [vmem:[%s6246_s3 + $0x18] sm:$0xff]   ;;  %v4206_v0 = vld [vmem:[%s6246_s3 + $0x60] sm:$0xff]  }
 0x8a0   : > { %v4205_v25 = vld [vmem:[%s6246_s3 + $0x98] sm:$0xff]  }
 0x8a2   : > { %2584 = vmatpush1.bf16.msra.mxu0 %v6887_v42  ;;  %2690 = vmatpush1.bf16.msra.mxu1 %v6888_v35  ;;  %v4208_v42 = vld [vmem:[%s6246_s3 + $0x20] sm:$0xff]  }
 0x8a3   : > { %2585 = vmatprep.subr.bf16.mxu0 %v6889_v33  ;;  %2691 = vmatprep.subr.bf16.mxu1 %v6890_v8  ;;  %v4209_v35 = vld [vmem:[%s6246_s3 + $0xa0] sm:$0xff]   ;;  %v4210_v33 = vld [vmem:[%s6246_s3 + $0x68] sm:$0xff]  }
 0x8a4   : > { %v4211_v8 = vld [vmem:[%s6246_s3 + $0xe8] sm:$0xff]  }
 0x8a6   : > { %2586 = vmatpush1.bf16.msra.mxu0 %v6891_v9  ;;  %2692 = vmatpush1.bf16.msra.mxu1 %v6892_v17  ;;  %v4212_v9 = vld [vmem:[%s6246_s3 + $0x28] sm:$0xff]  }
 0x8a7   : > { %2587 = vmatprep.subr.bf16.mxu0 %v6893_v11  ;;  %2693 = vmatprep.subr.bf16.mxu1 %v6894_v19  ;;  %v4213_v17 = vld [vmem:[%s6246_s3 + $0xa8] sm:$0xff]   ;;  %v4214_v11 = vld [vmem:[%s6246_s3 + $0x70] sm:$0xff]  }
 0x8a8   : > { %v4215_v19 = vld [vmem:[%s6246_s3 + $0xf0] sm:$0xff]  }
 0x8aa   : > { %2588 = vmatpush1.bf16.msra.mxu0 %v6895_v20  ;;  %2694 = vmatpush1.bf16.msra.mxu1 %v6896_v43  ;;  %v4216_v20 = vld [vmem:[%s6246_s3 + $0x30] sm:$0xff]  }
 0x8ab   : > { %2589 = vmatprep.subr.bf16.mxu0 %v6897_v44  ;;  %2695 = vmatprep.subr.bf16.mxu1 %v6898_v45  ;;  %v4217_v43 = vld [vmem:[%s6246_s3 + $0xb0] sm:$0xff]   ;;  %v4218_v44 = vld [vmem:[%s6246_s3 + $0x78] sm:$0xff]  }
 0x8ac   : > { %v4219_v45 = vld [vmem:[%s6246_s3 + $0xf8] sm:$0xff]  }
 0x8ae   : > { %2590 = vmatpush1.bf16.msra.mxu0 %v6899_v46  ;;  %2696 = vmatpush1.bf16.msra.mxu1 %v6900_v47  ;;  %v4220_v46 = vld [vmem:[%s6246_s3 + $0x38] sm:$0xff]  }
 0x8af   : > { %2591 = vmatprep.subr.bf16.mxu0 %v6901_v49  ;;  %2697 = vmatprep.subr.bf16.mxu1 %v6902_v50  ;;  %v4221_v47 = vld [vmem:[%s6246_s3 + $0xb8] sm:$0xff]  }
 0x8b2   : > { %2592 = vmatpush1.bf16.msra.mxu0 %v6903_v52  ;;  %2698 = vmatpush1.bf16.msra.mxu1 %v6904_v63 }
 0x8b3   : > { %2593 = vmatprep.subr.bf16.mxu0 %v6905_v6  ;;  %2699 = vmatprep.subr.bf16.mxu1 %v6906_v21 }
 0x8b6   : > { %2594 = vmatpush1.bf16.msra.mxu0 %v6907_v22  ;;  %2700 = vmatpush1.bf16.msra.mxu1 %v6908_v23 }
 0x8b9   : > { %2596 = vmatmul.mubr.bf16.vlgmr.msra.gmra.mrb[64].mxu0 %v6008_v51  ;;  %2702 = vmatmul.mubr.bf16.vlgmr.msra.gmra.mrb[64].mxu1 %v6008_v51 }
 0x8ba   : > { %2605 = vmatprep.mubr.bf16.mxu0 %v6018_v13  ;;  %2711 = vmatprep.mubr.bf16.mxu1 %v6018_v13 }
 0x8c1   : > { %2606 = vmatmul.mubr.bf16.gmra.mrb[68].mxu0 %v6014_v3  ;;  %2712 = vmatmul.mubr.bf16.gmra.mrb[68].mxu1 %v6014_v3 }
 0x8c2   : > { %2762 = vmatprep.mubr.bf16.mxu0 %v6590_v54  ;;  %2815 = vmatprep.mubr.bf16.mxu1 %v6590_v54 }
 0x98c   : > { %v2597_v24 = vpop.f32.mrb[64].mxu0  ;;  %v2703_v59 = vpop.f32.mrb[64].mxu1 }
 0x98d   : > { %v2599_v56 = vpop.f32.mrb[65].mxu0  ;;  %v2705_v53 = vpop.f32.mrb[65].mxu1 }
 0x98e   : > { %v2601_v55 = vpop.f32.mrb[66].mxu0  ;;  %v2707_v57 = vpop.f32.mrb[66].mxu1 }
 0x98f   : > { %v2722_v58 = vpack.c.bf16 %v2601_v55, %v2597_v24  ;;  %v2724_v51 = vpack.c.bf16 %v2707_v57, %v2703_v59  ;;  %v2603_v61 = vpop.f32.mrb[67].mxu0  ;;  %v2709_v1 = vpop.f32.mrb[67].mxu1 }
 0x990   : > { %v2723_v7 = vpack.c.bf16 %v2603_v61, %v2599_v56  ;;  %v2725_v48 = vpack.c.bf16 %v2709_v1, %v2705_v53 }
 0x992   : > { %2730 = vmatprep.subr.bf16.mxu0 %v2723_v7  ;;  %2783 = vmatprep.subr.bf16.mxu1 %v2725_v48 }
 0x993   : > { %2731 = vmatpush1.bf16.msra.mxu0 %v2722_v58  ;;  %2784 = vmatpush1.bf16.msra.mxu1 %v2724_v51 }
 0x994   : > { %v2607_v30 = vpop.f32.mrb[68].mxu0  ;;  %v2713_v5 = vpop.f32.mrb[68].mxu1 }
 0x995   : > { %v2609_v3 = vpop.f32.mrb[69].mxu0  ;;  %v2715_v41 = vpop.f32.mrb[69].mxu1 }
 0x996   : > { %v2611_v13 = vpop.f32.mrb[70].mxu0  ;;  %v2717_v29 = vpop.f32.mrb[70].mxu1 }
 0x997   : > { %v2726_v10 = vpack.c.bf16 %v2611_v13, %v2607_v30  ;;  %v2728_v27 = vpack.c.bf16 %v2717_v29, %v2713_v5  ;;  %v2613_v37 = vpop.f32.mrb[71].mxu0  ;;  %v2719_v32 = vpop.f32.mrb[71].mxu1 }
 0x998   : > { %v2727_v34 = vpack.c.bf16 %v2613_v37, %v2609_v3  ;;  %v2729_v39 = vpack.c.bf16 %v2719_v32, %v2715_v41 }
 0x99a   : > { %2732 = vmatprep.subr.bf16.mxu0 %v2727_v34  ;;  %2785 = vmatprep.subr.bf16.mxu1 %v2729_v39 }
 0x99b   : > { %2733 = vmatpush1.bf16.msra.mxu0 %v2726_v10  ;;  %2786 = vmatpush1.bf16.msra.mxu1 %v2728_v27 }
 0x99c   : > { %3752 = vmatprep.subr.bf16.mxu0 %v4190_v28  ;;  %3780 = vmatprep.subr.bf16.mxu1 %v4191_v31 }
 0x99e   : > { %3707 = vmatmul.mubr.msk.bf16.vlgmr.msra.gmra.mrb[72].mxu0 %vm1323_vm0, %v5927_v60  ;;  %3709 = vmatmul.mubr.msk.bf16.vlgmr.msra.gmra.mrb[72].mxu1 %vm1323_vm0, %v5927_v60  ;;  %v4198_v60 = vld [vmem:[%s6246_s3 + $0x50] sm:$0xff]  }
 0x99f   : > { %2772 = vmatprep.mubr.bf16.mxu0 %v6590_v54  ;;  %2825 = vmatprep.mubr.bf16.mxu1 %v6590_v54  ;;  %v4199_v54 = vld [vmem:[%s6246_s3 + $0xd0] sm:$0xff]  }
 0x9a0   : > { %3753 = vmatpush3.bf16.msra.mxu0 %v4192_v40  ;;  %3781 = vmatpush3.bf16.msra.mxu1 %v4193_v4 }
 0x9a1   : > { %3754 = vmatprep.subr.bf16.mxu0 %v4194_v16  ;;  %3782 = vmatprep.subr.bf16.mxu1 %v4195_v12 }
 0x9a4   : > { %3755 = vmatpush3.bf16.msra.mxu0 %v4196_v15  ;;  %3783 = vmatpush3.bf16.msra.mxu1 %v4197_v18 }
 0x9a5   : > { %3756 = vmatprep.subr.bf16.mxu0 %v4198_v60  ;;  %3784 = vmatprep.subr.bf16.mxu1 %v4199_v54 }
 0x9a6   : > { %3708 = vmatmul.mubr.msk.bf16.gmra.mrb[76].mxu0 %vm1323_vm0, %v5946_v38  ;;  %3710 = vmatmul.mubr.msk.bf16.gmra.mrb[76].mxu1 %vm1323_vm0, %v5946_v38  ;;  %v4207_v38 = vld [vmem:[%s6246_s3 + $0xe0] sm:$0xff]  }
 0x9a8   : > { %3757 = vmatpush3.bf16.msra.mxu0 %v4200_v62  ;;  %3785 = vmatpush3.bf16.msra.mxu1 %v4201_v2 }
 0x9a9   : > { %3758 = vmatprep.subr.bf16.mxu0 %v4202_v36  ;;  %3786 = vmatprep.subr.bf16.mxu1 %v4203_v14 }
 0x9ac   : > { %3759 = vmatpush3.bf16.msra.mxu0 %v4204_v26  ;;  %3787 = vmatpush3.bf16.msra.mxu1 %v4205_v25 }
 0x9ad   : > { %3760 = vmatprep.subr.bf16.mxu0 %v4206_v0  ;;  %3788 = vmatprep.subr.bf16.mxu1 %v4207_v38 }
 0x9b0   : > { %3761 = vmatpush3.bf16.msra.mxu0 %v4208_v42  ;;  %3789 = vmatpush3.bf16.msra.mxu1 %v4209_v35 }
 0x9b1   : > { %3762 = vmatprep.subr.bf16.mxu0 %v4210_v33  ;;  %3790 = vmatprep.subr.bf16.mxu1 %v4211_v8  ;;  %v3218_v8 = vld [vmem:[%s6247_s4 + $0x20] sm:$0xff] }
 0x9b4   : > { %3763 = vmatpush3.bf16.msra.mxu0 %v4212_v9  ;;  %3791 = vmatpush3.bf16.msra.mxu1 %v4213_v17  ;;  %v3219_v9 = vld [vmem:[%s6247_s4 + $0x28] sm:$0xff]  ;;  %v3214_v17 = vld [vmem:[%s6247_s4] sm:$0xff] }
 0x9b5   : > { %3764 = vmatprep.subr.bf16.mxu0 %v4214_v11  ;;  %3792 = vmatprep.subr.bf16.mxu1 %v4215_v19  ;;  %v3842_v19 = vpack.c.bf16 %v3219_v9, %v3218_v8 }
 0x9b8   : > { %3765 = vmatpush3.bf16.msra.mxu0 %v4216_v20  ;;  %3793 = vmatpush3.bf16.msra.mxu1 %v4217_v43  ;;  %v3215_v20 = vld [vmem:[%s6247_s4 + $0x8] sm:$0xff]  ;;  %v3220_v43 = vld [vmem:[%s6247_s4 + $0x30] sm:$0xff] }
 0x9b9   : > { %3766 = vmatprep.subr.bf16.mxu0 %v4218_v44  ;;  %3794 = vmatprep.subr.bf16.mxu1 %v4219_v45  ;;  %v3221_v44 = vld [vmem:[%s6247_s4 + $0x38] sm:$0xff]  ;;  %v3850_v45 = vpack.c.bf16 %v3215_v20, %v3214_v17 }
 0x9bc   : > { %3767 = vmatpush3.bf16.msra.mxu0 %v4220_v46  ;;  %3795 = vmatpush3.bf16.msra.mxu1 %v4221_v47  ;;  %v3846_v46 = vpack.c.bf16 %v3221_v44, %v3220_v43  ;;  %v3216_v47 = vld [vmem:[%s6247_s4 + $0x10] sm:$0xff] }
 0x9bd   : > { %3843 = vmatprep.subr.bf16.mxu1 %v3842_v19  ;;  %3851 = vmatprep.subr.bf16.mxu0 %v3850_v45 }
 0xa71   : > { %v2764_v49 = vpop.f32.mrb[72].mxu0  ;;  %v2817_v50 = vpop.f32.mrb[72].mxu1 }
 0xa72   : > { %v2766_v52 = vpop.f32.mrb[73].mxu0  ;;  %v2819_v63 = vpop.f32.mrb[73].mxu1  ;;  %v2836_v22 = vmax.f32 %v2764_v49, 0.0  ;;  %v2838_v23 = vmax.f32 %v2817_v50, 0.0  ;;  %v3217_v49 = vld [vmem:[%s6247_s4 + $0x18] sm:$0xff] }
 0xa73   : > { %v2768_v6 = vpop.f32.mrb[74].mxu0  ;;  %v2821_v21 = vpop.f32.mrb[74].mxu1  ;;  %v2837_v55 = vmax.f32 %v2766_v52, 0.0  ;;  %v2839_v57 = vmax.f32 %v2819_v63, 0.0  ;;  %v3854_v63 = vpack.c.bf16 %v3217_v49, %v3216_v47 }
 0xa74   : > { %v2840_v24 = vmax.f32 %v2768_v6, 0.0  ;;  %v2842_v59 = vmax.f32 %v2821_v21, 0.0  ;;  %v2770_v56 = vpop.f32.mrb[75].mxu0  ;;  %v2823_v53 = vpop.f32.mrb[75].mxu1 }
 0xa75   : > { %v2841_v58 = vmax.f32 %v2770_v56, 0.0  ;;  %v2843_v51 = vmax.f32 %v2823_v53, 0.0 }
 0xa76   : > { %v2852_v61 = vpack.c.bf16 %v2840_v24, %v2836_v22  ;;  %v2854_v1 = vpack.c.bf16 %v2842_v59, %v2838_v23 }
 0xa77   : > { %v2853_v7 = vpack.c.bf16 %v2841_v58, %v2837_v55  ;;  %v2855_v48 = vpack.c.bf16 %v2843_v51, %v2839_v57 }
 0xa79   : > { %v2774_v30 = vpop.f32.mrb[76].mxu0  ;;  %v2827_v5 = vpop.f32.mrb[76].mxu1  ;;  %3148 = vmatprep.mubr.bf16.mxu0 %v2853_v7  ;;  %3197 = vmatprep.mubr.bf16.mxu1 %v2855_v48 }
 0xa7a   : > { %v2776_v3 = vpop.f32.mrb[77].mxu0  ;;  %v2829_v41 = vpop.f32.mrb[77].mxu1  ;;  %3149 = vmatmul.mubr.bf16.vlgmr.msra.gmra.mrb[80].mxu0 %v2852_v61  ;;  %3198 = vmatmul.mubr.bf16.vlgmr.msra.gmra.mrb[80].mxu1 %v2854_v1  ;;  %v2844_v10 = vmax.f32 %v2774_v30, 0.0  ;;  %v2846_v27 = vmax.f32 %v2827_v5, 0.0 }
 0xa7b   : > { %v2778_v13 = vpop.f32.mrb[78].mxu0  ;;  %v2831_v29 = vpop.f32.mrb[78].mxu1  ;;  %v2845_v28 = vmax.f32 %v2776_v3, 0.0  ;;  %v2847_v31 = vmax.f32 %v2829_v41, 0.0  ;;  %3845 = vmatpush3.bf16.msra.mxu1 %v3842_v19  ;;  %3853 = vmatpush3.bf16.msra.mxu0 %v3850_v45 }
 0xa7c   : > { %v2848_v37 = vmax.f32 %v2778_v13, 0.0  ;;  %v2850_v32 = vmax.f32 %v2831_v29, 0.0  ;;  %v2780_v34 = vpop.f32.mrb[79].mxu0  ;;  %v2833_v39 = vpop.f32.mrb[79].mxu1  ;;  %3847 = vmatprep.subr.bf16.mxu1 %v3846_v46  ;;  %3855 = vmatprep.subr.bf16.mxu0 %v3854_v63 }
 0xa7d   : > { %v2849_v40 = vmax.f32 %v2780_v34, 0.0  ;;  %v2851_v4 = vmax.f32 %v2833_v39, 0.0 }
 0xa7e   : > { %v2856_v16 = vpack.c.bf16 %v2848_v37, %v2844_v10  ;;  %v2858_v12 = vpack.c.bf16 %v2850_v32, %v2846_v27  ;;  %v3747_v27 = vld [vmem:[%s6248_s5] ss:$0 sm:$0xff] }
 0xa7f   : > { %v2857_v15 = vpack.c.bf16 %v2849_v40, %v2845_v28  ;;  %v2859_v18 = vpack.c.bf16 %v2851_v4, %v2847_v31  ;;  %3849 = vmatpush3.bf16.msra.mxu1 %v3846_v46  ;;  %3857 = vmatpush3.bf16.msra.mxu0 %v3854_v63 }
 0xa81   : > { %3156 = vmatprep.mubr.bf16.mxu0 %v2857_v15  ;;  %3205 = vmatprep.mubr.bf16.mxu1 %v2859_v18 }
 0xa82   : > { %3157 = vmatmul.mubr.bf16.gmra.mrb[84].mxu0 %v2856_v16  ;;  %3206 = vmatmul.mubr.bf16.gmra.mrb[84].mxu1 %v2858_v12 }
 0xb4d   : > { %v3768_v60 = vpop.f32.mrb[80].mxu0  ;;  %v3796_v54 = vpop.f32.mrb[80].mxu1 }
 0xb4e   : > { %v3769_v62 = vpop.f32.mrb[81].mxu0  ;;  %v3797_v2 = vpop.f32.mrb[81].mxu1 }
 0xb4f   : > { %v3770_v36 = vadd.f32 %v3769_v62, %v3768_v60  ;;  %v3798_v14 = vadd.f32 %v3797_v2, %v3796_v54  ;;  %v3771_v26 = vpop.f32.mrb[82].mxu0  ;;  %v3799_v25 = vpop.f32.mrb[82].mxu1 }
 0xb50   : > { %v3772_v0 = vpop.f32.mrb[83].mxu0  ;;  %v3800_v38 = vpop.f32.mrb[83].mxu1 }
 0xb51   : > { %v3773_v42 = vadd.f32 %v3772_v0, %v3771_v26  ;;  %v3801_v35 = vadd.f32 %v3800_v38, %v3799_v25  ;;  %v3200_v33 = vadd.f32 %v3798_v14, %v3770_v36 }
 0xb53   : > { %v3203_v11 = vadd.f32 %v3801_v35, %v3773_v42  ;;  %3226 = vrot.lane.b32.xlu0 %v3200_v33, %s4430_s24 }
 0xb55   : > { %v3774_v50 = vpop.f32.mrb[84].mxu0  ;;  %v3802_v52 = vpop.f32.mrb[84].mxu1 }
 0xb56   : > { %v3775_v6 = vpop.f32.mrb[85].mxu0  ;;  %v3803_v21 = vpop.f32.mrb[85].mxu1 }
 0xb57   : > { %v3776_v22 = vadd.f32 %v3775_v6, %v3774_v50  ;;  %v3804_v23 = vadd.f32 %v3803_v21, %v3802_v52  ;;  %v3805_v24 = vpop.f32.mrb[86].mxu1  ;;  %3228 = vrot.lane.b32.xlu0 %v3203_v11, %s4430_s24  ;;  %v3777_v59 = vpop.f32.mrb[86].mxu0 }
 0xb58   : > { %v3778_v56 = vpop.f32.mrb[87].mxu0  ;;  %v3806_v53 = vpop.f32.mrb[87].mxu1 }
 0xb59   : > { %v3779_v55 = vadd.f32 %v3778_v56, %v3777_v59  ;;  %v3807_v57 = vadd.f32 %v3806_v53, %v3805_v24  ;;  %v3208_v58 = vadd.f32 %v3804_v23, %v3776_v22 }
 0xb5b   : > { %v3211_v51 = vadd.f32 %v3807_v57, %v3779_v55  ;;  %3230 = vrot.lane.b32.xlu1 %v3208_v58, %s4430_s24 }
 0xb5f   : > { %3232 = vrot.lane.b32.xlu1 %v3211_v51, %s4430_s24 }
 0xb88   : > { %3351 = vxpose.xlu1.b32.start [1/4] (short) (narrow) %v3200_v33, 16 }
 0xb8c   : > { %3352 = vxpose.xlu1.b32.cont [2/4] (short) (narrow) %v3203_v11, 16 }
 0xb90   : > { %3353 = vxpose.xlu1.b32.cont [3/4] (short) (narrow) %v3208_v58, 16 }
 0xb94   : > { %3354 = vxpose.xlu1.b32.end [4/4] (short) (narrow) %v3211_v51, 16 }
 0xbc5   : > { %v3227_v61 = vpop.permute.xlu0 %3226 }
 0xbc6   : > { %3238 = vxpose.xlu0.b32.start [1/4] (short) (narrow) %v3227_v61, 16 }
 0xbc9   : > { %v3229_v1 = vpop.permute.xlu0 %3228 }
 0xbca   : > { %3239 = vxpose.xlu0.b32.cont [2/4] (short) (narrow) %v3229_v1, 16 }
 0xbcd   : > { %v3231_v7 = vpop.permute.xlu1 %3230 }
 0xbce   : > { %3240 = vxpose.xlu0.b32.cont [3/4] (short) (narrow) %v3231_v7, 16 }
 0xbd1   : > { %v3233_v48 = vpop.permute.xlu1 %3232 }
 0xbd2   : > { %3241 = vxpose.xlu0.b32.end [4/4] (short) (narrow) %v3233_v48, 16 }
 0xc08   : > { %v3367_v30 = vpop.trf.xlu1 }
 0xc09   : > { %3839 = vmatprep.mubr.msk.f32.mxu0 %vm1323_vm0, %v3367_v30 }
 0xc0c   : > { %v3368_v5 = vpop.trf.xlu1 }
 0xc0d   : > { %3840 = vmatmul.mubr.msk.f32.vlgmr.msra.gmra.mrb[88].mxu0 %vm1323_vm0, %v3368_v5 }
 0xc46   : > { %v3254_v3 = vpop.trf.xlu0 }
 0xc47   : > { %3828 = vmatprep.mubr.msk.f32.mxu1 %vm1323_vm0, %v3254_v3 }
 0xc4a   : > { %v3255_v41 = vpop.trf.xlu0 }
 0xc4b   : > { %3829 = vmatmul.mubr.msk.f32.vlgmr.msra.gmra.mrb[88].mxu1 %vm1323_vm0, %v3255_v41 }
 0xce0   : > { %v3841_v13 = vpop.f32.mrb[88].mxu0 }
 0xce1   : > { %v3455_v29 = vpop.f32.mrb[89].mxu0 }
 0xd1e   : > { %v3830_v10 = vpop.f32.mrb[88].mxu1 }
 0xd1f   : > { %v3461_v37 = vadd.f32 %v3841_v13, %v3830_v10  ;;  %v3342_v32 = vpop.f32.mrb[89].mxu1 }
 0xd20   : > { %v3456_v34 = vadd.f32 %v3455_v29, %v3342_v32 }
 0xd21   : > { %v3472_v39 = vadd.f32 %v3747_v27, %v3461_v37 }
 0xd22   : > { %v3471_v28 = vadd.f32 %v3747_v27, %v3456_v34 }
 0xd23   : > { %3475 = vst.msk [vmem:[%s271_s13 + $0x8] sm:$0xff] %vm3473_vm1, %v3472_v39 }
 0xd24   : > { %3474 = vst.msk [vmem:[%s271_s13] sm:$0xff] %vm3473_vm1, %v3471_v28 }
 0xd25 PF: > { %p16_p8 = scmp.ge.s32.totalorder %s4488_s26, 4   ;;  %s6909_s21 = smov %s4416_s22 }
 0xd26   : > { %s6910_s22 = smov %s4420_s23  ;;  %s6911_s23 = smov %s4498_s29 }
 0xd27   : > { %s6912_s24 = smov %s4488_s26  ;;  %18 = sbr.rel (!%p16_p8) target bundleno = 3 (0x3), region = 84 }
 0xd2e   :  { %3497 = vsyncpa [#allocation3], 1 }
 0xd2f   :  { %3499 = vsyncpa [#allocation3 + $0x1], 1 }

</bundles_post_ra>
